<compile_context>
chip_gen: v7x
topology: tpu7x:2x2x1
jax: 0.10.0
libtpu: 0.0.40
codegen_flags: <defaults>
</compile_context>

<pallas_src>
import functools
import math

import numpy as np
import jax
import jax.numpy as jnp
from jax.experimental import pallas as pl
from jax.experimental.pallas import tpu as pltpu


KERNEL_SIZES = [7, 3, 3, 3, 3]   # mask_conv_0 .. mask_conv_4
LOW_THRESH = 0.2
C_FEAT = 256
PBLK = 128                       # pyramids per lane-packed block


# ----------------------------------------------------------------------------
# Fused kernel: feature conv (MXU) + per-pyramid mask conv + bias + sigmoid.
# ----------------------------------------------------------------------------
def _fused_mask_kernel(xpad_ref, wf_ref, m_ref, wm_ref, b_ref, o_ref, mpad_scr,
                       *, H, W, k, Wp):
    # xpad_ref : (Hp*Wp, 256)  zero-padded feature, spatial-major / channel-minor
    # wf_ref   : (256, k*k)    feature-channel conv weights, tap = dh*k + dw
    # m_ref    : (H, W, 128)   lane-packed last-masks for this pyramid block
    # wm_ref   : (k*k,)  SMEM  mask-channel conv weights
    # b_ref    : (1,)    SMEM  conv bias
    # o_ref    : (H, W, 128)   sigmoid masks (lane-dense stores)
    # mpad_scr : (Hp, Wp, 128) VMEM scratch: spatially zero-padded masks
    pad = k // 2

    # (1) Channel contraction on the MXU: one matmul replaces k*k cross-lane
    #     XLU reductions.  taps[y*Wp + x, dh*k + dw] = sum_c xpad[y,x,c]*Wf[c,dh,dw]
    taps = jnp.dot(xpad_ref[...], wf_ref[...],
                   preferred_element_type=jnp.float32)      # (Hp*Wp, k*k)

    # (2) Spatial zero-padding of the mask block done in VMEM (no XLA pad pass).
    mpad_scr[...] = jnp.zeros_like(mpad_scr)
    mpad_scr[pad:pad + H, pad:pad + W, :] = m_ref[...]

    bias = b_ref[0]

    # (3) Per output row: shift-add the feature taps into a (W, 1) column
    #     (sublane layout -> broadcasts across the 128 pyramid lanes for free),
    #     accumulate the k*k mask taps over the lane-packed pyramids, epilogue.
    for h in range(H):
        base = jnp.zeros((W, 1), jnp.float32)
        macc = jnp.zeros((W, o_ref.shape[-1]), jnp.float32)
        for dh in range(k):
            y = h + dh
            row0 = y * Wp
            for dw in range(k):
                t = dh * k + dw
                base = base + taps[row0 + dw:row0 + dw + W, t:t + 1]
                macc = macc + mpad_scr[y, dw:dw + W, :] * wm_ref[t]
        o_ref[h] = jax.nn.sigmoid(base + macc + bias)


def _fused_call(feat_chw, last_hwp, w_feat, w_mask, bias, k):
    """Run the fused kernel for one level / one group of pyramids."""
    C, H, W = feat_chw.shape
    P = last_hwp.shape[-1]
    pad = k // 2
    Hp, Wp = H + 2 * pad, W + 2 * pad
    Pp = ((P + PBLK - 1) // PBLK) * PBLK

    # Feature: NCHW slice -> HWC, 'same' zero pad, flatten for the MXU matmul
    # (single fused XLA copy; the transpose is needed for channel-minor anyway).
    xpad = jnp.pad(jnp.transpose(feat_chw, (1, 2, 0)),
                   ((pad, pad), (pad, pad), (0, 0))).reshape(Hp * Wp, C)
    # Pad the pyramid (lane) axis to a multiple of 128; padded lanes are junk
    # in the output and get sliced away below.
    masks_in = jnp.pad(last_hwp, ((0, 0), (0, 0), (0, Pp - P)))
    wm = w_mask.reshape(k * k)
    b = jnp.reshape(bias, (1,))

    kern = functools.partial(_fused_mask_kernel, H=H, W=W, k=k, Wp=Wp)
    out = pl.pallas_call(
        kern,
        out_shape=jax.ShapeDtypeStruct((H, W, Pp), jnp.float32),
        grid=(Pp // PBLK,),
        in_specs=[
            pl.BlockSpec((Hp * Wp, C), lambda p: (0, 0)),
            pl.BlockSpec((C, k * k), lambda p: (0, 0)),
            pl.BlockSpec((H, W, PBLK), lambda p: (0, 0, p)),
            pl.BlockSpec(memory_space=pltpu.MemorySpace.SMEM),
            pl.BlockSpec(memory_space=pltpu.MemorySpace.SMEM),
        ],
        out_specs=pl.BlockSpec((H, W, PBLK), lambda p: (0, 0, p)),
        scratch_shapes=[pltpu.VMEM((Hp, Wp, PBLK), jnp.float32)],
        compiler_params=pltpu.CompilerParams(
            dimension_semantics=("parallel",),          # v7x: shard P blocks on 2 TCs
            vmem_limit_bytes=48 * 1024 * 1024),         # headroom on v5e defaults
    )(xpad, w_feat, masks_in, wm, b)
    return out[:, :, :P]


# ----------------------------------------------------------------------------
# JITted per-level drivers (batched over all pyramids of the call).
# ----------------------------------------------------------------------------
def bilinear_resize_hwp(x, out_h, out_w):
    # x: (Hin, Win, P) -> (out_h, out_w, P); matches F.interpolate(bilinear,
    # align_corners=False).
    in_h, in_w = x.shape[0], x.shape[1]
    sy, sx = in_h / out_h, in_w / out_w
    ys = jnp.clip((jnp.arange(out_h, dtype=jnp.float32) + 0.5) * sy - 0.5,
                  0.0, in_h - 1)
    xs = jnp.clip((jnp.arange(out_w, dtype=jnp.float32) + 0.5) * sx - 0.5,
                  0.0, in_w - 1)
    y0 = jnp.floor(ys).astype(jnp.int32)
    x0 = jnp.floor(xs).astype(jnp.int32)
    y1 = jnp.minimum(y0 + 1, in_h - 1)
    x1 = jnp.minimum(x0 + 1, in_w - 1)
    wy = (ys - y0.astype(jnp.float32))[:, None, None]
    wx = (xs - x0.astype(jnp.float32))[None, :, None]

    def g(yy, xx):
        return x[yy[:, None], xx[None, :], :]

    top = g(y0, x0) * (1.0 - wx) + g(y0, x1) * wx
    bot = g(y1, x0) * (1.0 - wx) + g(y1, x1) * wx
    return top * (1.0 - wy) + bot * wy


@functools.partial(jax.jit, static_argnames=("k",))
def _level_step(feat_chw, prev_masks_hwp, w_feat, w_mask, bias, *, k):
    H, W = feat_chw.shape[-2:]
    last = bilinear_resize_hwp(prev_masks_hwp, H, W)
    return _fused_call(feat_chw, last, w_feat, w_mask, bias, k)


@functools.partial(jax.jit, static_argnames=("k",))
def _level_init(feat_chw, pos_h, pos_w, w_feat, w_mask, bias, *, k):
    H, W = feat_chw.shape[-2:]
    P = pos_h.shape[0]
    last = jnp.zeros((H, W, P), jnp.float32).at[pos_h, pos_w,
                                                jnp.arange(P)].set(1.0)
    return _fused_call(feat_chw, last, w_feat, w_mask, bias, k)


# ----------------------------------------------------------------------------
# Module glue (eval path).
# ----------------------------------------------------------------------------
class InstancePyramid:
    def __init__(self, pos, init_pub_level, level_sizes):
        self.pos = pos
        self.init_level = init_pub_level
        self.level_sizes = level_sizes
        self.masks = {}          # rel level -> (lane-packed stack, column)

    def set_mask(self, pub_level, stack, col):
        self.masks[pub_level - self.init_level] = (stack, col)

    def get_mask_ref(self, pub_level):
        return self.masks[pub_level - self.init_level]

    def get_mask(self, pub_level):
        stack, col = self.masks[pub_level - self.init_level]
        return stack[:, :, col]


def _gather_level_masks(pyramids, pub_level):
    """Stack masks for a pyramid list without per-pyramid device slicing."""
    pieces = []
    i, n = 0, len(pyramids)
    while i < n:
        stack, c0 = pyramids[i].get_mask_ref(pub_level)
        j, c_last = i, c0
        while j + 1 < n:
            s2, c2 = pyramids[j + 1].get_mask_ref(pub_level)
            if s2 is stack and c2 == c_last + 1:
                j += 1
                c_last = c2
            else:
                break
        pieces.append(stack[:, :, c0:c_last + 1])
        i = j + 1
    return pieces[0] if len(pieces) == 1 else jnp.concatenate(pieces, axis=-1)


def init_params(key):
    """mask_conv_l: Conv2d(257, 1, k) with kaiming_normal_ weights."""
    params = []
    for k in KERNEL_SIZES:
        key, kw, kb = jax.random.split(key, 3)
        fan_in = (C_FEAT + 1) * k * k
        std = math.sqrt(2.0 / fan_in)
        w_full = jax.random.normal(kw, (C_FEAT + 1, k, k), jnp.float32) * std
        bound = 1.0 / math.sqrt(fan_in)
        b = jax.random.uniform(kb, (), jnp.float32, -bound, bound)
        w_feat = w_full[:C_FEAT].reshape(C_FEAT, k * k)   # (256, k*k), tap=dh*k+dw
        w_mask = w_full[C_FEAT]                           # (k, k)
        params.append((w_feat, w_mask, b))
    return params


def compute_mask(params, level, feature_nchw, pyramids, is_init=False):
    if not pyramids:
        return None
    k = KERNEL_SIZES[level]
    w_feat, w_mask, bias = params[level]
    feat_chw = feature_nchw[0]                            # (256, H, W)
    if is_init:
        ph = jnp.asarray(np.array([p.pos[0] for p in pyramids], np.int32))
        pw = jnp.asarray(np.array([p.pos[1] for p in pyramids], np.int32))
        masks = _level_init(feat_chw, ph, pw, w_feat, w_mask, bias, k=k)
    else:
        prev = _gather_level_masks(pyramids, level - 1)   # (Hprev, Wprev, P)
        masks = _level_step(feat_chw, prev, w_feat, w_mask, bias, k=k)
    for idx, pyr in enumerate(pyramids):
        pyr.set_mask(level, masks, idx)                   # lazy ref, no slicing
    return masks


def maskfirst_forward(params, fs_fpn):
    # fs_fpn: FPN outputs fine -> coarse, each (N, 256, H, W) float32
    fs = fs_fpn[::-1]                                     # coarse -> fine
    level_sizes = [tuple(f.shape[-2:]) for f in fs]
    N = fs[0].shape[0]
    test_masks = []
    for i in range(N):
        # level 0: one pyramid per position of the coarsest feature map
        x_curr = fs[0][i:i + 1]
        H0, W0 = level_sizes[0]
        pyrs = [InstancePyramid((h, w), 0, level_sizes)
                for h in range(H0) for w in range(W0)]
        compute_mask(params, 0, x_curr, pyrs, True)

        for curr_level in (1, 2):
            x_curr = fs[curr_level][i:i + 1]
            masks = compute_mask(params, curr_level, x_curr, pyrs)
            # device-side max over pyramids; one small (H, W) host transfer to
            # spawn the data-dependent new pyramids
            maxed = np.asarray(jnp.max(masks, axis=-1))
            new_pos = [tuple(int(v) for v in rc)
                       for rc in np.argwhere(maxed < LOW_THRESH)]
            new_pyrs = [InstancePyramid(pos, curr_level, level_sizes)
                        for pos in new_pos]
            compute_mask(params, curr_level, x_curr, new_pyrs, True)
            pyrs += new_pyrs
        test_masks.append(pyrs)
    return test_masks


if __name__ == "__main__":
    key = jax.random.PRNGKey(0)
    kp, kf = jax.random.split(key)
    params = init_params(kp)

    # Synthetic FPN features (fine -> coarse), N=2 images, 256 channels.
    N = 2
    sizes = [(32, 32), (16, 16), (8, 8), (4, 4), (2, 2)]
    fs_fpn = []
    for s in sizes:
        kf, sub = jax.random.split(kf)
        fs_fpn.append(jax.random.normal(sub, (N, C_FEAT, s[0], s[1]),
                                        jnp.float32))

    test_masks = maskfirst_forward(params, fs_fpn)

    # block on the final (level-2) masks of every image (lane-packed stacks)
    for i in range(N):
        final = _gather_level_masks(test_masks[i], 2)     # (H2, W2, P_total)
        jax.block_until_ready(final)
    print("KERNEL_OK")
</pallas_src>

<mosaic_0001>
module attributes {stable_mosaic.version = 11 : i64} {
  func.func @_fused_mask_kernel(%arg0: i32, %arg1: memref<64x256xf32, #tpu.memory_space<vmem>>, %arg2: memref<256x49xf32, #tpu.memory_space<vmem>>, %arg3: memref<2x2x128xf32, #tpu.memory_space<vmem>>, %arg4: memref<49xf32, #tpu.memory_space<smem>>, %arg5: memref<1xf32, #tpu.memory_space<smem>>, %arg6: memref<2x2x128xf32, #tpu.memory_space<vmem>>, %arg7: memref<8x8x128xf32, #tpu.memory_space<vmem>>) attributes {dimension_semantics = [#tpu.dimension_semantics<parallel>], iteration_bounds = array<i64: 1>, scalar_prefetch = 0 : i64, scratch_operands = 1 : i64, tpu.core_type = #tpu.core_type<tc>, window_params = [{pipeline_mode = #tpu.pipeline_mode<synchronous>, transform_indices = @transform_0, window_bounds = array<i64: 64, 256>}, {pipeline_mode = #tpu.pipeline_mode<synchronous>, transform_indices = @transform_1, window_bounds = array<i64: 256, 49>}, {transform_indices = @transform_2, window_bounds = array<i64: 2, 2, 128>}, {transform_indices = @transform_3, window_bounds = array<i64: 49>}, {transform_indices = @transform_4, window_bounds = array<i64: 1>}, {transform_indices = @transform_5, window_bounds = array<i64: 2, 2, 128>}]} {
    %c0 = arith.constant 0 : index
    %c0_0 = arith.constant 0 : index
    %0 = vector.load %arg1[%c0, %c0_0] : memref<64x256xf32, #tpu.memory_space<vmem>>, vector<64x256xf32>
    %c0_1 = arith.constant 0 : index
    %c0_2 = arith.constant 0 : index
    %1 = vector.load %arg2[%c0_1, %c0_2] : memref<256x49xf32, #tpu.memory_space<vmem>>, vector<256x49xf32>
    %cst = arith.constant dense<0.000000e+00> : vector<64x49xf32>
    %2 = tpu.matmul %0, %1, %cst {dimension_numbers = #tpu.dot_dimension_numbers<[1], [0], [0], [1], [0, 0, 1, 1], [], []>} : vector<64x256xf32>, vector<256x49xf32>, vector<64x49xf32> -> vector<64x49xf32>
    %cst_3 = arith.constant 0.000000e+00 : f32
    %3 = vector.broadcast %cst_3 : f32 to vector<8x8x128xf32>
    %c0_4 = arith.constant 0 : index
    %c0_5 = arith.constant 0 : index
    %c0_6 = arith.constant 0 : index
    %4 = vector.load %arg7[%c0_4, %c0_5, %c0_6] : memref<8x8x128xf32, #tpu.memory_space<vmem>>, vector<8x8x128xf32>
    tpu.vector_store %arg7[%c0_4, %c0_5, %c0_6], %3 {strides = array<i32>} : memref<8x8x128xf32, #tpu.memory_space<vmem>>, vector<8x8x128xf32>,
    %c0_7 = arith.constant 0 : index
    %c0_8 = arith.constant 0 : index
    %c0_9 = arith.constant 0 : index
    %5 = vector.load %arg3[%c0_7, %c0_8, %c0_9] : memref<2x2x128xf32, #tpu.memory_space<vmem>>, vector<2x2x128xf32>
    %c3 = arith.constant 3 : index
    %c3_10 = arith.constant 3 : index
    %c0_11 = arith.constant 0 : index
    %6 = vector.load %arg7[%c3, %c3_10, %c0_11] : memref<8x8x128xf32, #tpu.memory_space<vmem>>, vector<2x2x128xf32>
    tpu.vector_store %arg7[%c3, %c3_10, %c0_11], %5 {strides = array<i32>} : memref<8x8x128xf32, #tpu.memory_space<vmem>>, vector<2x2x128xf32>,
    %c0_12 = arith.constant 0 : index
    %7 = memref.load %arg5[%c0_12] : memref<1xf32, #tpu.memory_space<smem>>
    %cst_13 = arith.constant 0.000000e+00 : f32
    %8 = vector.broadcast %cst_13 : f32 to vector<2x1xf32>
    %cst_14 = arith.constant 0.000000e+00 : f32
    %9 = vector.broadcast %cst_14 : f32 to vector<2x128xf32>
    %10 = vector.extract_strided_slice %2 {offsets = [0, 0], sizes = [2, 1], strides = [1, 1]} : vector<64x49xf32> to vector<2x1xf32>
    %11 = arith.addf %8, %10 : vector<2x1xf32>
    %c0_15 = arith.constant 0 : index
    %c0_16 = arith.constant 0 : index
    %c0_17 = arith.constant 0 : index
    %12 = vector.load %arg7[%c0_15, %c0_16, %c0_17] : memref<8x8x128xf32, #tpu.memory_space<vmem>>, vector<1x2x128xf32>
    %13 = vector.shape_cast %12 : vector<1x2x128xf32> to vector<2x128xf32>
    %c0_18 = arith.constant 0 : index
    %14 = memref.load %arg4[%c0_18] : memref<49xf32, #tpu.memory_space<smem>>
    %15 = vector.broadcast %14 : f32 to vector<2x128xf32>
    %16 = arith.mulf %13, %15 : vector<2x128xf32>
    %17 = arith.addf %9, %16 : vector<2x128xf32>
    %18 = vector.extract_strided_slice %2 {offsets = [1, 1], sizes = [2, 1], strides = [1, 1]} : vector<64x49xf32> to vector<2x1xf32>
    %19 = arith.addf %11, %18 : vector<2x1xf32>
    %c0_19 = arith.constant 0 : index
    %c1 = arith.constant 1 : index
    %c0_20 = arith.constant 0 : index
    %20 = vector.load %arg7[%c0_19, %c1, %c0_20] : memref<8x8x128xf32, #tpu.memory_space<vmem>>, vector<1x2x128xf32>
    %21 = vector.shape_cast %20 : vector<1x2x128xf32> to vector<2x128xf32>
    %c1_21 = arith.constant 1 : index
    %22 = memref.load %arg4[%c1_21] : memref<49xf32, #tpu.memory_space<smem>>
    %23 = vector.broadcast %22 : f32 to vector<2x128xf32>
    %24 = arith.mulf %21, %23 : vector<2x128xf32>
    %25 = arith.addf %17, %24 : vector<2x128xf32>
    %26 = vector.extract_strided_slice %2 {offsets = [2, 2], sizes = [2, 1], strides = [1, 1]} : vector<64x49xf32> to vector<2x1xf32>
    %27 = arith.addf %19, %26 : vector<2x1xf32>
    %c0_22 = arith.constant 0 : index
    %c2 = arith.constant 2 : index
    %c0_23 = arith.constant 0 : index
    %28 = vector.load %arg7[%c0_22, %c2, %c0_23] : memref<8x8x128xf32, #tpu.memory_space<vmem>>, vector<1x2x128xf32>
    %29 = vector.shape_cast %28 : vector<1x2x128xf32> to vector<2x128xf32>
    %c2_24 = arith.constant 2 : index
    %30 = memref.load %arg4[%c2_24] : memref<49xf32, #tpu.memory_space<smem>>
    %31 = vector.broadcast %30 : f32 to vector<2x128xf32>
    %32 = arith.mulf %29, %31 : vector<2x128xf32>
    %33 = arith.addf %25, %32 : vector<2x128xf32>
    %34 = vector.extract_strided_slice %2 {offsets = [3, 3], sizes = [2, 1], strides = [1, 1]} : vector<64x49xf32> to vector<2x1xf32>
    %35 = arith.addf %27, %34 : vector<2x1xf32>
    %c0_25 = arith.constant 0 : index
    %c3_26 = arith.constant 3 : index
    %c0_27 = arith.constant 0 : index
    %36 = vector.load %arg7[%c0_25, %c3_26, %c0_27] : memref<8x8x128xf32, #tpu.memory_space<vmem>>, vector<1x2x128xf32>
    %37 = vector.shape_cast %36 : vector<1x2x128xf32> to vector<2x128xf32>
    %c3_28 = arith.constant 3 : index
    %38 = memref.load %arg4[%c3_28] : memref<49xf32, #tpu.memory_space<smem>>
    %39 = vector.broadcast %38 : f32 to vector<2x128xf32>
    %40 = arith.mulf %37, %39 : vector<2x128xf32>
    %41 = arith.addf %33, %40 : vector<2x128xf32>
    %42 = vector.extract_strided_slice %2 {offsets = [4, 4], sizes = [2, 1], strides = [1, 1]} : vector<64x49xf32> to vector<2x1xf32>
    %43 = arith.addf %35, %42 : vector<2x1xf32>
    %c0_29 = arith.constant 0 : index
    %c4 = arith.constant 4 : index
    %c0_30 = arith.constant 0 : index
    %44 = vector.load %arg7[%c0_29, %c4, %c0_30] : memref<8x8x128xf32, #tpu.memory_space<vmem>>, vector<1x2x128xf32>
    %45 = vector.shape_cast %44 : vector<1x2x128xf32> to vector<2x128xf32>
    %c4_31 = arith.constant 4 : index
    %46 = memref.load %arg4[%c4_31] : memref<49xf32, #tpu.memory_space<smem>>
    %47 = vector.broadcast %46 : f32 to vector<2x128xf32>
    %48 = arith.mulf %45, %47 : vector<2x128xf32>
    %49 = arith.addf %41, %48 : vector<2x128xf32>
    %50 = vector.extract_strided_slice %2 {offsets = [5, 5], sizes = [2, 1], strides = [1, 1]} : vector<64x49xf32> to vector<2x1xf32>
    %51 = arith.addf %43, %50 : vector<2x1xf32>
    %c0_32 = arith.constant 0 : index
    %c5 = arith.constant 5 : index
    %c0_33 = arith.constant 0 : index
    %52 = vector.load %arg7[%c0_32, %c5, %c0_33] : memref<8x8x128xf32, #tpu.memory_space<vmem>>, vector<1x2x128xf32>
    %53 = vector.shape_cast %52 : vector<1x2x128xf32> to vector<2x128xf32>
    %c5_34 = arith.constant 5 : index
    %54 = memref.load %arg4[%c5_34] : memref<49xf32, #tpu.memory_space<smem>>
    %55 = vector.broadcast %54 : f32 to vector<2x128xf32>
    %56 = arith.mulf %53, %55 : vector<2x128xf32>
    %57 = arith.addf %49, %56 : vector<2x128xf32>
    %58 = vector.extract_strided_slice %2 {offsets = [6, 6], sizes = [2, 1], strides = [1, 1]} : vector<64x49xf32> to vector<2x1xf32>
    %59 = arith.addf %51, %58 : vector<2x1xf32>
    %c0_35 = arith.constant 0 : index
    %c6 = arith.constant 6 : index
    %c0_36 = arith.constant 0 : index
    %60 = vector.load %arg7[%c0_35, %c6, %c0_36] : memref<8x8x128xf32, #tpu.memory_space<vmem>>, vector<1x2x128xf32>
    %61 = vector.shape_cast %60 : vector<1x2x128xf32> to vector<2x128xf32>
    %c6_37 = arith.constant 6 : index
    %62 = memref.load %arg4[%c6_37] : memref<49xf32, #tpu.memory_space<smem>>
    %63 = vector.broadcast %62 : f32 to vector<2x128xf32>
    %64 = arith.mulf %61, %63 : vector<2x128xf32>
    %65 = arith.addf %57, %64 : vector<2x128xf32>
    %66 = vector.extract_strided_slice %2 {offsets = [8, 7], sizes = [2, 1], strides = [1, 1]} : vector<64x49xf32> to vector<2x1xf32>
    %67 = arith.addf %59, %66 : vector<2x1xf32>
    %c1_38 = arith.constant 1 : index
    %c0_39 = arith.constant 0 : index
    %c0_40 = arith.constant 0 : index
    %68 = vector.load %arg7[%c1_38, %c0_39, %c0_40] : memref<8x8x128xf32, #tpu.memory_space<vmem>>, vector<1x2x128xf32>
    %69 = vector.shape_cast %68 : vector<1x2x128xf32> to vector<2x128xf32>
    %c7 = arith.constant 7 : index
    %70 = memref.load %arg4[%c7] : memref<49xf32, #tpu.memory_space<smem>>
    %71 = vector.broadcast %70 : f32 to vector<2x128xf32>
    %72 = arith.mulf %69, %71 : vector<2x128xf32>
    %73 = arith.addf %65, %72 : vector<2x128xf32>
    %74 = vector.extract_strided_slice %2 {offsets = [9, 8], sizes = [2, 1], strides = [1, 1]} : vector<64x49xf32> to vector<2x1xf32>
    %75 = arith.addf %67, %74 : vector<2x1xf32>
    %c1_41 = arith.constant 1 : index
    %c1_42 = arith.constant 1 : index
    %c0_43 = arith.constant 0 : index
    %76 = vector.load %arg7[%c1_41, %c1_42, %c0_43] : memref<8x8x128xf32, #tpu.memory_space<vmem>>, vector<1x2x128xf32>
    %77 = vector.shape_cast %76 : vector<1x2x128xf32> to vector<2x128xf32>
    %c8 = arith.constant 8 : index
    %78 = memref.load %arg4[%c8] : memref<49xf32, #tpu.memory_space<smem>>
    %79 = vector.broadcast %78 : f32 to vector<2x128xf32>
    %80 = arith.mulf %77, %79 : vector<2x128xf32>
    %81 = arith.addf %73, %80 : vector<2x128xf32>
    %82 = vector.extract_strided_slice %2 {offsets = [10, 9], sizes = [2, 1], strides = [1, 1]} : vector<64x49xf32> to vector<2x1xf32>
    %83 = arith.addf %75, %82 : vector<2x1xf32>
    %c1_44 = arith.constant 1 : index
    %c2_45 = arith.constant 2 : index
    %c0_46 = arith.constant 0 : index
    %84 = vector.load %arg7[%c1_44, %c2_45, %c0_46] : memref<8x8x128xf32, #tpu.memory_space<vmem>>, vector<1x2x128xf32>
    %85 = vector.shape_cast %84 : vector<1x2x128xf32> to vector<2x128xf32>
    %c9 = arith.constant 9 : index
    %86 = memref.load %arg4[%c9] : memref<49xf32, #tpu.memory_space<smem>>
    %87 = vector.broadcast %86 : f32 to vector<2x128xf32>
    %88 = arith.mulf %85, %87 : vector<2x128xf32>
    %89 = arith.addf %81, %88 : vector<2x128xf32>
    %90 = vector.extract_strided_slice %2 {offsets = [11, 10], sizes = [2, 1], strides = [1, 1]} : vector<64x49xf32> to vector<2x1xf32>
    %91 = arith.addf %83, %90 : vector<2x1xf32>
    %c1_47 = arith.constant 1 : index
    %c3_48 = arith.constant 3 : index
    %c0_49 = arith.constant 0 : index
    %92 = vector.load %arg7[%c1_47, %c3_48, %c0_49] : memref<8x8x128xf32, #tpu.memory_space<vmem>>, vector<1x2x128xf32>
    %93 = vector.shape_cast %92 : vector<1x2x128xf32> to vector<2x128xf32>
    %c10 = arith.constant 10 : index
    %94 = memref.load %arg4[%c10] : memref<49xf32, #tpu.memory_space<smem>>
    %95 = vector.broadcast %94 : f32 to vector<2x128xf32>
    %96 = arith.mulf %93, %95 : vector<2x128xf32>
    %97 = arith.addf %89, %96 : vector<2x128xf32>
    %98 = vector.extract_strided_slice %2 {offsets = [12, 11], sizes = [2, 1], strides = [1, 1]} : vector<64x49xf32> to vector<2x1xf32>
    %99 = arith.addf %91, %98 : vector<2x1xf32>
    %c1_50 = arith.constant 1 : index
    %c4_51 = arith.constant 4 : index
    %c0_52 = arith.constant 0 : index
    %100 = vector.load %arg7[%c1_50, %c4_51, %c0_52] : memref<8x8x128xf32, #tpu.memory_space<vmem>>, vector<1x2x128xf32>
    %101 = vector.shape_cast %100 : vector<1x2x128xf32> to vector<2x128xf32>
    %c11 = arith.constant 11 : index
    %102 = memref.load %arg4[%c11] : memref<49xf32, #tpu.memory_space<smem>>
    %103 = vector.broadcast %102 : f32 to vector<2x128xf32>
    %104 = arith.mulf %101, %103 : vector<2x128xf32>
    %105 = arith.addf %97, %104 : vector<2x128xf32>
    %106 = vector.extract_strided_slice %2 {offsets = [13, 12], sizes = [2, 1], strides = [1, 1]} : vector<64x49xf32> to vector<2x1xf32>
    %107 = arith.addf %99, %106 : vector<2x1xf32>
    %c1_53 = arith.constant 1 : index
    %c5_54 = arith.constant 5 : index
    %c0_55 = arith.constant 0 : index
    %108 = vector.load %arg7[%c1_53, %c5_54, %c0_55] : memref<8x8x128xf32, #tpu.memory_space<vmem>>, vector<1x2x128xf32>
    %109 = vector.shape_cast %108 : vector<1x2x128xf32> to vector<2x128xf32>
    %c12 = arith.constant 12 : index
    %110 = memref.load %arg4[%c12] : memref<49xf32, #tpu.memory_space<smem>>
    %111 = vector.broadcast %110 : f32 to vector<2x128xf32>
    %112 = arith.mulf %109, %111 : vector<2x128xf32>
    %113 = arith.addf %105, %112 : vector<2x128xf32>
    %114 = vector.extract_strided_slice %2 {offsets = [14, 13], sizes = [2, 1], strides = [1, 1]} : vector<64x49xf32> to vector<2x1xf32>
    %115 = arith.addf %107, %114 : vector<2x1xf32>
    %c1_56 = arith.constant 1 : index
    %c6_57 = arith.constant 6 : index
    %c0_58 = arith.constant 0 : index
    %116 = vector.load %arg7[%c1_56, %c6_57, %c0_58] : memref<8x8x128xf32, #tpu.memory_space<vmem>>, vector<1x2x128xf32>
    %117 = vector.shape_cast %116 : vector<1x2x128xf32> to vector<2x128xf32>
    %c13 = arith.constant 13 : index
    %118 = memref.load %arg4[%c13] : memref<49xf32, #tpu.memory_space<smem>>
    %119 = vector.broadcast %118 : f32 to vector<2x128xf32>
    %120 = arith.mulf %117, %119 : vector<2x128xf32>
    %121 = arith.addf %113, %120 : vector<2x128xf32>
    %122 = vector.extract_strided_slice %2 {offsets = [16, 14], sizes = [2, 1], strides = [1, 1]} : vector<64x49xf32> to vector<2x1xf32>
    %123 = arith.addf %115, %122 : vector<2x1xf32>
    %c2_59 = arith.constant 2 : index
    %c0_60 = arith.constant 0 : index
    %c0_61 = arith.constant 0 : index
    %124 = vector.load %arg7[%c2_59, %c0_60, %c0_61] : memref<8x8x128xf32, #tpu.memory_space<vmem>>, vector<1x2x128xf32>
    %125 = vector.shape_cast %124 : vector<1x2x128xf32> to vector<2x128xf32>
    %c14 = arith.constant 14 : index
    %126 = memref.load %arg4[%c14] : memref<49xf32, #tpu.memory_space<smem>>
    %127 = vector.broadcast %126 : f32 to vector<2x128xf32>
    %128 = arith.mulf %125, %127 : vector<2x128xf32>
    %129 = arith.addf %121, %128 : vector<2x128xf32>
    %130 = vector.extract_strided_slice %2 {offsets = [17, 15], sizes = [2, 1], strides = [1, 1]} : vector<64x49xf32> to vector<2x1xf32>
    %131 = arith.addf %123, %130 : vector<2x1xf32>
    %c2_62 = arith.constant 2 : index
    %c1_63 = arith.constant 1 : index
    %c0_64 = arith.constant 0 : index
    %132 = vector.load %arg7[%c2_62, %c1_63, %c0_64] : memref<8x8x128xf32, #tpu.memory_space<vmem>>, vector<1x2x128xf32>
    %133 = vector.shape_cast %132 : vector<1x2x128xf32> to vector<2x128xf32>
    %c15 = arith.constant 15 : index
    %134 = memref.load %arg4[%c15] : memref<49xf32, #tpu.memory_space<smem>>
    %135 = vector.broadcast %134 : f32 to vector<2x128xf32>
    %136 = arith.mulf %133, %135 : vector<2x128xf32>
    %137 = arith.addf %129, %136 : vector<2x128xf32>
    %138 = vector.extract_strided_slice %2 {offsets = [18, 16], sizes = [2, 1], strides = [1, 1]} : vector<64x49xf32> to vector<2x1xf32>
    %139 = arith.addf %131, %138 : vector<2x1xf32>
    %c2_65 = arith.constant 2 : index
    %c2_66 = arith.constant 2 : index
    %c0_67 = arith.constant 0 : index
    %140 = vector.load %arg7[%c2_65, %c2_66, %c0_67] : memref<8x8x128xf32, #tpu.memory_space<vmem>>, vector<1x2x128xf32>
    %141 = vector.shape_cast %140 : vector<1x2x128xf32> to vector<2x128xf32>
    %c16 = arith.constant 16 : index
    %142 = memref.load %arg4[%c16] : memref<49xf32, #tpu.memory_space<smem>>
    %143 = vector.broadcast %142 : f32 to vector<2x128xf32>
    %144 = arith.mulf %141, %143 : vector<2x128xf32>
    %145 = arith.addf %137, %144 : vector<2x128xf32>
    %146 = vector.extract_strided_slice %2 {offsets = [19, 17], sizes = [2, 1], strides = [1, 1]} : vector<64x49xf32> to vector<2x1xf32>
    %147 = arith.addf %139, %146 : vector<2x1xf32>
    %c2_68 = arith.constant 2 : index
    %c3_69 = arith.constant 3 : index
    %c0_70 = arith.constant 0 : index
    %148 = vector.load %arg7[%c2_68, %c3_69, %c0_70] : memref<8x8x128xf32, #tpu.memory_space<vmem>>, vector<1x2x128xf32>
    %149 = vector.shape_cast %148 : vector<1x2x128xf32> to vector<2x128xf32>
    %c17 = arith.constant 17 : index
    %150 = memref.load %arg4[%c17] : memref<49xf32, #tpu.memory_space<smem>>
    %151 = vector.broadcast %150 : f32 to vector<2x128xf32>
    %152 = arith.mulf %149, %151 : vector<2x128xf32>
    %153 = arith.addf %145, %152 : vector<2x128xf32>
    %154 = vector.extract_strided_slice %2 {offsets = [20, 18], sizes = [2, 1], strides = [1, 1]} : vector<64x49xf32> to vector<2x1xf32>
    %155 = arith.addf %147, %154 : vector<2x1xf32>
    %c2_71 = arith.constant 2 : index
    %c4_72 = arith.constant 4 : index
    %c0_73 = arith.constant 0 : index
    %156 = vector.load %arg7[%c2_71, %c4_72, %c0_73] : memref<8x8x128xf32, #tpu.memory_space<vmem>>, vector<1x2x128xf32>
    %157 = vector.shape_cast %156 : vector<1x2x128xf32> to vector<2x128xf32>
    %c18 = arith.constant 18 : index
    %158 = memref.load %arg4[%c18] : memref<49xf32, #tpu.memory_space<smem>>
    %159 = vector.broadcast %158 : f32 to vector<2x128xf32>
    %160 = arith.mulf %157, %159 : vector<2x128xf32>
    %161 = arith.addf %153, %160 : vector<2x128xf32>
    %162 = vector.extract_strided_slice %2 {offsets = [21, 19], sizes = [2, 1], strides = [1, 1]} : vector<64x49xf32> to vector<2x1xf32>
    %163 = arith.addf %155, %162 : vector<2x1xf32>
    %c2_74 = arith.constant 2 : index
    %c5_75 = arith.constant 5 : index
    %c0_76 = arith.constant 0 : index
    %164 = vector.load %arg7[%c2_74, %c5_75, %c0_76] : memref<8x8x128xf32, #tpu.memory_space<vmem>>, vector<1x2x128xf32>
    %165 = vector.shape_cast %164 : vector<1x2x128xf32> to vector<2x128xf32>
    %c19 = arith.constant 19 : index
    %166 = memref.load %arg4[%c19] : memref<49xf32, #tpu.memory_space<smem>>
    %167 = vector.broadcast %166 : f32 to vector<2x128xf32>
    %168 = arith.mulf %165, %167 : vector<2x128xf32>
    %169 = arith.addf %161, %168 : vector<2x128xf32>
    %170 = vector.extract_strided_slice %2 {offsets = [22, 20], sizes = [2, 1], strides = [1, 1]} : vector<64x49xf32> to vector<2x1xf32>
    %171 = arith.addf %163, %170 : vector<2x1xf32>
    %c2_77 = arith.constant 2 : index
    %c6_78 = arith.constant 6 : index
    %c0_79 = arith.constant 0 : index
    %172 = vector.load %arg7[%c2_77, %c6_78, %c0_79] : memref<8x8x128xf32, #tpu.memory_space<vmem>>, vector<1x2x128xf32>
    %173 = vector.shape_cast %172 : vector<1x2x128xf32> to vector<2x128xf32>
    %c20 = arith.constant 20 : index
    %174 = memref.load %arg4[%c20] : memref<49xf32, #tpu.memory_space<smem>>
    %175 = vector.broadcast %174 : f32 to vector<2x128xf32>
    %176 = arith.mulf %173, %175 : vector<2x128xf32>
    %177 = arith.addf %169, %176 : vector<2x128xf32>
    %178 = vector.extract_strided_slice %2 {offsets = [24, 21], sizes = [2, 1], strides = [1, 1]} : vector<64x49xf32> to vector<2x1xf32>
    %179 = arith.addf %171, %178 : vector<2x1xf32>
    %c3_80 = arith.constant 3 : index
    %c0_81 = arith.constant 0 : index
    %c0_82 = arith.constant 0 : index
    %180 = vector.load %arg7[%c3_80, %c0_81, %c0_82] : memref<8x8x128xf32, #tpu.memory_space<vmem>>, vector<1x2x128xf32>
    %181 = vector.shape_cast %180 : vector<1x2x128xf32> to vector<2x128xf32>
    %c21 = arith.constant 21 : index
    %182 = memref.load %arg4[%c21] : memref<49xf32, #tpu.memory_space<smem>>
    %183 = vector.broadcast %182 : f32 to vector<2x128xf32>
    %184 = arith.mulf %181, %183 : vector<2x128xf32>
    %185 = arith.addf %177, %184 : vector<2x128xf32>
    %186 = vector.extract_strided_slice %2 {offsets = [25, 22], sizes = [2, 1], strides = [1, 1]} : vector<64x49xf32> to vector<2x1xf32>
    %187 = arith.addf %179, %186 : vector<2x1xf32>
    %c3_83 = arith.constant 3 : index
    %c1_84 = arith.constant 1 : index
    %c0_85 = arith.constant 0 : index
    %188 = vector.load %arg7[%c3_83, %c1_84, %c0_85] : memref<8x8x128xf32, #tpu.memory_space<vmem>>, vector<1x2x128xf32>
    %189 = vector.shape_cast %188 : vector<1x2x128xf32> to vector<2x128xf32>
    %c22 = arith.constant 22 : index
    %190 = memref.load %arg4[%c22] : memref<49xf32, #tpu.memory_space<smem>>
    %191 = vector.broadcast %190 : f32 to vector<2x128xf32>
    %192 = arith.mulf %189, %191 : vector<2x128xf32>
    %193 = arith.addf %185, %192 : vector<2x128xf32>
    %194 = vector.extract_strided_slice %2 {offsets = [26, 23], sizes = [2, 1], strides = [1, 1]} : vector<64x49xf32> to vector<2x1xf32>
    %195 = arith.addf %187, %194 : vector<2x1xf32>
    %c3_86 = arith.constant 3 : index
    %c2_87 = arith.constant 2 : index
    %c0_88 = arith.constant 0 : index
    %196 = vector.load %arg7[%c3_86, %c2_87, %c0_88] : memref<8x8x128xf32, #tpu.memory_space<vmem>>, vector<1x2x128xf32>
    %197 = vector.shape_cast %196 : vector<1x2x128xf32> to vector<2x128xf32>
    %c23 = arith.constant 23 : index
    %198 = memref.load %arg4[%c23] : memref<49xf32, #tpu.memory_space<smem>>
    %199 = vector.broadcast %198 : f32 to vector<2x128xf32>
    %200 = arith.mulf %197, %199 : vector<2x128xf32>
    %201 = arith.addf %193, %200 : vector<2x128xf32>
    %202 = vector.extract_strided_slice %2 {offsets = [27, 24], sizes = [2, 1], strides = [1, 1]} : vector<64x49xf32> to vector<2x1xf32>
    %203 = arith.addf %195, %202 : vector<2x1xf32>
    %c3_89 = arith.constant 3 : index
    %c3_90 = arith.constant 3 : index
    %c0_91 = arith.constant 0 : index
    %204 = vector.load %arg7[%c3_89, %c3_90, %c0_91] : memref<8x8x128xf32, #tpu.memory_space<vmem>>, vector<1x2x128xf32>
    %205 = vector.shape_cast %204 : vector<1x2x128xf32> to vector<2x128xf32>
    %c24 = arith.constant 24 : index
    %206 = memref.load %arg4[%c24] : memref<49xf32, #tpu.memory_space<smem>>
    %207 = vector.broadcast %206 : f32 to vector<2x128xf32>
    %208 = arith.mulf %205, %207 : vector<2x128xf32>
    %209 = arith.addf %201, %208 : vector<2x128xf32>
    %210 = vector.extract_strided_slice %2 {offsets = [28, 25], sizes = [2, 1], strides = [1, 1]} : vector<64x49xf32> to vector<2x1xf32>
    %211 = arith.addf %203, %210 : vector<2x1xf32>
    %c3_92 = arith.constant 3 : index
    %c4_93 = arith.constant 4 : index
    %c0_94 = arith.constant 0 : index
    %212 = vector.load %arg7[%c3_92, %c4_93, %c0_94] : memref<8x8x128xf32, #tpu.memory_space<vmem>>, vector<1x2x128xf32>
    %213 = vector.shape_cast %212 : vector<1x2x128xf32> to vector<2x128xf32>
    %c25 = arith.constant 25 : index
    %214 = memref.load %arg4[%c25] : memref<49xf32, #tpu.memory_space<smem>>
    %215 = vector.broadcast %214 : f32 to vector<2x128xf32>
    %216 = arith.mulf %213, %215 : vector<2x128xf32>
    %217 = arith.addf %209, %216 : vector<2x128xf32>
    %218 = vector.extract_strided_slice %2 {offsets = [29, 26], sizes = [2, 1], strides = [1, 1]} : vector<64x49xf32> to vector<2x1xf32>
    %219 = arith.addf %211, %218 : vector<2x1xf32>
    %c3_95 = arith.constant 3 : index
    %c5_96 = arith.constant 5 : index
    %c0_97 = arith.constant 0 : index
    %220 = vector.load %arg7[%c3_95, %c5_96, %c0_97] : memref<8x8x128xf32, #tpu.memory_space<vmem>>, vector<1x2x128xf32>
    %221 = vector.shape_cast %220 : vector<1x2x128xf32> to vector<2x128xf32>
    %c26 = arith.constant 26 : index
    %222 = memref.load %arg4[%c26] : memref<49xf32, #tpu.memory_space<smem>>
    %223 = vector.broadcast %222 : f32 to vector<2x128xf32>
    %224 = arith.mulf %221, %223 : vector<2x128xf32>
    %225 = arith.addf %217, %224 : vector<2x128xf32>
    %226 = vector.extract_strided_slice %2 {offsets = [30, 27], sizes = [2, 1], strides = [1, 1]} : vector<64x49xf32> to vector<2x1xf32>
    %227 = arith.addf %219, %226 : vector<2x1xf32>
    %c3_98 = arith.constant 3 : index
    %c6_99 = arith.constant 6 : index
    %c0_100 = arith.constant 0 : index
    %228 = vector.load %arg7[%c3_98, %c6_99, %c0_100] : memref<8x8x128xf32, #tpu.memory_space<vmem>>, vector<1x2x128xf32>
    %229 = vector.shape_cast %228 : vector<1x2x128xf32> to vector<2x128xf32>
    %c27 = arith.constant 27 : index
    %230 = memref.load %arg4[%c27] : memref<49xf32, #tpu.memory_space<smem>>
    %231 = vector.broadcast %230 : f32 to vector<2x128xf32>
    %232 = arith.mulf %229, %231 : vector<2x128xf32>
    %233 = arith.addf %225, %232 : vector<2x128xf32>
    %234 = vector.extract_strided_slice %2 {offsets = [32, 28], sizes = [2, 1], strides = [1, 1]} : vector<64x49xf32> to vector<2x1xf32>
    %235 = arith.addf %227, %234 : vector<2x1xf32>
    %c4_101 = arith.constant 4 : index
    %c0_102 = arith.constant 0 : index
    %c0_103 = arith.constant 0 : index
    %236 = vector.load %arg7[%c4_101, %c0_102, %c0_103] : memref<8x8x128xf32, #tpu.memory_space<vmem>>, vector<1x2x128xf32>
    %237 = vector.shape_cast %236 : vector<1x2x128xf32> to vector<2x128xf32>
    %c28 = arith.constant 28 : index
    %238 = memref.load %arg4[%c28] : memref<49xf32, #tpu.memory_space<smem>>
    %239 = vector.broadcast %238 : f32 to vector<2x128xf32>
    %240 = arith.mulf %237, %239 : vector<2x128xf32>
    %241 = arith.addf %233, %240 : vector<2x128xf32>
    %242 = vector.extract_strided_slice %2 {offsets = [33, 29], sizes = [2, 1], strides = [1, 1]} : vector<64x49xf32> to vector<2x1xf32>
    %243 = arith.addf %235, %242 : vector<2x1xf32>
    %c4_104 = arith.constant 4 : index
    %c1_105 = arith.constant 1 : index
    %c0_106 = arith.constant 0 : index
    %244 = vector.load %arg7[%c4_104, %c1_105, %c0_106] : memref<8x8x128xf32, #tpu.memory_space<vmem>>, vector<1x2x128xf32>
    %245 = vector.shape_cast %244 : vector<1x2x128xf32> to vector<2x128xf32>
    %c29 = arith.constant 29 : index
    %246 = memref.load %arg4[%c29] : memref<49xf32, #tpu.memory_space<smem>>
    %247 = vector.broadcast %246 : f32 to vector<2x128xf32>
    %248 = arith.mulf %245, %247 : vector<2x128xf32>
    %249 = arith.addf %241, %248 : vector<2x128xf32>
    %250 = vector.extract_strided_slice %2 {offsets = [34, 30], sizes = [2, 1], strides = [1, 1]} : vector<64x49xf32> to vector<2x1xf32>
    %251 = arith.addf %243, %250 : vector<2x1xf32>
    %c4_107 = arith.constant 4 : index
    %c2_108 = arith.constant 2 : index
    %c0_109 = arith.constant 0 : index
    %252 = vector.load %arg7[%c4_107, %c2_108, %c0_109] : memref<8x8x128xf32, #tpu.memory_space<vmem>>, vector<1x2x128xf32>
    %253 = vector.shape_cast %252 : vector<1x2x128xf32> to vector<2x128xf32>
    %c30 = arith.constant 30 : index
    %254 = memref.load %arg4[%c30] : memref<49xf32, #tpu.memory_space<smem>>
    %255 = vector.broadcast %254 : f32 to vector<2x128xf32>
    %256 = arith.mulf %253, %255 : vector<2x128xf32>
    %257 = arith.addf %249, %256 : vector<2x128xf32>
    %258 = vector.extract_strided_slice %2 {offsets = [35, 31], sizes = [2, 1], strides = [1, 1]} : vector<64x49xf32> to vector<2x1xf32>
    %259 = arith.addf %251, %258 : vector<2x1xf32>
    %c4_110 = arith.constant 4 : index
    %c3_111 = arith.constant 3 : index
    %c0_112 = arith.constant 0 : index
    %260 = vector.load %arg7[%c4_110, %c3_111, %c0_112] : memref<8x8x128xf32, #tpu.memory_space<vmem>>, vector<1x2x128xf32>
    %261 = vector.shape_cast %260 : vector<1x2x128xf32> to vector<2x128xf32>
    %c31 = arith.constant 31 : index
    %262 = memref.load %arg4[%c31] : memref<49xf32, #tpu.memory_space<smem>>
    %263 = vector.broadcast %262 : f32 to vector<2x128xf32>
    %264 = arith.mulf %261, %263 : vector<2x128xf32>
    %265 = arith.addf %257, %264 : vector<2x128xf32>
    %266 = vector.extract_strided_slice %2 {offsets = [36, 32], sizes = [2, 1], strides = [1, 1]} : vector<64x49xf32> to vector<2x1xf32>
    %267 = arith.addf %259, %266 : vector<2x1xf32>
    %c4_113 = arith.constant 4 : index
    %c4_114 = arith.constant 4 : index
    %c0_115 = arith.constant 0 : index
    %268 = vector.load %arg7[%c4_113, %c4_114, %c0_115] : memref<8x8x128xf32, #tpu.memory_space<vmem>>, vector<1x2x128xf32>
    %269 = vector.shape_cast %268 : vector<1x2x128xf32> to vector<2x128xf32>
    %c32 = arith.constant 32 : index
    %270 = memref.load %arg4[%c32] : memref<49xf32, #tpu.memory_space<smem>>
    %271 = vector.broadcast %270 : f32 to vector<2x128xf32>
    %272 = arith.mulf %269, %271 : vector<2x128xf32>
    %273 = arith.addf %265, %272 : vector<2x128xf32>
    %274 = vector.extract_strided_slice %2 {offsets = [37, 33], sizes = [2, 1], strides = [1, 1]} : vector<64x49xf32> to vector<2x1xf32>
    %275 = arith.addf %267, %274 : vector<2x1xf32>
    %c4_116 = arith.constant 4 : index
    %c5_117 = arith.constant 5 : index
    %c0_118 = arith.constant 0 : index
    %276 = vector.load %arg7[%c4_116, %c5_117, %c0_118] : memref<8x8x128xf32, #tpu.memory_space<vmem>>, vector<1x2x128xf32>
    %277 = vector.shape_cast %276 : vector<1x2x128xf32> to vector<2x128xf32>
    %c33 = arith.constant 33 : index
    %278 = memref.load %arg4[%c33] : memref<49xf32, #tpu.memory_space<smem>>
    %279 = vector.broadcast %278 : f32 to vector<2x128xf32>
    %280 = arith.mulf %277, %279 : vector<2x128xf32>
    %281 = arith.addf %273, %280 : vector<2x128xf32>
    %282 = vector.extract_strided_slice %2 {offsets = [38, 34], sizes = [2, 1], strides = [1, 1]} : vector<64x49xf32> to vector<2x1xf32>
    %283 = arith.addf %275, %282 : vector<2x1xf32>
    %c4_119 = arith.constant 4 : index
    %c6_120 = arith.constant 6 : index
    %c0_121 = arith.constant 0 : index
    %284 = vector.load %arg7[%c4_119, %c6_120, %c0_121] : memref<8x8x128xf32, #tpu.memory_space<vmem>>, vector<1x2x128xf32>
    %285 = vector.shape_cast %284 : vector<1x2x128xf32> to vector<2x128xf32>
    %c34 = arith.constant 34 : index
    %286 = memref.load %arg4[%c34] : memref<49xf32, #tpu.memory_space<smem>>
    %287 = vector.broadcast %286 : f32 to vector<2x128xf32>
    %288 = arith.mulf %285, %287 : vector<2x128xf32>
    %289 = arith.addf %281, %288 : vector<2x128xf32>
    %290 = vector.extract_strided_slice %2 {offsets = [40, 35], sizes = [2, 1], strides = [1, 1]} : vector<64x49xf32> to vector<2x1xf32>
    %291 = arith.addf %283, %290 : vector<2x1xf32>
    %c5_122 = arith.constant 5 : index
    %c0_123 = arith.constant 0 : index
    %c0_124 = arith.constant 0 : index
    %292 = vector.load %arg7[%c5_122, %c0_123, %c0_124] : memref<8x8x128xf32, #tpu.memory_space<vmem>>, vector<1x2x128xf32>
    %293 = vector.shape_cast %292 : vector<1x2x128xf32> to vector<2x128xf32>
    %c35 = arith.constant 35 : index
    %294 = memref.load %arg4[%c35] : memref<49xf32, #tpu.memory_space<smem>>
    %295 = vector.broadcast %294 : f32 to vector<2x128xf32>
    %296 = arith.mulf %293, %295 : vector<2x128xf32>
    %297 = arith.addf %289, %296 : vector<2x128xf32>
    %298 = vector.extract_strided_slice %2 {offsets = [41, 36], sizes = [2, 1], strides = [1, 1]} : vector<64x49xf32> to vector<2x1xf32>
    %299 = arith.addf %291, %298 : vector<2x1xf32>
    %c5_125 = arith.constant 5 : index
    %c1_126 = arith.constant 1 : index
    %c0_127 = arith.constant 0 : index
    %300 = vector.load %arg7[%c5_125, %c1_126, %c0_127] : memref<8x8x128xf32, #tpu.memory_space<vmem>>, vector<1x2x128xf32>
    %301 = vector.shape_cast %300 : vector<1x2x128xf32> to vector<2x128xf32>
    %c36 = arith.constant 36 : index
    %302 = memref.load %arg4[%c36] : memref<49xf32, #tpu.memory_space<smem>>
    %303 = vector.broadcast %302 : f32 to vector<2x128xf32>
    %304 = arith.mulf %301, %303 : vector<2x128xf32>
    %305 = arith.addf %297, %304 : vector<2x128xf32>
    %306 = vector.extract_strided_slice %2 {offsets = [42, 37], sizes = [2, 1], strides = [1, 1]} : vector<64x49xf32> to vector<2x1xf32>
    %307 = arith.addf %299, %306 : vector<2x1xf32>
    %c5_128 = arith.constant 5 : index
    %c2_129 = arith.constant 2 : index
    %c0_130 = arith.constant 0 : index
    %308 = vector.load %arg7[%c5_128, %c2_129, %c0_130] : memref<8x8x128xf32, #tpu.memory_space<vmem>>, vector<1x2x128xf32>
    %309 = vector.shape_cast %308 : vector<1x2x128xf32> to vector<2x128xf32>
    %c37 = arith.constant 37 : index
    %310 = memref.load %arg4[%c37] : memref<49xf32, #tpu.memory_space<smem>>
    %311 = vector.broadcast %310 : f32 to vector<2x128xf32>
    %312 = arith.mulf %309, %311 : vector<2x128xf32>
    %313 = arith.addf %305, %312 : vector<2x128xf32>
    %314 = vector.extract_strided_slice %2 {offsets = [43, 38], sizes = [2, 1], strides = [1, 1]} : vector<64x49xf32> to vector<2x1xf32>
    %315 = arith.addf %307, %314 : vector<2x1xf32>
    %c5_131 = arith.constant 5 : index
    %c3_132 = arith.constant 3 : index
    %c0_133 = arith.constant 0 : index
    %316 = vector.load %arg7[%c5_131, %c3_132, %c0_133] : memref<8x8x128xf32, #tpu.memory_space<vmem>>, vector<1x2x128xf32>
    %317 = vector.shape_cast %316 : vector<1x2x128xf32> to vector<2x128xf32>
    %c38 = arith.constant 38 : index
    %318 = memref.load %arg4[%c38] : memref<49xf32, #tpu.memory_space<smem>>
    %319 = vector.broadcast %318 : f32 to vector<2x128xf32>
    %320 = arith.mulf %317, %319 : vector<2x128xf32>
    %321 = arith.addf %313, %320 : vector<2x128xf32>
    %322 = vector.extract_strided_slice %2 {offsets = [44, 39], sizes = [2, 1], strides = [1, 1]} : vector<64x49xf32> to vector<2x1xf32>
    %323 = arith.addf %315, %322 : vector<2x1xf32>
    %c5_134 = arith.constant 5 : index
    %c4_135 = arith.constant 4 : index
    %c0_136 = arith.constant 0 : index
    %324 = vector.load %arg7[%c5_134, %c4_135, %c0_136] : memref<8x8x128xf32, #tpu.memory_space<vmem>>, vector<1x2x128xf32>
    %325 = vector.shape_cast %324 : vector<1x2x128xf32> to vector<2x128xf32>
    %c39 = arith.constant 39 : index
    %326 = memref.load %arg4[%c39] : memref<49xf32, #tpu.memory_space<smem>>
    %327 = vector.broadcast %326 : f32 to vector<2x128xf32>
    %328 = arith.mulf %325, %327 : vector<2x128xf32>
    %329 = arith.addf %321, %328 : vector<2x128xf32>
    %330 = vector.extract_strided_slice %2 {offsets = [45, 40], sizes = [2, 1], strides = [1, 1]} : vector<64x49xf32> to vector<2x1xf32>
    %331 = arith.addf %323, %330 : vector<2x1xf32>
    %c5_137 = arith.constant 5 : index
    %c5_138 = arith.constant 5 : index
    %c0_139 = arith.constant 0 : index
    %332 = vector.load %arg7[%c5_137, %c5_138, %c0_139] : memref<8x8x128xf32, #tpu.memory_space<vmem>>, vector<1x2x128xf32>
    %333 = vector.shape_cast %332 : vector<1x2x128xf32> to vector<2x128xf32>
    %c40 = arith.constant 40 : index
    %334 = memref.load %arg4[%c40] : memref<49xf32, #tpu.memory_space<smem>>
    %335 = vector.broadcast %334 : f32 to vector<2x128xf32>
    %336 = arith.mulf %333, %335 : vector<2x128xf32>
    %337 = arith.addf %329, %336 : vector<2x128xf32>
    %338 = vector.extract_strided_slice %2 {offsets = [46, 41], sizes = [2, 1], strides = [1, 1]} : vector<64x49xf32> to vector<2x1xf32>
    %339 = arith.addf %331, %338 : vector<2x1xf32>
    %c5_140 = arith.constant 5 : index
    %c6_141 = arith.constant 6 : index
    %c0_142 = arith.constant 0 : index
    %340 = vector.load %arg7[%c5_140, %c6_141, %c0_142] : memref<8x8x128xf32, #tpu.memory_space<vmem>>, vector<1x2x128xf32>
    %341 = vector.shape_cast %340 : vector<1x2x128xf32> to vector<2x128xf32>
    %c41 = arith.constant 41 : index
    %342 = memref.load %arg4[%c41] : memref<49xf32, #tpu.memory_space<smem>>
    %343 = vector.broadcast %342 : f32 to vector<2x128xf32>
    %344 = arith.mulf %341, %343 : vector<2x128xf32>
    %345 = arith.addf %337, %344 : vector<2x128xf32>
    %346 = vector.extract_strided_slice %2 {offsets = [48, 42], sizes = [2, 1], strides = [1, 1]} : vector<64x49xf32> to vector<2x1xf32>
    %347 = arith.addf %339, %346 : vector<2x1xf32>
    %c6_143 = arith.constant 6 : index
    %c0_144 = arith.constant 0 : index
    %c0_145 = arith.constant 0 : index
    %348 = vector.load %arg7[%c6_143, %c0_144, %c0_145] : memref<8x8x128xf32, #tpu.memory_space<vmem>>, vector<1x2x128xf32>
    %349 = vector.shape_cast %348 : vector<1x2x128xf32> to vector<2x128xf32>
    %c42 = arith.constant 42 : index
    %350 = memref.load %arg4[%c42] : memref<49xf32, #tpu.memory_space<smem>>
    %351 = vector.broadcast %350 : f32 to vector<2x128xf32>
    %352 = arith.mulf %349, %351 : vector<2x128xf32>
    %353 = arith.addf %345, %352 : vector<2x128xf32>
    %354 = vector.extract_strided_slice %2 {offsets = [49, 43], sizes = [2, 1], strides = [1, 1]} : vector<64x49xf32> to vector<2x1xf32>
    %355 = arith.addf %347, %354 : vector<2x1xf32>
    %c6_146 = arith.constant 6 : index
    %c1_147 = arith.constant 1 : index
    %c0_148 = arith.constant 0 : index
    %356 = vector.load %arg7[%c6_146, %c1_147, %c0_148] : memref<8x8x128xf32, #tpu.memory_space<vmem>>, vector<1x2x128xf32>
    %357 = vector.shape_cast %356 : vector<1x2x128xf32> to vector<2x128xf32>
    %c43 = arith.constant 43 : index
    %358 = memref.load %arg4[%c43] : memref<49xf32, #tpu.memory_space<smem>>
    %359 = vector.broadcast %358 : f32 to vector<2x128xf32>
    %360 = arith.mulf %357, %359 : vector<2x128xf32>
    %361 = arith.addf %353, %360 : vector<2x128xf32>
    %362 = vector.extract_strided_slice %2 {offsets = [50, 44], sizes = [2, 1], strides = [1, 1]} : vector<64x49xf32> to vector<2x1xf32>
    %363 = arith.addf %355, %362 : vector<2x1xf32>
    %c6_149 = arith.constant 6 : index
    %c2_150 = arith.constant 2 : index
    %c0_151 = arith.constant 0 : index
    %364 = vector.load %arg7[%c6_149, %c2_150, %c0_151] : memref<8x8x128xf32, #tpu.memory_space<vmem>>, vector<1x2x128xf32>
    %365 = vector.shape_cast %364 : vector<1x2x128xf32> to vector<2x128xf32>
    %c44 = arith.constant 44 : index
    %366 = memref.load %arg4[%c44] : memref<49xf32, #tpu.memory_space<smem>>
    %367 = vector.broadcast %366 : f32 to vector<2x128xf32>
    %368 = arith.mulf %365, %367 : vector<2x128xf32>
    %369 = arith.addf %361, %368 : vector<2x128xf32>
    %370 = vector.extract_strided_slice %2 {offsets = [51, 45], sizes = [2, 1], strides = [1, 1]} : vector<64x49xf32> to vector<2x1xf32>
    %371 = arith.addf %363, %370 : vector<2x1xf32>
    %c6_152 = arith.constant 6 : index
    %c3_153 = arith.constant 3 : index
    %c0_154 = arith.constant 0 : index
    %372 = vector.load %arg7[%c6_152, %c3_153, %c0_154] : memref<8x8x128xf32, #tpu.memory_space<vmem>>, vector<1x2x128xf32>
    %373 = vector.shape_cast %372 : vector<1x2x128xf32> to vector<2x128xf32>
    %c45 = arith.constant 45 : index
    %374 = memref.load %arg4[%c45] : memref<49xf32, #tpu.memory_space<smem>>
    %375 = vector.broadcast %374 : f32 to vector<2x128xf32>
    %376 = arith.mulf %373, %375 : vector<2x128xf32>
    %377 = arith.addf %369, %376 : vector<2x128xf32>
    %378 = vector.extract_strided_slice %2 {offsets = [52, 46], sizes = [2, 1], strides = [1, 1]} : vector<64x49xf32> to vector<2x1xf32>
    %379 = arith.addf %371, %378 : vector<2x1xf32>
    %c6_155 = arith.constant 6 : index
    %c4_156 = arith.constant 4 : index
    %c0_157 = arith.constant 0 : index
    %380 = vector.load %arg7[%c6_155, %c4_156, %c0_157] : memref<8x8x128xf32, #tpu.memory_space<vmem>>, vector<1x2x128xf32>
    %381 = vector.shape_cast %380 : vector<1x2x128xf32> to vector<2x128xf32>
    %c46 = arith.constant 46 : index
    %382 = memref.load %arg4[%c46] : memref<49xf32, #tpu.memory_space<smem>>
    %383 = vector.broadcast %382 : f32 to vector<2x128xf32>
    %384 = arith.mulf %381, %383 : vector<2x128xf32>
    %385 = arith.addf %377, %384 : vector<2x128xf32>
    %386 = vector.extract_strided_slice %2 {offsets = [53, 47], sizes = [2, 1], strides = [1, 1]} : vector<64x49xf32> to vector<2x1xf32>
    %387 = arith.addf %379, %386 : vector<2x1xf32>
    %c6_158 = arith.constant 6 : index
    %c5_159 = arith.constant 5 : index
    %c0_160 = arith.constant 0 : index
    %388 = vector.load %arg7[%c6_158, %c5_159, %c0_160] : memref<8x8x128xf32, #tpu.memory_space<vmem>>, vector<1x2x128xf32>
    %389 = vector.shape_cast %388 : vector<1x2x128xf32> to vector<2x128xf32>
    %c47 = arith.constant 47 : index
    %390 = memref.load %arg4[%c47] : memref<49xf32, #tpu.memory_space<smem>>
    %391 = vector.broadcast %390 : f32 to vector<2x128xf32>
    %392 = arith.mulf %389, %391 : vector<2x128xf32>
    %393 = arith.addf %385, %392 : vector<2x128xf32>
    %394 = vector.extract_strided_slice %2 {offsets = [54, 48], sizes = [2, 1], strides = [1, 1]} : vector<64x49xf32> to vector<2x1xf32>
    %395 = arith.addf %387, %394 : vector<2x1xf32>
    %c6_161 = arith.constant 6 : index
    %c6_162 = arith.constant 6 : index
    %c0_163 = arith.constant 0 : index
    %396 = vector.load %arg7[%c6_161, %c6_162, %c0_163] : memref<8x8x128xf32, #tpu.memory_space<vmem>>, vector<1x2x128xf32>
    %397 = vector.shape_cast %396 : vector<1x2x128xf32> to vector<2x128xf32>
    %c48 = arith.constant 48 : index
    %398 = memref.load %arg4[%c48] : memref<49xf32, #tpu.memory_space<smem>>
    %399 = vector.broadcast %398 : f32 to vector<2x128xf32>
    %400 = arith.mulf %397, %399 : vector<2x128xf32>
    %401 = arith.addf %393, %400 : vector<2x128xf32>
    %402 = vector.broadcast %395 : vector<2x1xf32> to vector<2x128xf32>
    %403 = arith.addf %402, %401 : vector<2x128xf32>
    %404 = vector.broadcast %7 : f32 to vector<2x128xf32>
    %405 = arith.addf %403, %404 : vector<2x128xf32>
    %406 = arith.negf %405 : vector<2x128xf32>
    %407 = math.exp %406 : vector<2x128xf32>
    %cst_164 = arith.constant 1.000000e+00 : f32
    %408 = vector.broadcast %cst_164 : f32 to vector<2x128xf32>
    %409 = arith.addf %408, %407 : vector<2x128xf32>
    %410 = arith.divf %408, %409 : vector<2x128xf32>
    %c0_165 = arith.constant 0 : index
    %c0_166 = arith.constant 0 : index
    %c0_167 = arith.constant 0 : index
    %411 = vector.load %arg6[%c0_165, %c0_166, %c0_167] : memref<2x2x128xf32, #tpu.memory_space<vmem>>, vector<1x2x128xf32>
    %412 = vector.shape_cast %411 : vector<1x2x128xf32> to vector<2x128xf32>
    %413 = vector.shape_cast %410 : vector<2x128xf32> to vector<1x2x128xf32>
    tpu.vector_store %arg6[%c0_165, %c0_166, %c0_167], %413 {strides = array<i32>} : memref<2x2x128xf32, #tpu.memory_space<vmem>>, vector<1x2x128xf32>,
    %cst_168 = arith.constant 0.000000e+00 : f32
    %414 = vector.broadcast %cst_168 : f32 to vector<2x1xf32>
    %cst_169 = arith.constant 0.000000e+00 : f32
    %415 = vector.broadcast %cst_169 : f32 to vector<2x128xf32>
    %416 = vector.extract_strided_slice %2 {offsets = [8, 0], sizes = [2, 1], strides = [1, 1]} : vector<64x49xf32> to vector<2x1xf32>
    %417 = arith.addf %414, %416 : vector<2x1xf32>
    %c1_170 = arith.constant 1 : index
    %c0_171 = arith.constant 0 : index
    %c0_172 = arith.constant 0 : index
    %418 = vector.load %arg7[%c1_170, %c0_171, %c0_172] : memref<8x8x128xf32, #tpu.memory_space<vmem>>, vector<1x2x128xf32>
    %419 = vector.shape_cast %418 : vector<1x2x128xf32> to vector<2x128xf32>
    %c0_173 = arith.constant 0 : index
    %420 = memref.load %arg4[%c0_173] : memref<49xf32, #tpu.memory_space<smem>>
    %421 = vector.broadcast %420 : f32 to vector<2x128xf32>
    %422 = arith.mulf %419, %421 : vector<2x128xf32>
    %423 = arith.addf %415, %422 : vector<2x128xf32>
    %424 = vector.extract_strided_slice %2 {offsets = [9, 1], sizes = [2, 1], strides = [1, 1]} : vector<64x49xf32> to vector<2x1xf32>
    %425 = arith.addf %417, %424 : vector<2x1xf32>
    %c1_174 = arith.constant 1 : index
    %c1_175 = arith.constant 1 : index
    %c0_176 = arith.constant 0 : index
    %426 = vector.load %arg7[%c1_174, %c1_175, %c0_176] : memref<8x8x128xf32, #tpu.memory_space<vmem>>, vector<1x2x128xf32>
    %427 = vector.shape_cast %426 : vector<1x2x128xf32> to vector<2x128xf32>
    %c1_177 = arith.constant 1 : index
    %428 = memref.load %arg4[%c1_177] : memref<49xf32, #tpu.memory_space<smem>>
    %429 = vector.broadcast %428 : f32 to vector<2x128xf32>
    %430 = arith.mulf %427, %429 : vector<2x128xf32>
    %431 = arith.addf %423, %430 : vector<2x128xf32>
    %432 = vector.extract_strided_slice %2 {offsets = [10, 2], sizes = [2, 1], strides = [1, 1]} : vector<64x49xf32> to vector<2x1xf32>
    %433 = arith.addf %425, %432 : vector<2x1xf32>
    %c1_178 = arith.constant 1 : index
    %c2_179 = arith.constant 2 : index
    %c0_180 = arith.constant 0 : index
    %434 = vector.load %arg7[%c1_178, %c2_179, %c0_180] : memref<8x8x128xf32, #tpu.memory_space<vmem>>, vector<1x2x128xf32>
    %435 = vector.shape_cast %434 : vector<1x2x128xf32> to vector<2x128xf32>
    %c2_181 = arith.constant 2 : index
    %436 = memref.load %arg4[%c2_181] : memref<49xf32, #tpu.memory_space<smem>>
    %437 = vector.broadcast %436 : f32 to vector<2x128xf32>
    %438 = arith.mulf %435, %437 : vector<2x128xf32>
    %439 = arith.addf %431, %438 : vector<2x128xf32>
    %440 = vector.extract_strided_slice %2 {offsets = [11, 3], sizes = [2, 1], strides = [1, 1]} : vector<64x49xf32> to vector<2x1xf32>
    %441 = arith.addf %433, %440 : vector<2x1xf32>
    %c1_182 = arith.constant 1 : index
    %c3_183 = arith.constant 3 : index
    %c0_184 = arith.constant 0 : index
    %442 = vector.load %arg7[%c1_182, %c3_183, %c0_184] : memref<8x8x128xf32, #tpu.memory_space<vmem>>, vector<1x2x128xf32>
    %443 = vector.shape_cast %442 : vector<1x2x128xf32> to vector<2x128xf32>
    %c3_185 = arith.constant 3 : index
    %444 = memref.load %arg4[%c3_185] : memref<49xf32, #tpu.memory_space<smem>>
    %445 = vector.broadcast %444 : f32 to vector<2x128xf32>
    %446 = arith.mulf %443, %445 : vector<2x128xf32>
    %447 = arith.addf %439, %446 : vector<2x128xf32>
    %448 = vector.extract_strided_slice %2 {offsets = [12, 4], sizes = [2, 1], strides = [1, 1]} : vector<64x49xf32> to vector<2x1xf32>
    %449 = arith.addf %441, %448 : vector<2x1xf32>
    %c1_186 = arith.constant 1 : index
    %c4_187 = arith.constant 4 : index
    %c0_188 = arith.constant 0 : index
    %450 = vector.load %arg7[%c1_186, %c4_187, %c0_188] : memref<8x8x128xf32, #tpu.memory_space<vmem>>, vector<1x2x128xf32>
    %451 = vector.shape_cast %450 : vector<1x2x128xf32> to vector<2x128xf32>
    %c4_189 = arith.constant 4 : index
    %452 = memref.load %arg4[%c4_189] : memref<49xf32, #tpu.memory_space<smem>>
    %453 = vector.broadcast %452 : f32 to vector<2x128xf32>
    %454 = arith.mulf %451, %453 : vector<2x128xf32>
    %455 = arith.addf %447, %454 : vector<2x128xf32>
    %456 = vector.extract_strided_slice %2 {offsets = [13, 5], sizes = [2, 1], strides = [1, 1]} : vector<64x49xf32> to vector<2x1xf32>
    %457 = arith.addf %449, %456 : vector<2x1xf32>
    %c1_190 = arith.constant 1 : index
    %c5_191 = arith.constant 5 : index
    %c0_192 = arith.constant 0 : index
    %458 = vector.load %arg7[%c1_190, %c5_191, %c0_192] : memref<8x8x128xf32, #tpu.memory_space<vmem>>, vector<1x2x128xf32>
    %459 = vector.shape_cast %458 : vector<1x2x128xf32> to vector<2x128xf32>
    %c5_193 = arith.constant 5 : index
    %460 = memref.load %arg4[%c5_193] : memref<49xf32, #tpu.memory_space<smem>>
    %461 = vector.broadcast %460 : f32 to vector<2x128xf32>
    %462 = arith.mulf %459, %461 : vector<2x128xf32>
    %463 = arith.addf %455, %462 : vector<2x128xf32>
    %464 = vector.extract_strided_slice %2 {offsets = [14, 6], sizes = [2, 1], strides = [1, 1]} : vector<64x49xf32> to vector<2x1xf32>
    %465 = arith.addf %457, %464 : vector<2x1xf32>
    %c1_194 = arith.constant 1 : index
    %c6_195 = arith.constant 6 : index
    %c0_196 = arith.constant 0 : index
    %466 = vector.load %arg7[%c1_194, %c6_195, %c0_196] : memref<8x8x128xf32, #tpu.memory_space<vmem>>, vector<1x2x128xf32>
    %467 = vector.shape_cast %466 : vector<1x2x128xf32> to vector<2x128xf32>
    %c6_197 = arith.constant 6 : index
    %468 = memref.load %arg4[%c6_197] : memref<49xf32, #tpu.memory_space<smem>>
    %469 = vector.broadcast %468 : f32 to vector<2x128xf32>
    %470 = arith.mulf %467, %469 : vector<2x128xf32>
    %471 = arith.addf %463, %470 : vector<2x128xf32>
    %472 = vector.extract_strided_slice %2 {offsets = [16, 7], sizes = [2, 1], strides = [1, 1]} : vector<64x49xf32> to vector<2x1xf32>
    %473 = arith.addf %465, %472 : vector<2x1xf32>
    %c2_198 = arith.constant 2 : index
    %c0_199 = arith.constant 0 : index
    %c0_200 = arith.constant 0 : index
    %474 = vector.load %arg7[%c2_198, %c0_199, %c0_200] : memref<8x8x128xf32, #tpu.memory_space<vmem>>, vector<1x2x128xf32>
    %475 = vector.shape_cast %474 : vector<1x2x128xf32> to vector<2x128xf32>
    %c7_201 = arith.constant 7 : index
    %476 = memref.load %arg4[%c7_201] : memref<49xf32, #tpu.memory_space<smem>>
    %477 = vector.broadcast %476 : f32 to vector<2x128xf32>
    %478 = arith.mulf %475, %477 : vector<2x128xf32>
    %479 = arith.addf %471, %478 : vector<2x128xf32>
    %480 = vector.extract_strided_slice %2 {offsets = [17, 8], sizes = [2, 1], strides = [1, 1]} : vector<64x49xf32> to vector<2x1xf32>
    %481 = arith.addf %473, %480 : vector<2x1xf32>
    %c2_202 = arith.constant 2 : index
    %c1_203 = arith.constant 1 : index
    %c0_204 = arith.constant 0 : index
    %482 = vector.load %arg7[%c2_202, %c1_203, %c0_204] : memref<8x8x128xf32, #tpu.memory_space<vmem>>, vector<1x2x128xf32>
    %483 = vector.shape_cast %482 : vector<1x2x128xf32> to vector<2x128xf32>
    %c8_205 = arith.constant 8 : index
    %484 = memref.load %arg4[%c8_205] : memref<49xf32, #tpu.memory_space<smem>>
    %485 = vector.broadcast %484 : f32 to vector<2x128xf32>
    %486 = arith.mulf %483, %485 : vector<2x128xf32>
    %487 = arith.addf %479, %486 : vector<2x128xf32>
    %488 = vector.extract_strided_slice %2 {offsets = [18, 9], sizes = [2, 1], strides = [1, 1]} : vector<64x49xf32> to vector<2x1xf32>
    %489 = arith.addf %481, %488 : vector<2x1xf32>
    %c2_206 = arith.constant 2 : index
    %c2_207 = arith.constant 2 : index
    %c0_208 = arith.constant 0 : index
    %490 = vector.load %arg7[%c2_206, %c2_207, %c0_208] : memref<8x8x128xf32, #tpu.memory_space<vmem>>, vector<1x2x128xf32>
    %491 = vector.shape_cast %490 : vector<1x2x128xf32> to vector<2x128xf32>
    %c9_209 = arith.constant 9 : index
    %492 = memref.load %arg4[%c9_209] : memref<49xf32, #tpu.memory_space<smem>>
    %493 = vector.broadcast %492 : f32 to vector<2x128xf32>
    %494 = arith.mulf %491, %493 : vector<2x128xf32>
    %495 = arith.addf %487, %494 : vector<2x128xf32>
    %496 = vector.extract_strided_slice %2 {offsets = [19, 10], sizes = [2, 1], strides = [1, 1]} : vector<64x49xf32> to vector<2x1xf32>
    %497 = arith.addf %489, %496 : vector<2x1xf32>
    %c2_210 = arith.constant 2 : index
    %c3_211 = arith.constant 3 : index
    %c0_212 = arith.constant 0 : index
    %498 = vector.load %arg7[%c2_210, %c3_211, %c0_212] : memref<8x8x128xf32, #tpu.memory_space<vmem>>, vector<1x2x128xf32>
    %499 = vector.shape_cast %498 : vector<1x2x128xf32> to vector<2x128xf32>
    %c10_213 = arith.constant 10 : index
    %500 = memref.load %arg4[%c10_213] : memref<49xf32, #tpu.memory_space<smem>>
    %501 = vector.broadcast %500 : f32 to vector<2x128xf32>
    %502 = arith.mulf %499, %501 : vector<2x128xf32>
    %503 = arith.addf %495, %502 : vector<2x128xf32>
    %504 = vector.extract_strided_slice %2 {offsets = [20, 11], sizes = [2, 1], strides = [1, 1]} : vector<64x49xf32> to vector<2x1xf32>
    %505 = arith.addf %497, %504 : vector<2x1xf32>
    %c2_214 = arith.constant 2 : index
    %c4_215 = arith.constant 4 : index
    %c0_216 = arith.constant 0 : index
    %506 = vector.load %arg7[%c2_214, %c4_215, %c0_216] : memref<8x8x128xf32, #tpu.memory_space<vmem>>, vector<1x2x128xf32>
    %507 = vector.shape_cast %506 : vector<1x2x128xf32> to vector<2x128xf32>
    %c11_217 = arith.constant 11 : index
    %508 = memref.load %arg4[%c11_217] : memref<49xf32, #tpu.memory_space<smem>>
    %509 = vector.broadcast %508 : f32 to vector<2x128xf32>
    %510 = arith.mulf %507, %509 : vector<2x128xf32>
    %511 = arith.addf %503, %510 : vector<2x128xf32>
    %512 = vector.extract_strided_slice %2 {offsets = [21, 12], sizes = [2, 1], strides = [1, 1]} : vector<64x49xf32> to vector<2x1xf32>
    %513 = arith.addf %505, %512 : vector<2x1xf32>
    %c2_218 = arith.constant 2 : index
    %c5_219 = arith.constant 5 : index
    %c0_220 = arith.constant 0 : index
    %514 = vector.load %arg7[%c2_218, %c5_219, %c0_220] : memref<8x8x128xf32, #tpu.memory_space<vmem>>, vector<1x2x128xf32>
    %515 = vector.shape_cast %514 : vector<1x2x128xf32> to vector<2x128xf32>
    %c12_221 = arith.constant 12 : index
    %516 = memref.load %arg4[%c12_221] : memref<49xf32, #tpu.memory_space<smem>>
    %517 = vector.broadcast %516 : f32 to vector<2x128xf32>
    %518 = arith.mulf %515, %517 : vector<2x128xf32>
    %519 = arith.addf %511, %518 : vector<2x128xf32>
    %520 = vector.extract_strided_slice %2 {offsets = [22, 13], sizes = [2, 1], strides = [1, 1]} : vector<64x49xf32> to vector<2x1xf32>
    %521 = arith.addf %513, %520 : vector<2x1xf32>
    %c2_222 = arith.constant 2 : index
    %c6_223 = arith.constant 6 : index
    %c0_224 = arith.constant 0 : index
    %522 = vector.load %arg7[%c2_222, %c6_223, %c0_224] : memref<8x8x128xf32, #tpu.memory_space<vmem>>, vector<1x2x128xf32>
    %523 = vector.shape_cast %522 : vector<1x2x128xf32> to vector<2x128xf32>
    %c13_225 = arith.constant 13 : index
    %524 = memref.load %arg4[%c13_225] : memref<49xf32, #tpu.memory_space<smem>>
    %525 = vector.broadcast %524 : f32 to vector<2x128xf32>
    %526 = arith.mulf %523, %525 : vector<2x128xf32>
    %527 = arith.addf %519, %526 : vector<2x128xf32>
    %528 = vector.extract_strided_slice %2 {offsets = [24, 14], sizes = [2, 1], strides = [1, 1]} : vector<64x49xf32> to vector<2x1xf32>
    %529 = arith.addf %521, %528 : vector<2x1xf32>
    %c3_226 = arith.constant 3 : index
    %c0_227 = arith.constant 0 : index
    %c0_228 = arith.constant 0 : index
    %530 = vector.load %arg7[%c3_226, %c0_227, %c0_228] : memref<8x8x128xf32, #tpu.memory_space<vmem>>, vector<1x2x128xf32>
    %531 = vector.shape_cast %530 : vector<1x2x128xf32> to vector<2x128xf32>
    %c14_229 = arith.constant 14 : index
    %532 = memref.load %arg4[%c14_229] : memref<49xf32, #tpu.memory_space<smem>>
    %533 = vector.broadcast %532 : f32 to vector<2x128xf32>
    %534 = arith.mulf %531, %533 : vector<2x128xf32>
    %535 = arith.addf %527, %534 : vector<2x128xf32>
    %536 = vector.extract_strided_slice %2 {offsets = [25, 15], sizes = [2, 1], strides = [1, 1]} : vector<64x49xf32> to vector<2x1xf32>
    %537 = arith.addf %529, %536 : vector<2x1xf32>
    %c3_230 = arith.constant 3 : index
    %c1_231 = arith.constant 1 : index
    %c0_232 = arith.constant 0 : index
    %538 = vector.load %arg7[%c3_230, %c1_231, %c0_232] : memref<8x8x128xf32, #tpu.memory_space<vmem>>, vector<1x2x128xf32>
    %539 = vector.shape_cast %538 : vector<1x2x128xf32> to vector<2x128xf32>
    %c15_233 = arith.constant 15 : index
    %540 = memref.load %arg4[%c15_233] : memref<49xf32, #tpu.memory_space<smem>>
    %541 = vector.broadcast %540 : f32 to vector<2x128xf32>
    %542 = arith.mulf %539, %541 : vector<2x128xf32>
    %543 = arith.addf %535, %542 : vector<2x128xf32>
    %544 = vector.extract_strided_slice %2 {offsets = [26, 16], sizes = [2, 1], strides = [1, 1]} : vector<64x49xf32> to vector<2x1xf32>
    %545 = arith.addf %537, %544 : vector<2x1xf32>
    %c3_234 = arith.constant 3 : index
    %c2_235 = arith.constant 2 : index
    %c0_236 = arith.constant 0 : index
    %546 = vector.load %arg7[%c3_234, %c2_235, %c0_236] : memref<8x8x128xf32, #tpu.memory_space<vmem>>, vector<1x2x128xf32>
    %547 = vector.shape_cast %546 : vector<1x2x128xf32> to vector<2x128xf32>
    %c16_237 = arith.constant 16 : index
    %548 = memref.load %arg4[%c16_237] : memref<49xf32, #tpu.memory_space<smem>>
    %549 = vector.broadcast %548 : f32 to vector<2x128xf32>
    %550 = arith.mulf %547, %549 : vector<2x128xf32>
    %551 = arith.addf %543, %550 : vector<2x128xf32>
    %552 = vector.extract_strided_slice %2 {offsets = [27, 17], sizes = [2, 1], strides = [1, 1]} : vector<64x49xf32> to vector<2x1xf32>
    %553 = arith.addf %545, %552 : vector<2x1xf32>
    %c3_238 = arith.constant 3 : index
    %c3_239 = arith.constant 3 : index
    %c0_240 = arith.constant 0 : index
    %554 = vector.load %arg7[%c3_238, %c3_239, %c0_240] : memref<8x8x128xf32, #tpu.memory_space<vmem>>, vector<1x2x128xf32>
    %555 = vector.shape_cast %554 : vector<1x2x128xf32> to vector<2x128xf32>
    %c17_241 = arith.constant 17 : index
    %556 = memref.load %arg4[%c17_241] : memref<49xf32, #tpu.memory_space<smem>>
    %557 = vector.broadcast %556 : f32 to vector<2x128xf32>
    %558 = arith.mulf %555, %557 : vector<2x128xf32>
    %559 = arith.addf %551, %558 : vector<2x128xf32>
    %560 = vector.extract_strided_slice %2 {offsets = [28, 18], sizes = [2, 1], strides = [1, 1]} : vector<64x49xf32> to vector<2x1xf32>
    %561 = arith.addf %553, %560 : vector<2x1xf32>
    %c3_242 = arith.constant 3 : index
    %c4_243 = arith.constant 4 : index
    %c0_244 = arith.constant 0 : index
    %562 = vector.load %arg7[%c3_242, %c4_243, %c0_244] : memref<8x8x128xf32, #tpu.memory_space<vmem>>, vector<1x2x128xf32>
    %563 = vector.shape_cast %562 : vector<1x2x128xf32> to vector<2x128xf32>
    %c18_245 = arith.constant 18 : index
    %564 = memref.load %arg4[%c18_245] : memref<49xf32, #tpu.memory_space<smem>>
    %565 = vector.broadcast %564 : f32 to vector<2x128xf32>
    %566 = arith.mulf %563, %565 : vector<2x128xf32>
    %567 = arith.addf %559, %566 : vector<2x128xf32>
    %568 = vector.extract_strided_slice %2 {offsets = [29, 19], sizes = [2, 1], strides = [1, 1]} : vector<64x49xf32> to vector<2x1xf32>
    %569 = arith.addf %561, %568 : vector<2x1xf32>
    %c3_246 = arith.constant 3 : index
    %c5_247 = arith.constant 5 : index
    %c0_248 = arith.constant 0 : index
    %570 = vector.load %arg7[%c3_246, %c5_247, %c0_248] : memref<8x8x128xf32, #tpu.memory_space<vmem>>, vector<1x2x128xf32>
    %571 = vector.shape_cast %570 : vector<1x2x128xf32> to vector<2x128xf32>
    %c19_249 = arith.constant 19 : index
    %572 = memref.load %arg4[%c19_249] : memref<49xf32, #tpu.memory_space<smem>>
    %573 = vector.broadcast %572 : f32 to vector<2x128xf32>
    %574 = arith.mulf %571, %573 : vector<2x128xf32>
    %575 = arith.addf %567, %574 : vector<2x128xf32>
    %576 = vector.extract_strided_slice %2 {offsets = [30, 20], sizes = [2, 1], strides = [1, 1]} : vector<64x49xf32> to vector<2x1xf32>
    %577 = arith.addf %569, %576 : vector<2x1xf32>
    %c3_250 = arith.constant 3 : index
    %c6_251 = arith.constant 6 : index
    %c0_252 = arith.constant 0 : index
    %578 = vector.load %arg7[%c3_250, %c6_251, %c0_252] : memref<8x8x128xf32, #tpu.memory_space<vmem>>, vector<1x2x128xf32>
    %579 = vector.shape_cast %578 : vector<1x2x128xf32> to vector<2x128xf32>
    %c20_253 = arith.constant 20 : index
    %580 = memref.load %arg4[%c20_253] : memref<49xf32, #tpu.memory_space<smem>>
    %581 = vector.broadcast %580 : f32 to vector<2x128xf32>
    %582 = arith.mulf %579, %581 : vector<2x128xf32>
    %583 = arith.addf %575, %582 : vector<2x128xf32>
    %584 = vector.extract_strided_slice %2 {offsets = [32, 21], sizes = [2, 1], strides = [1, 1]} : vector<64x49xf32> to vector<2x1xf32>
    %585 = arith.addf %577, %584 : vector<2x1xf32>
    %c4_254 = arith.constant 4 : index
    %c0_255 = arith.constant 0 : index
    %c0_256 = arith.constant 0 : index
    %586 = vector.load %arg7[%c4_254, %c0_255, %c0_256] : memref<8x8x128xf32, #tpu.memory_space<vmem>>, vector<1x2x128xf32>
    %587 = vector.shape_cast %586 : vector<1x2x128xf32> to vector<2x128xf32>
    %c21_257 = arith.constant 21 : index
    %588 = memref.load %arg4[%c21_257] : memref<49xf32, #tpu.memory_space<smem>>
    %589 = vector.broadcast %588 : f32 to vector<2x128xf32>
    %590 = arith.mulf %587, %589 : vector<2x128xf32>
    %591 = arith.addf %583, %590 : vector<2x128xf32>
    %592 = vector.extract_strided_slice %2 {offsets = [33, 22], sizes = [2, 1], strides = [1, 1]} : vector<64x49xf32> to vector<2x1xf32>
    %593 = arith.addf %585, %592 : vector<2x1xf32>
    %c4_258 = arith.constant 4 : index
    %c1_259 = arith.constant 1 : index
    %c0_260 = arith.constant 0 : index
    %594 = vector.load %arg7[%c4_258, %c1_259, %c0_260] : memref<8x8x128xf32, #tpu.memory_space<vmem>>, vector<1x2x128xf32>
    %595 = vector.shape_cast %594 : vector<1x2x128xf32> to vector<2x128xf32>
    %c22_261 = arith.constant 22 : index
    %596 = memref.load %arg4[%c22_261] : memref<49xf32, #tpu.memory_space<smem>>
    %597 = vector.broadcast %596 : f32 to vector<2x128xf32>
    %598 = arith.mulf %595, %597 : vector<2x128xf32>
    %599 = arith.addf %591, %598 : vector<2x128xf32>
    %600 = vector.extract_strided_slice %2 {offsets = [34, 23], sizes = [2, 1], strides = [1, 1]} : vector<64x49xf32> to vector<2x1xf32>
    %601 = arith.addf %593, %600 : vector<2x1xf32>
    %c4_262 = arith.constant 4 : index
    %c2_263 = arith.constant 2 : index
    %c0_264 = arith.constant 0 : index
    %602 = vector.load %arg7[%c4_262, %c2_263, %c0_264] : memref<8x8x128xf32, #tpu.memory_space<vmem>>, vector<1x2x128xf32>
    %603 = vector.shape_cast %602 : vector<1x2x128xf32> to vector<2x128xf32>
    %c23_265 = arith.constant 23 : index
    %604 = memref.load %arg4[%c23_265] : memref<49xf32, #tpu.memory_space<smem>>
    %605 = vector.broadcast %604 : f32 to vector<2x128xf32>
    %606 = arith.mulf %603, %605 : vector<2x128xf32>
    %607 = arith.addf %599, %606 : vector<2x128xf32>
    %608 = vector.extract_strided_slice %2 {offsets = [35, 24], sizes = [2, 1], strides = [1, 1]} : vector<64x49xf32> to vector<2x1xf32>
    %609 = arith.addf %601, %608 : vector<2x1xf32>
    %c4_266 = arith.constant 4 : index
    %c3_267 = arith.constant 3 : index
    %c0_268 = arith.constant 0 : index
    %610 = vector.load %arg7[%c4_266, %c3_267, %c0_268] : memref<8x8x128xf32, #tpu.memory_space<vmem>>, vector<1x2x128xf32>
    %611 = vector.shape_cast %610 : vector<1x2x128xf32> to vector<2x128xf32>
    %c24_269 = arith.constant 24 : index
    %612 = memref.load %arg4[%c24_269] : memref<49xf32, #tpu.memory_space<smem>>
    %613 = vector.broadcast %612 : f32 to vector<2x128xf32>
    %614 = arith.mulf %611, %613 : vector<2x128xf32>
    %615 = arith.addf %607, %614 : vector<2x128xf32>
    %616 = vector.extract_strided_slice %2 {offsets = [36, 25], sizes = [2, 1], strides = [1, 1]} : vector<64x49xf32> to vector<2x1xf32>
    %617 = arith.addf %609, %616 : vector<2x1xf32>
    %c4_270 = arith.constant 4 : index
    %c4_271 = arith.constant 4 : index
    %c0_272 = arith.constant 0 : index
    %618 = vector.load %arg7[%c4_270, %c4_271, %c0_272] : memref<8x8x128xf32, #tpu.memory_space<vmem>>, vector<1x2x128xf32>
    %619 = vector.shape_cast %618 : vector<1x2x128xf32> to vector<2x128xf32>
    %c25_273 = arith.constant 25 : index
    %620 = memref.load %arg4[%c25_273] : memref<49xf32, #tpu.memory_space<smem>>
    %621 = vector.broadcast %620 : f32 to vector<2x128xf32>
    %622 = arith.mulf %619, %621 : vector<2x128xf32>
    %623 = arith.addf %615, %622 : vector<2x128xf32>
    %624 = vector.extract_strided_slice %2 {offsets = [37, 26], sizes = [2, 1], strides = [1, 1]} : vector<64x49xf32> to vector<2x1xf32>
    %625 = arith.addf %617, %624 : vector<2x1xf32>
    %c4_274 = arith.constant 4 : index
    %c5_275 = arith.constant 5 : index
    %c0_276 = arith.constant 0 : index
    %626 = vector.load %arg7[%c4_274, %c5_275, %c0_276] : memref<8x8x128xf32, #tpu.memory_space<vmem>>, vector<1x2x128xf32>
    %627 = vector.shape_cast %626 : vector<1x2x128xf32> to vector<2x128xf32>
    %c26_277 = arith.constant 26 : index
    %628 = memref.load %arg4[%c26_277] : memref<49xf32, #tpu.memory_space<smem>>
    %629 = vector.broadcast %628 : f32 to vector<2x128xf32>
    %630 = arith.mulf %627, %629 : vector<2x128xf32>
    %631 = arith.addf %623, %630 : vector<2x128xf32>
    %632 = vector.extract_strided_slice %2 {offsets = [38, 27], sizes = [2, 1], strides = [1, 1]} : vector<64x49xf32> to vector<2x1xf32>
    %633 = arith.addf %625, %632 : vector<2x1xf32>
    %c4_278 = arith.constant 4 : index
    %c6_279 = arith.constant 6 : index
    %c0_280 = arith.constant 0 : index
    %634 = vector.load %arg7[%c4_278, %c6_279, %c0_280] : memref<8x8x128xf32, #tpu.memory_space<vmem>>, vector<1x2x128xf32>
    %635 = vector.shape_cast %634 : vector<1x2x128xf32> to vector<2x128xf32>
    %c27_281 = arith.constant 27 : index
    %636 = memref.load %arg4[%c27_281] : memref<49xf32, #tpu.memory_space<smem>>
    %637 = vector.broadcast %636 : f32 to vector<2x128xf32>
    %638 = arith.mulf %635, %637 : vector<2x128xf32>
    %639 = arith.addf %631, %638 : vector<2x128xf32>
    %640 = vector.extract_strided_slice %2 {offsets = [40, 28], sizes = [2, 1], strides = [1, 1]} : vector<64x49xf32> to vector<2x1xf32>
    %641 = arith.addf %633, %640 : vector<2x1xf32>
    %c5_282 = arith.constant 5 : index
    %c0_283 = arith.constant 0 : index
    %c0_284 = arith.constant 0 : index
    %642 = vector.load %arg7[%c5_282, %c0_283, %c0_284] : memref<8x8x128xf32, #tpu.memory_space<vmem>>, vector<1x2x128xf32>
    %643 = vector.shape_cast %642 : vector<1x2x128xf32> to vector<2x128xf32>
    %c28_285 = arith.constant 28 : index
    %644 = memref.load %arg4[%c28_285] : memref<49xf32, #tpu.memory_space<smem>>
    %645 = vector.broadcast %644 : f32 to vector<2x128xf32>
    %646 = arith.mulf %643, %645 : vector<2x128xf32>
    %647 = arith.addf %639, %646 : vector<2x128xf32>
    %648 = vector.extract_strided_slice %2 {offsets = [41, 29], sizes = [2, 1], strides = [1, 1]} : vector<64x49xf32> to vector<2x1xf32>
    %649 = arith.addf %641, %648 : vector<2x1xf32>
    %c5_286 = arith.constant 5 : index
    %c1_287 = arith.constant 1 : index
    %c0_288 = arith.constant 0 : index
    %650 = vector.load %arg7[%c5_286, %c1_287, %c0_288] : memref<8x8x128xf32, #tpu.memory_space<vmem>>, vector<1x2x128xf32>
    %651 = vector.shape_cast %650 : vector<1x2x128xf32> to vector<2x128xf32>
    %c29_289 = arith.constant 29 : index
    %652 = memref.load %arg4[%c29_289] : memref<49xf32, #tpu.memory_space<smem>>
    %653 = vector.broadcast %652 : f32 to vector<2x128xf32>
    %654 = arith.mulf %651, %653 : vector<2x128xf32>
    %655 = arith.addf %647, %654 : vector<2x128xf32>
    %656 = vector.extract_strided_slice %2 {offsets = [42, 30], sizes = [2, 1], strides = [1, 1]} : vector<64x49xf32> to vector<2x1xf32>
    %657 = arith.addf %649, %656 : vector<2x1xf32>
    %c5_290 = arith.constant 5 : index
    %c2_291 = arith.constant 2 : index
    %c0_292 = arith.constant 0 : index
    %658 = vector.load %arg7[%c5_290, %c2_291, %c0_292] : memref<8x8x128xf32, #tpu.memory_space<vmem>>, vector<1x2x128xf32>
    %659 = vector.shape_cast %658 : vector<1x2x128xf32> to vector<2x128xf32>
    %c30_293 = arith.constant 30 : index
    %660 = memref.load %arg4[%c30_293] : memref<49xf32, #tpu.memory_space<smem>>
    %661 = vector.broadcast %660 : f32 to vector<2x128xf32>
    %662 = arith.mulf %659, %661 : vector<2x128xf32>
    %663 = arith.addf %655, %662 : vector<2x128xf32>
    %664 = vector.extract_strided_slice %2 {offsets = [43, 31], sizes = [2, 1], strides = [1, 1]} : vector<64x49xf32> to vector<2x1xf32>
    %665 = arith.addf %657, %664 : vector<2x1xf32>
    %c5_294 = arith.constant 5 : index
    %c3_295 = arith.constant 3 : index
    %c0_296 = arith.constant 0 : index
    %666 = vector.load %arg7[%c5_294, %c3_295, %c0_296] : memref<8x8x128xf32, #tpu.memory_space<vmem>>, vector<1x2x128xf32>
    %667 = vector.shape_cast %666 : vector<1x2x128xf32> to vector<2x128xf32>
    %c31_297 = arith.constant 31 : index
    %668 = memref.load %arg4[%c31_297] : memref<49xf32, #tpu.memory_space<smem>>
    %669 = vector.broadcast %668 : f32 to vector<2x128xf32>
    %670 = arith.mulf %667, %669 : vector<2x128xf32>
    %671 = arith.addf %663, %670 : vector<2x128xf32>
    %672 = vector.extract_strided_slice %2 {offsets = [44, 32], sizes = [2, 1], strides = [1, 1]} : vector<64x49xf32> to vector<2x1xf32>
    %673 = arith.addf %665, %672 : vector<2x1xf32>
    %c5_298 = arith.constant 5 : index
    %c4_299 = arith.constant 4 : index
    %c0_300 = arith.constant 0 : index
    %674 = vector.load %arg7[%c5_298, %c4_299, %c0_300] : memref<8x8x128xf32, #tpu.memory_space<vmem>>, vector<1x2x128xf32>
    %675 = vector.shape_cast %674 : vector<1x2x128xf32> to vector<2x128xf32>
    %c32_301 = arith.constant 32 : index
    %676 = memref.load %arg4[%c32_301] : memref<49xf32, #tpu.memory_space<smem>>
    %677 = vector.broadcast %676 : f32 to vector<2x128xf32>
    %678 = arith.mulf %675, %677 : vector<2x128xf32>
    %679 = arith.addf %671, %678 : vector<2x128xf32>
    %680 = vector.extract_strided_slice %2 {offsets = [45, 33], sizes = [2, 1], strides = [1, 1]} : vector<64x49xf32> to vector<2x1xf32>
    %681 = arith.addf %673, %680 : vector<2x1xf32>
    %c5_302 = arith.constant 5 : index
    %c5_303 = arith.constant 5 : index
    %c0_304 = arith.constant 0 : index
    %682 = vector.load %arg7[%c5_302, %c5_303, %c0_304] : memref<8x8x128xf32, #tpu.memory_space<vmem>>, vector<1x2x128xf32>
    %683 = vector.shape_cast %682 : vector<1x2x128xf32> to vector<2x128xf32>
    %c33_305 = arith.constant 33 : index
    %684 = memref.load %arg4[%c33_305] : memref<49xf32, #tpu.memory_space<smem>>
    %685 = vector.broadcast %684 : f32 to vector<2x128xf32>
    %686 = arith.mulf %683, %685 : vector<2x128xf32>
    %687 = arith.addf %679, %686 : vector<2x128xf32>
    %688 = vector.extract_strided_slice %2 {offsets = [46, 34], sizes = [2, 1], strides = [1, 1]} : vector<64x49xf32> to vector<2x1xf32>
    %689 = arith.addf %681, %688 : vector<2x1xf32>
    %c5_306 = arith.constant 5 : index
    %c6_307 = arith.constant 6 : index
    %c0_308 = arith.constant 0 : index
    %690 = vector.load %arg7[%c5_306, %c6_307, %c0_308] : memref<8x8x128xf32, #tpu.memory_space<vmem>>, vector<1x2x128xf32>
    %691 = vector.shape_cast %690 : vector<1x2x128xf32> to vector<2x128xf32>
    %c34_309 = arith.constant 34 : index
    %692 = memref.load %arg4[%c34_309] : memref<49xf32, #tpu.memory_space<smem>>
    %693 = vector.broadcast %692 : f32 to vector<2x128xf32>
    %694 = arith.mulf %691, %693 : vector<2x128xf32>
    %695 = arith.addf %687, %694 : vector<2x128xf32>
    %696 = vector.extract_strided_slice %2 {offsets = [48, 35], sizes = [2, 1], strides = [1, 1]} : vector<64x49xf32> to vector<2x1xf32>
    %697 = arith.addf %689, %696 : vector<2x1xf32>
    %c6_310 = arith.constant 6 : index
    %c0_311 = arith.constant 0 : index
    %c0_312 = arith.constant 0 : index
    %698 = vector.load %arg7[%c6_310, %c0_311, %c0_312] : memref<8x8x128xf32, #tpu.memory_space<vmem>>, vector<1x2x128xf32>
    %699 = vector.shape_cast %698 : vector<1x2x128xf32> to vector<2x128xf32>
    %c35_313 = arith.constant 35 : index
    %700 = memref.load %arg4[%c35_313] : memref<49xf32, #tpu.memory_space<smem>>
    %701 = vector.broadcast %700 : f32 to vector<2x128xf32>
    %702 = arith.mulf %699, %701 : vector<2x128xf32>
    %703 = arith.addf %695, %702 : vector<2x128xf32>
    %704 = vector.extract_strided_slice %2 {offsets = [49, 36], sizes = [2, 1], strides = [1, 1]} : vector<64x49xf32> to vector<2x1xf32>
    %705 = arith.addf %697, %704 : vector<2x1xf32>
    %c6_314 = arith.constant 6 : index
    %c1_315 = arith.constant 1 : index
    %c0_316 = arith.constant 0 : index
    %706 = vector.load %arg7[%c6_314, %c1_315, %c0_316] : memref<8x8x128xf32, #tpu.memory_space<vmem>>, vector<1x2x128xf32>
    %707 = vector.shape_cast %706 : vector<1x2x128xf32> to vector<2x128xf32>
    %c36_317 = arith.constant 36 : index
    %708 = memref.load %arg4[%c36_317] : memref<49xf32, #tpu.memory_space<smem>>
    %709 = vector.broadcast %708 : f32 to vector<2x128xf32>
    %710 = arith.mulf %707, %709 : vector<2x128xf32>
    %711 = arith.addf %703, %710 : vector<2x128xf32>
    %712 = vector.extract_strided_slice %2 {offsets = [50, 37], sizes = [2, 1], strides = [1, 1]} : vector<64x49xf32> to vector<2x1xf32>
    %713 = arith.addf %705, %712 : vector<2x1xf32>
    %c6_318 = arith.constant 6 : index
    %c2_319 = arith.constant 2 : index
    %c0_320 = arith.constant 0 : index
    %714 = vector.load %arg7[%c6_318, %c2_319, %c0_320] : memref<8x8x128xf32, #tpu.memory_space<vmem>>, vector<1x2x128xf32>
    %715 = vector.shape_cast %714 : vector<1x2x128xf32> to vector<2x128xf32>
    %c37_321 = arith.constant 37 : index
    %716 = memref.load %arg4[%c37_321] : memref<49xf32, #tpu.memory_space<smem>>
    %717 = vector.broadcast %716 : f32 to vector<2x128xf32>
    %718 = arith.mulf %715, %717 : vector<2x128xf32>
    %719 = arith.addf %711, %718 : vector<2x128xf32>
    %720 = vector.extract_strided_slice %2 {offsets = [51, 38], sizes = [2, 1], strides = [1, 1]} : vector<64x49xf32> to vector<2x1xf32>
    %721 = arith.addf %713, %720 : vector<2x1xf32>
    %c6_322 = arith.constant 6 : index
    %c3_323 = arith.constant 3 : index
    %c0_324 = arith.constant 0 : index
    %722 = vector.load %arg7[%c6_322, %c3_323, %c0_324] : memref<8x8x128xf32, #tpu.memory_space<vmem>>, vector<1x2x128xf32>
    %723 = vector.shape_cast %722 : vector<1x2x128xf32> to vector<2x128xf32>
    %c38_325 = arith.constant 38 : index
    %724 = memref.load %arg4[%c38_325] : memref<49xf32, #tpu.memory_space<smem>>
    %725 = vector.broadcast %724 : f32 to vector<2x128xf32>
    %726 = arith.mulf %723, %725 : vector<2x128xf32>
    %727 = arith.addf %719, %726 : vector<2x128xf32>
    %728 = vector.extract_strided_slice %2 {offsets = [52, 39], sizes = [2, 1], strides = [1, 1]} : vector<64x49xf32> to vector<2x1xf32>
    %729 = arith.addf %721, %728 : vector<2x1xf32>
    %c6_326 = arith.constant 6 : index
    %c4_327 = arith.constant 4 : index
    %c0_328 = arith.constant 0 : index
    %730 = vector.load %arg7[%c6_326, %c4_327, %c0_328] : memref<8x8x128xf32, #tpu.memory_space<vmem>>, vector<1x2x128xf32>
    %731 = vector.shape_cast %730 : vector<1x2x128xf32> to vector<2x128xf32>
    %c39_329 = arith.constant 39 : index
    %732 = memref.load %arg4[%c39_329] : memref<49xf32, #tpu.memory_space<smem>>
    %733 = vector.broadcast %732 : f32 to vector<2x128xf32>
    %734 = arith.mulf %731, %733 : vector<2x128xf32>
    %735 = arith.addf %727, %734 : vector<2x128xf32>
    %736 = vector.extract_strided_slice %2 {offsets = [53, 40], sizes = [2, 1], strides = [1, 1]} : vector<64x49xf32> to vector<2x1xf32>
    %737 = arith.addf %729, %736 : vector<2x1xf32>
    %c6_330 = arith.constant 6 : index
    %c5_331 = arith.constant 5 : index
    %c0_332 = arith.constant 0 : index
    %738 = vector.load %arg7[%c6_330, %c5_331, %c0_332] : memref<8x8x128xf32, #tpu.memory_space<vmem>>, vector<1x2x128xf32>
    %739 = vector.shape_cast %738 : vector<1x2x128xf32> to vector<2x128xf32>
    %c40_333 = arith.constant 40 : index
    %740 = memref.load %arg4[%c40_333] : memref<49xf32, #tpu.memory_space<smem>>
    %741 = vector.broadcast %740 : f32 to vector<2x128xf32>
    %742 = arith.mulf %739, %741 : vector<2x128xf32>
    %743 = arith.addf %735, %742 : vector<2x128xf32>
    %744 = vector.extract_strided_slice %2 {offsets = [54, 41], sizes = [2, 1], strides = [1, 1]} : vector<64x49xf32> to vector<2x1xf32>
    %745 = arith.addf %737, %744 : vector<2x1xf32>
    %c6_334 = arith.constant 6 : index
    %c6_335 = arith.constant 6 : index
    %c0_336 = arith.constant 0 : index
    %746 = vector.load %arg7[%c6_334, %c6_335, %c0_336] : memref<8x8x128xf32, #tpu.memory_space<vmem>>, vector<1x2x128xf32>
    %747 = vector.shape_cast %746 : vector<1x2x128xf32> to vector<2x128xf32>
    %c41_337 = arith.constant 41 : index
    %748 = memref.load %arg4[%c41_337] : memref<49xf32, #tpu.memory_space<smem>>
    %749 = vector.broadcast %748 : f32 to vector<2x128xf32>
    %750 = arith.mulf %747, %749 : vector<2x128xf32>
    %751 = arith.addf %743, %750 : vector<2x128xf32>
    %752 = vector.extract_strided_slice %2 {offsets = [56, 42], sizes = [2, 1], strides = [1, 1]} : vector<64x49xf32> to vector<2x1xf32>
    %753 = arith.addf %745, %752 : vector<2x1xf32>
    %c7_338 = arith.constant 7 : index
    %c0_339 = arith.constant 0 : index
    %c0_340 = arith.constant 0 : index
    %754 = vector.load %arg7[%c7_338, %c0_339, %c0_340] : memref<8x8x128xf32, #tpu.memory_space<vmem>>, vector<1x2x128xf32>
    %755 = vector.shape_cast %754 : vector<1x2x128xf32> to vector<2x128xf32>
    %c42_341 = arith.constant 42 : index
    %756 = memref.load %arg4[%c42_341] : memref<49xf32, #tpu.memory_space<smem>>
    %757 = vector.broadcast %756 : f32 to vector<2x128xf32>
    %758 = arith.mulf %755, %757 : vector<2x128xf32>
    %759 = arith.addf %751, %758 : vector<2x128xf32>
    %760 = vector.extract_strided_slice %2 {offsets = [57, 43], sizes = [2, 1], strides = [1, 1]} : vector<64x49xf32> to vector<2x1xf32>
    %761 = arith.addf %753, %760 : vector<2x1xf32>
    %c7_342 = arith.constant 7 : index
    %c1_343 = arith.constant 1 : index
    %c0_344 = arith.constant 0 : index
    %762 = vector.load %arg7[%c7_342, %c1_343, %c0_344] : memref<8x8x128xf32, #tpu.memory_space<vmem>>, vector<1x2x128xf32>
    %763 = vector.shape_cast %762 : vector<1x2x128xf32> to vector<2x128xf32>
    %c43_345 = arith.constant 43 : index
    %764 = memref.load %arg4[%c43_345] : memref<49xf32, #tpu.memory_space<smem>>
    %765 = vector.broadcast %764 : f32 to vector<2x128xf32>
    %766 = arith.mulf %763, %765 : vector<2x128xf32>
    %767 = arith.addf %759, %766 : vector<2x128xf32>
    %768 = vector.extract_strided_slice %2 {offsets = [58, 44], sizes = [2, 1], strides = [1, 1]} : vector<64x49xf32> to vector<2x1xf32>
    %769 = arith.addf %761, %768 : vector<2x1xf32>
    %c7_346 = arith.constant 7 : index
    %c2_347 = arith.constant 2 : index
    %c0_348 = arith.constant 0 : index
    %770 = vector.load %arg7[%c7_346, %c2_347, %c0_348] : memref<8x8x128xf32, #tpu.memory_space<vmem>>, vector<1x2x128xf32>
    %771 = vector.shape_cast %770 : vector<1x2x128xf32> to vector<2x128xf32>
    %c44_349 = arith.constant 44 : index
    %772 = memref.load %arg4[%c44_349] : memref<49xf32, #tpu.memory_space<smem>>
    %773 = vector.broadcast %772 : f32 to vector<2x128xf32>
    %774 = arith.mulf %771, %773 : vector<2x128xf32>
    %775 = arith.addf %767, %774 : vector<2x128xf32>
    %776 = vector.extract_strided_slice %2 {offsets = [59, 45], sizes = [2, 1], strides = [1, 1]} : vector<64x49xf32> to vector<2x1xf32>
    %777 = arith.addf %769, %776 : vector<2x1xf32>
    %c7_350 = arith.constant 7 : index
    %c3_351 = arith.constant 3 : index
    %c0_352 = arith.constant 0 : index
    %778 = vector.load %arg7[%c7_350, %c3_351, %c0_352] : memref<8x8x128xf32, #tpu.memory_space<vmem>>, vector<1x2x128xf32>
    %779 = vector.shape_cast %778 : vector<1x2x128xf32> to vector<2x128xf32>
    %c45_353 = arith.constant 45 : index
    %780 = memref.load %arg4[%c45_353] : memref<49xf32, #tpu.memory_space<smem>>
    %781 = vector.broadcast %780 : f32 to vector<2x128xf32>
    %782 = arith.mulf %779, %781 : vector<2x128xf32>
    %783 = arith.addf %775, %782 : vector<2x128xf32>
    %784 = vector.extract_strided_slice %2 {offsets = [60, 46], sizes = [2, 1], strides = [1, 1]} : vector<64x49xf32> to vector<2x1xf32>
    %785 = arith.addf %777, %784 : vector<2x1xf32>
    %c7_354 = arith.constant 7 : index
    %c4_355 = arith.constant 4 : index
    %c0_356 = arith.constant 0 : index
    %786 = vector.load %arg7[%c7_354, %c4_355, %c0_356] : memref<8x8x128xf32, #tpu.memory_space<vmem>>, vector<1x2x128xf32>
    %787 = vector.shape_cast %786 : vector<1x2x128xf32> to vector<2x128xf32>
    %c46_357 = arith.constant 46 : index
    %788 = memref.load %arg4[%c46_357] : memref<49xf32, #tpu.memory_space<smem>>
    %789 = vector.broadcast %788 : f32 to vector<2x128xf32>
    %790 = arith.mulf %787, %789 : vector<2x128xf32>
    %791 = arith.addf %783, %790 : vector<2x128xf32>
    %792 = vector.extract_strided_slice %2 {offsets = [61, 47], sizes = [2, 1], strides = [1, 1]} : vector<64x49xf32> to vector<2x1xf32>
    %793 = arith.addf %785, %792 : vector<2x1xf32>
    %c7_358 = arith.constant 7 : index
    %c5_359 = arith.constant 5 : index
    %c0_360 = arith.constant 0 : index
    %794 = vector.load %arg7[%c7_358, %c5_359, %c0_360] : memref<8x8x128xf32, #tpu.memory_space<vmem>>, vector<1x2x128xf32>
    %795 = vector.shape_cast %794 : vector<1x2x128xf32> to vector<2x128xf32>
    %c47_361 = arith.constant 47 : index
    %796 = memref.load %arg4[%c47_361] : memref<49xf32, #tpu.memory_space<smem>>
    %797 = vector.broadcast %796 : f32 to vector<2x128xf32>
    %798 = arith.mulf %795, %797 : vector<2x128xf32>
    %799 = arith.addf %791, %798 : vector<2x128xf32>
    %800 = vector.extract_strided_slice %2 {offsets = [62, 48], sizes = [2, 1], strides = [1, 1]} : vector<64x49xf32> to vector<2x1xf32>
    %801 = arith.addf %793, %800 : vector<2x1xf32>
    %c7_362 = arith.constant 7 : index
    %c6_363 = arith.constant 6 : index
    %c0_364 = arith.constant 0 : index
    %802 = vector.load %arg7[%c7_362, %c6_363, %c0_364] : memref<8x8x128xf32, #tpu.memory_space<vmem>>, vector<1x2x128xf32>
    %803 = vector.shape_cast %802 : vector<1x2x128xf32> to vector<2x128xf32>
    %c48_365 = arith.constant 48 : index
    %804 = memref.load %arg4[%c48_365] : memref<49xf32, #tpu.memory_space<smem>>
    %805 = vector.broadcast %804 : f32 to vector<2x128xf32>
    %806 = arith.mulf %803, %805 : vector<2x128xf32>
    %807 = arith.addf %799, %806 : vector<2x128xf32>
    %808 = vector.broadcast %801 : vector<2x1xf32> to vector<2x128xf32>
    %809 = arith.addf %808, %807 : vector<2x128xf32>
    %810 = vector.broadcast %7 : f32 to vector<2x128xf32>
    %811 = arith.addf %809, %810 : vector<2x128xf32>
    %812 = arith.negf %811 : vector<2x128xf32>
    %813 = math.exp %812 : vector<2x128xf32>
    %cst_366 = arith.constant 1.000000e+00 : f32
    %814 = vector.broadcast %cst_366 : f32 to vector<2x128xf32>
    %815 = arith.addf %814, %813 : vector<2x128xf32>
    %816 = arith.divf %814, %815 : vector<2x128xf32>
    %c1_367 = arith.constant 1 : index
    %c0_368 = arith.constant 0 : index
    %c0_369 = arith.constant 0 : index
    %817 = vector.load %arg6[%c1_367, %c0_368, %c0_369] : memref<2x2x128xf32, #tpu.memory_space<vmem>>, vector<1x2x128xf32>
    %818 = vector.shape_cast %817 : vector<1x2x128xf32> to vector<2x128xf32>
    %819 = vector.shape_cast %816 : vector<2x128xf32> to vector<1x2x128xf32>
    tpu.vector_store %arg6[%c1_367, %c0_368, %c0_369], %819 {strides = array<i32>} : memref<2x2x128xf32, #tpu.memory_space<vmem>>, vector<1x2x128xf32>,
    return
  }
  func.func @transform_0(%arg0: i32) -> (i32, i32) {
    %c0_i32 = arith.constant 0 : i32
    %c0_i32_0 = arith.constant 0 : i32
    %c0_i32_1 = arith.constant 0 : i32
    return %c0_i32, %c0_i32_0 : i32, i32
  }
  func.func @transform_1(%arg0: i32) -> (i32, i32) {
    %c0_i32 = arith.constant 0 : i32
    %c0_i32_0 = arith.constant 0 : i32
    %c0_i32_1 = arith.constant 0 : i32
    return %c0_i32, %c0_i32_0 : i32, i32
  }
  func.func @transform_2(%arg0: i32) -> (i32, i32, i32) {
    %c0_i32 = arith.constant 0 : i32
    %c0_i32_0 = arith.constant 0 : i32
    %c0_i32_1 = arith.constant 0 : i32
    return %c0_i32, %c0_i32_0, %arg0 : i32, i32, i32
  }
  func.func @transform_3(%arg0: i32) -> i32 {
    %c0_i32 = arith.constant 0 : i32
    %c0_i32_0 = arith.constant 0 : i32
    return %c0_i32 : i32
  }
  func.func @transform_4(%arg0: i32) -> i32 {
    %c0_i32 = arith.constant 0 : i32
    %c0_i32_0 = arith.constant 0 : i32
    return %c0_i32 : i32
  }
  func.func @transform_5(%arg0: i32) -> (i32, i32, i32) {
    %c0_i32 = arith.constant 0 : i32
    %c0_i32_0 = arith.constant 0 : i32
    %c0_i32_1 = arith.constant 0 : i32
    return %c0_i32, %c0_i32_0, %arg0 : i32, i32, i32
  }
}

</mosaic_0001>

<bundles_post_ra>
// kernel: _level_init.1
= control target key start
LH: loop header
LB: loop body
LE: loop exit
PB: predicated region body
PF: predicated region fallthrough
CT: control target
= control target key end

     0   :  { %11 = vsyncpa [#allocation6], 0  ;;  %s2070_s0 = inlined_call_operand.vmem [shape: f32[64,256], index: 0, kind: input, shape index: {}]   ;;  %s2071_s1 = inlined_call_operand.vmem [shape: f32[256,49], index: 1, kind: input, shape index: {}]   ;;  %s2072_s2 = inlined_call_operand.vmem [shape: f32[2,2,128], index: 2, kind: input, shape index: {}]   ;;  %s2073_s3 = inlined_call_operand.vmem [shape: f32[49], index: 3, kind: input, shape index: {}]   ;;  %s2074_s4 = inlined_call_operand.<no memory space> [shape: f32[1], index: 4, kind: input, shape index: {}]   ;;  %s2075_s5 = inlined_call_operand.hbm [shape: f32[2,2,128], index: 5, kind: output, shape index: {}]  }
   0x1   :  { %12 = vsyncpa [#allocation5], 0  ;;  %s25_s20 = sshll.u32 %s2073_s3, 4  ;;  %s26_s20 = int_to_ptr.vmem [resolvable:$true] %s25_s20 }
   0x2   :  { %s1453_s21 = scalar_lea.vmem %s26_s20, 16  ;;  %p1458_p1 = scmp.lt.s32.totalorder %s26_s20, %s26_s20 }
   0x3   :  { %p1454_p0 = scmp.ne.s32.totalorder %s26_s20, %s1453_s21  ;;  %p1459_p2 = scmp.lt.s32.totalorder %s1453_s21, %s1453_s21 }
   0x5   :  { %p1460_p3 = por %p1459_p2, %p1458_p1 }
   0x7   :  { %p1461_p4 = pnand %p1460_p3, %p1454_p0 }
   0x9   :  { %1464 = shalt.err (!%p1461_p4)
}
   0xa   :  { %s1491_s22 = smov [#allocation4]  }
   0xb   :  { %28 = dma.vmem_to_smem %s26_s20, 16, %s1491_s22, [#allocation6]  }
   0xc   :  { %1487 = dma.done.wait [#allocation6], 16  }
   0xd   :  { %1488 = vsyncadd [#allocation6], 4294967280 }
   0xe   :  { %34 = sfence }
   0xf   :  { %v67_v0 = vld [vmem:[%s2071_s1 + $0x80] sm:$0xff]  ;;  %v68_v1 = vld [vmem:[%s2071_s1 + $0x88] sm:$0xff]  ;;  %v69_v5 = vld [vmem:[%s2071_s1 + $0x90] sm:$0xff]  ;;  %s1492_s14 = smov 100   ;;  %s1493_s15 = smov 107  }
  0x10   :  { %v51_v2 = vld [vmem:[%s2071_s1] sm:$0xff]  ;;  %v1341_v3 = vpack.c.bf16 %v68_v1, %v67_v0  ;;  %v52_v4 = vld [vmem:[%s2071_s1 + $0x8] sm:$0xff]  ;;  %v70_v6 = vld [vmem:[%s2071_s1 + $0x98] sm:$0xff]  ;;  %s1495_s16 = smov 127   ;;  %s1496_s17 = smov 106  }
  0x11   :  { %v1343_v7 = vpack.c.bf16 %v52_v4, %v51_v2  ;;  %v1345_v8 = vpack.c.bf16 %v70_v6, %v69_v5  ;;  %v53_v9 = vld [vmem:[%s2071_s1 + $0x10] sm:$0xff]  ;;  %v54_v10 = vld [vmem:[%s2071_s1 + $0x18] sm:$0xff]  ;;  %v71_v11 = vld [vmem:[%s2071_s1 + $0xa0] sm:$0xff]  ;;  %s1497_s18 = smov 125   ;;  %s1499_s19 = smov 124  }
  0x12   :  { %1373 = vmatprep.subr.bf16.mxu1 %v1341_v3  ;;  %1342 = vmatprep.subr.bf16.mxu0 %v1341_v3  ;;  %v72_v12 = vld [vmem:[%s2071_s1 + $0xa8] sm:$0xff]  ;;  %v1347_v13 = vpack.c.bf16 %v54_v10, %v53_v9  ;;  %v55_v15 = vld [vmem:[%s2071_s1 + $0x20] sm:$0xff]  ;;  %v73_v17 = vld [vmem:[%s2071_s1 + $0xb0] sm:$0xff]  ;;  %s1500_s20 = smov 104   ;;  %s1501_s21 = smov 123  }
  0x13   :  { %1381 = vmatpush3.bf16.msra.mxu1 %v1343_v7  ;;  %1344 = vmatpush3.bf16.msra.mxu0 %v1343_v7  ;;  %v1349_v14 = vpack.c.bf16 %v72_v12, %v71_v11  ;;  %v56_v16 = vld [vmem:[%s2071_s1 + $0x28] sm:$0xff]  ;;  %v74_v18 = vld [vmem:[%s2071_s1 + $0xb8] sm:$0xff]  ;;  %v57_v21 = vld [vmem:[%s2071_s1 + $0x30] sm:$0xff]  ;;  %s1502_s22 = smov 103   ;;  %s1503_s23 = smov 122  }
  0x14   :  { %1374 = vmatprep.subr.bf16.mxu1 %v1345_v8  ;;  %1346 = vmatprep.subr.bf16.mxu0 %v1345_v8  ;;  %v1351_v19 = vpack.c.bf16 %v56_v16, %v55_v15  ;;  %v1353_v20 = vpack.c.bf16 %v74_v18, %v73_v17  ;;  %v58_v22 = vld [vmem:[%s2071_s1 + $0x38] sm:$0xff]  ;;  %v75_v23 = vld [vmem:[%s2071_s1 + $0xc0] sm:$0xff]  ;;  %v76_v24 = vld [vmem:[%s2071_s1 + $0xc8] sm:$0xff]  ;;  %s1504_s24 = smov 102   ;;  %s1505_s25 = smov 99  }
  0x15   :  { %v44_v25 = vld [vmem:[%s2070_s0 + $0x48] sm:$0xff]  ;;  %v1355_v27 = vpack.c.bf16 %v58_v22, %v57_v21  ;;  %v1357_v28 = vpack.c.bf16 %v76_v24, %v75_v23  ;;  %v59_v29 = vld [vmem:[%s2071_s1 + $0x40] sm:$0xff]  ;;  %v77_v31 = vld [vmem:[%s2071_s1 + $0xd0] sm:$0xff]  ;;  %s1506_s26 = smov 101   ;;  %s1507_s3 = smov 98  }
  0x16   :  { %167 = vmatprep.mubr.f32.mxu1 %v44_v25  ;;  %v36_v26 = vld [vmem:[%s2070_s0 + $0x8] sm:$0xff]  ;;  %v78_v32 = vld [vmem:[%s2071_s1 + $0xd8] sm:$0xff]  ;;  %v61_v35 = vld [vmem:[%s2071_s1 + $0x50] sm:$0xff]  ;;  %s1508_s27 = smov 97   ;;  %s1509_s28 = smov 96  }
  0x17   :  { %1382 = vmatpush3.bf16.msra.mxu1 %v1347_v13  ;;  %1348 = vmatpush3.bf16.msra.mxu0 %v1347_v13  ;;  %v60_v30 = vld [vmem:[%s2071_s1 + $0x48] sm:$0xff]  ;;  %v1361_v34 = vpack.c.bf16 %v78_v32, %v77_v31  ;;  %v62_v36 = vld [vmem:[%s2071_s1 + $0x58] sm:$0xff]  ;;  %v79_v37 = vld [vmem:[%s2071_s1 + $0xe0] sm:$0xff]  ;;  %s1510_s29 = smov 95   ;;  %s1511_s30 = smov 94  }
  0x18   :  { %1375 = vmatprep.subr.bf16.mxu1 %v1349_v14  ;;  %1350 = vmatprep.subr.bf16.mxu0 %v1349_v14  ;;  %v1359_v33 = vpack.c.bf16 %v60_v30, %v59_v29  ;;  %v80_v38 = vld [vmem:[%s2071_s1 + $0xe8] sm:$0xff]  ;;  %v1363_v39 = vpack.c.bf16 %v62_v36, %v61_v35  ;;  %v63_v41 = vld [vmem:[%s2071_s1 + $0x60] sm:$0xff]  ;;  %v81_v43 = vld [vmem:[%s2071_s1 + $0xf0] sm:$0xff]  ;;  %s1512_s6 = smov 121   ;;  %s1513_s7 = smov 93  }
  0x19   :  { %147 = vmatprep.mubr.f32.mxu0 %v36_v26  ;;  %v1365_v40 = vpack.c.bf16 %v80_v38, %v79_v37  ;;  %v64_v42 = vld [vmem:[%s2071_s1 + $0x68] sm:$0xff]  ;;  %v82_v44 = vld [vmem:[%s2071_s1 + $0xf8] sm:$0xff]  ;;  %v65_v47 = vld [vmem:[%s2071_s1 + $0x70] sm:$0xff]  ;;  %s1514_s8 = smov 120   ;;  %s1515_s9 = smov 119  }
  0x1a   :  { %v1367_v45 = vpack.c.bf16 %v64_v42, %v63_v41  ;;  %v1369_v46 = vpack.c.bf16 %v82_v44, %v81_v43  ;;  %v66_v48 = vld [vmem:[%s2071_s1 + $0x78] sm:$0xff]  ;;  %v43_v50 = vld [vmem:[%s2070_s0 + $0x40] sm:$0xff]  ;;  %v45_v54 = vld [vmem:[%s2070_s0 + $0x50] sm:$0xff]  ;;  %s1498_s1 = smov 105   ;;  %s1516_s10 = smov 118  }
  0x1b   :  { %1383 = vmatpush3.bf16.msra.mxu1 %v1351_v19  ;;  %1352 = vmatpush3.bf16.msra.mxu0 %v1351_v19  ;;  %v1371_v49 = vpack.c.bf16 %v66_v48, %v65_v47  ;;  %v35_v51 = vld [vmem:[%s2070_s0] sm:$0xff]  ;;  %v46_v52 = vld [vmem:[%s2070_s0 + $0x58] sm:$0xff]  ;;  %v37_v55 = vld [vmem:[%s2070_s0 + $0x10] sm:$0xff]  ;;  %s1517_s11 = smov 117   ;;  %s1518_s12 = smov 116  }
  0x1c   :  { %1376 = vmatprep.subr.bf16.mxu1 %v1353_v20  ;;  %1354 = vmatprep.subr.bf16.mxu0 %v1353_v20  ;;  %v38_v53 = vld [vmem:[%s2070_s0 + $0x18] sm:$0xff]  ;;  %v40_v56 = vld [vmem:[%s2070_s0 + $0x28] sm:$0xff]  ;;  %v39_v58 = vld [vmem:[%s2070_s0 + $0x20] sm:$0xff]  ;;  %s1519_s13 = smov 115  }
  0x1d   :  { %v48_v57 = vld [vmem:[%s2070_s0 + $0x68] sm:$0xff]  ;;  %v47_v59 = vld [vmem:[%s2070_s0 + $0x60] sm:$0xff]  ;;  %v42_v60 = vld [vmem:[%s2070_s0 + $0x38] sm:$0xff] }
  0x1e   :  { %v50_v61 = vld [vmem:[%s2070_s0 + $0x78] sm:$0xff]  ;;  %v41_v62 = vld [vmem:[%s2070_s0 + $0x30] sm:$0xff] }
  0x1f   :  { %1384 = vmatpush3.bf16.msra.mxu1 %v1355_v27  ;;  %1356 = vmatpush3.bf16.msra.mxu0 %v1355_v27  ;;  %v49_v63 = vld [vmem:[%s2070_s0 + $0x70] sm:$0xff]  ;;  %s1494_s0 = smov 126  }
  0x20   :  { %1377 = vmatprep.subr.bf16.mxu1 %v1357_v28  ;;  %1358 = vmatprep.subr.bf16.mxu0 %v1357_v28 }
  0x23   :  { %1385 = vmatpush3.bf16.msra.mxu1 %v1359_v33  ;;  %1360 = vmatpush3.bf16.msra.mxu0 %v1359_v33 }
  0x24   :  { %1378 = vmatprep.subr.bf16.mxu1 %v1361_v34  ;;  %1362 = vmatprep.subr.bf16.mxu0 %v1361_v34 }
  0x27   :  { %1386 = vmatpush3.bf16.msra.mxu1 %v1363_v39  ;;  %1364 = vmatpush3.bf16.msra.mxu0 %v1363_v39 }
  0x28   :  { %1379 = vmatprep.subr.bf16.mxu1 %v1365_v40  ;;  %1366 = vmatprep.subr.bf16.mxu0 %v1365_v40 }
  0x2b   :  { %1387 = vmatpush3.bf16.msra.mxu1 %v1367_v45  ;;  %1368 = vmatpush3.bf16.msra.mxu0 %v1367_v45 }
  0x2c   :  { %1380 = vmatprep.subr.bf16.mxu1 %v1369_v46  ;;  %1370 = vmatprep.subr.bf16.mxu0 %v1369_v46 }
  0x2f   :  { %1388 = vmatpush3.bf16.msra.mxu1 %v1371_v49  ;;  %1372 = vmatpush3.bf16.msra.mxu0 %v1371_v49 }
  0x32   :  { %168 = vmatmul.mubr.f32.vlgmr.msra.gmra.mrb[0].mxu1 %v43_v50  ;;  %148 = vmatmul.mubr.f32.vlgmr.msra.gmra.mrb[0].mxu0 %v35_v51 }
  0x33   :  { %172 = vmatprep.mubr.f32.mxu1 %v46_v52  ;;  %152 = vmatprep.mubr.f32.mxu0 %v38_v53 }
  0x36   :  { %173 = vmatmul.mubr.f32.gmra.mrb[2].mxu1 %v45_v54  ;;  %153 = vmatmul.mubr.f32.gmra.mrb[2].mxu0 %v37_v55 }
  0x37   :  { %157 = vmatprep.mubr.f32.mxu0 %v40_v56  ;;  %177 = vmatprep.mubr.f32.mxu1 %v48_v57 }
  0x3a   :  { %158 = vmatmul.mubr.f32.gmra.mrb[4].mxu0 %v39_v58  ;;  %178 = vmatmul.mubr.f32.gmra.mrb[4].mxu1 %v47_v59 }
  0x3b   :  { %162 = vmatprep.mubr.f32.mxu0 %v42_v60  ;;  %182 = vmatprep.mubr.f32.mxu1 %v50_v61 }
  0x3e   :  { %163 = vmatmul.mubr.f32.gmra.mrb[6].mxu0 %v41_v62  ;;  %183 = vmatmul.mubr.f32.gmra.mrb[6].mxu1 %v49_v63 }
 0x105   :  { %v1329_v0 = vpop.f32.mrb[0].mxu1  ;;  %v1317_v1 = vpop.f32.mrb[0].mxu0 }
 0x106   :  { %v1330_v2 = vpop.f32.mrb[1].mxu1  ;;  %v1318_v3 = vpop.f32.mrb[1].mxu0 }
 0x107   :  { %v1722_v4 = vadd.f32 %v1330_v2, %v1329_v0  ;;  %v1724_v5 = vadd.f32 %v1318_v3, %v1317_v1 }
 0x109   :  { %482 = vrot.lane.b32.xlu0 %v1722_v4, %s1492_s14  ;;  %895 = vrot.lane.b32.xlu1 %v1722_v4, %s1493_s15  ;;  %v219_v6 = vrot.slane %v1724_v5, 2  ;;  %v209_v7 = vrot.slane %v1724_v5, 1  ;;  %v1332_v8 = vpop.f32.mrb[2].mxu1  ;;  %v1320_v9 = vpop.f32.mrb[2].mxu0  ;;  %v492_v18 = vrot.slane %v1722_v4, 1  ;;  %v229_v19 = vrot.slane %v1724_v5, 3 }
 0x10a   :  { %v1333_v10 = vpop.f32.mrb[3].mxu1  ;;  %v1321_v11 = vpop.f32.mrb[3].mxu0  ;;  %v502_v24 = vrot.slane %v1722_v4, 2  ;;  %v239_v25 = vrot.slane %v1724_v5, 4  ;;  %v512_v27 = vrot.slane %v1722_v4, 3  ;;  %v249_v28 = vrot.slane %v1724_v5, 5 }
 0x10b   :  { %v1732_v12 = vadd.f32 %v1333_v10, %v1332_v8  ;;  %v1734_v13 = vadd.f32 %v1321_v11, %v1320_v9  ;;  %v522_v29 = vrot.slane %v1722_v4, 4  ;;  %v259_v30 = vrot.slane %v1724_v5, 6 }
 0x10c   :  { %v532_v31 = vrot.slane %v1722_v4, 5  ;;  %v542_v32 = vrot.slane %v1722_v4, 6 }
 0x10d   :  { %220 = vrot.lane.b32.xlu1 %v219_v6, %s1494_s0  ;;  %210 = vrot.lane.b32.xlu0 %v209_v7, %s1495_s16  ;;  %v1323_v14 = vpop.f32.mrb[4].mxu0  ;;  %v1335_v15 = vpop.f32.mrb[4].mxu1  ;;  %v290_v35 = vrot.slane %v1734_v13, 2  ;;  %v300_v37 = vrot.slane %v1734_v13, 3  ;;  %v310_v38 = vrot.slane %v1734_v13, 4  ;;  %v320_v39 = vrot.slane %v1734_v13, 5 }
 0x10e   :  { %v1324_v16 = vpop.f32.mrb[5].mxu0  ;;  %v1336_v17 = vpop.f32.mrb[5].mxu1  ;;  %v330_v40 = vrot.slane %v1734_v13, 6  ;;  %v563_v41 = vrot.slane %v1732_v12, 1  ;;  %v280_v42 = vrot.slane %v1734_v13, 1  ;;  %v573_v43 = vrot.slane %v1732_v12, 2 }
 0x10f   :  { %v1740_v20 = vadd.f32 %v1324_v16, %v1323_v14  ;;  %v1742_v21 = vadd.f32 %v1336_v17, %v1335_v15  ;;  %v583_v44 = vrot.slane %v1732_v12, 3  ;;  %v593_v45 = vrot.slane %v1732_v12, 4 }
 0x110   :  { %v603_v46 = vrot.slane %v1732_v12, 5  ;;  %v613_v47 = vrot.slane %v1732_v12, 6 }
 0x111   :  { %904 = vrot.lane.b32.xlu1 %v492_v18, %s1496_s17  ;;  %230 = vrot.lane.b32.xlu0 %v229_v19, %s1497_s18  ;;  %v1326_v22 = vpop.f32.mrb[6].mxu0  ;;  %v1338_v33 = vpop.f32.mrb[6].mxu1  ;;  %v351_v48 = vrot.slane %v1740_v20, 1  ;;  %v361_v49 = vrot.slane %v1740_v20, 2  ;;  %v371_v50 = vrot.slane %v1740_v20, 3  ;;  %v381_v51 = vrot.slane %v1740_v20, 4 }
 0x112   :  { %v1327_v23 = vpop.f32.mrb[7].mxu0  ;;  %v1339_v34 = vpop.f32.mrb[7].mxu1  ;;  %v391_v52 = vrot.slane %v1740_v20, 5  ;;  %v401_v53 = vrot.slane %v1740_v20, 6 }
 0x113   :  { %v1748_v26 = vadd.f32 %v1327_v23, %v1326_v22  ;;  %v1770_v36 = vadd.f32 %v1339_v34, %v1338_v33  ;;  %v644_v22 = vrot.slane %v1742_v21, 2  ;;  %v684_v34 = vrot.slane %v1742_v21, 6 }
 0x115   :  { %913 = vrot.lane.b32.xlu1 %v502_v24, %s1498_s1  ;;  %240 = vrot.lane.b32.xlu0 %v239_v25, %s1499_s19  ;;  %v421_v54 = vrot.slane %v1748_v26, 1  ;;  %v431_v57 = vrot.slane %v1748_v26, 2  ;;  %v441_v60 = vrot.slane %v1748_v26, 3  ;;  %v451_v1 = vrot.slane %v1748_v26, 4 }
 0x116   :  { %v471_v9 = vrot.slane %v1748_v26, 6  ;;  %v654_v25 = vrot.slane %v1742_v21, 3 }
 0x119   :  { %922 = vrot.lane.b32.xlu1 %v512_v27, %s1500_s20  ;;  %250 = vrot.lane.b32.xlu0 %v249_v28, %s1501_s21  ;;  %v664_v28 = vrot.slane %v1742_v21, 4 }
 0x11d   :  { %931 = vrot.lane.b32.xlu1 %v522_v29, %s1502_s22  ;;  %260 = vrot.lane.b32.xlu0 %v259_v30, %s1503_s23 }
 0x121   :  { %940 = vrot.lane.b32.xlu1 %v532_v31, %s1504_s24  ;;  %493 = vrot.lane.b32.xlu0 %v492_v18, %s1505_s25  ;;  %v634_v18 = vrot.slane %v1742_v21, 1 }
 0x125   :  { %949 = vrot.lane.b32.xlu1 %v542_v32, %s1506_s26  ;;  %503 = vrot.lane.b32.xlu0 %v502_v24, %s1507_s3 }
 0x129   :  { %958 = vrot.lane.b32.xlu1 %v1732_v12, %s1492_s14  ;;  %513 = vrot.lane.b32.xlu0 %v512_v27, %s1508_s27  ;;  %s1520_s14 = smov 114  }
 0x12d   :  { %724 = vrot.lane.b32.xlu1 %v290_v35, %s1494_s0  ;;  %523 = vrot.lane.b32.xlu0 %v522_v29, %s1509_s28  ;;  %s1521_s0 = smov 113  }
 0x131   :  { %733 = vrot.lane.b32.xlu1 %v300_v37, %s1497_s18  ;;  %533 = vrot.lane.b32.xlu0 %v532_v31, %s1510_s29  ;;  %s1523_s18 = smov 111   ;;  %v674_v31 = vrot.slane %v1742_v21, 5 }
 0x135   :  { %742 = vrot.lane.b32.xlu1 %v310_v38, %s1499_s19  ;;  %543 = vrot.lane.b32.xlu0 %v542_v32, %s1511_s30  ;;  %s1524_s19 = smov 110  }
 0x139   :  { %751 = vrot.lane.b32.xlu1 %v320_v39, %s1501_s21  ;;  %270 = vrot.lane.b32.xlu0 %v1734_v13, %s1512_s6  ;;  %s1525_s21 = smov 109  }
 0x13d   :  { %760 = vrot.lane.b32.xlu1 %v330_v40, %s1503_s23  ;;  %553 = vrot.lane.b32.xlu0 %v1732_v12, %s1513_s7  ;;  %s1526_s23 = smov 108  }
 0x141   :  { %967 = vrot.lane.b32.xlu1 %v563_v41, %s1505_s25  ;;  %715 = vrot.lane.b32.xlu0 %v280_v42, %s1495_s16  ;;  %s1522_s16 = smov 112   ;;  %s1527_s25 = smov 92  }
 0x145   :  { %976 = vrot.lane.b32.xlu1 %v573_v43, %s1507_s3  ;;  %281 = vrot.lane.b32.xlu0 %v280_v42, %s1514_s8  ;;  %s1528_s3 = smov 91   ;;  %v1105_v42 = vrot.slane %v1770_v36, 2 }
 0x149   :  { %985 = vrot.lane.b32.xlu1 %v583_v44, %s1508_s27  ;;  %291 = vrot.lane.b32.xlu0 %v290_v35, %s1515_s9  ;;  %s1536_s27 = smov 83  }
 0x14d   :  { %994 = vrot.lane.b32.xlu1 %v593_v45, %s1509_s28  ;;  %301 = vrot.lane.b32.xlu0 %v300_v37, %s1516_s10  ;;  %s1257_s28 = sld [smem:[#allocation4 + $0x16]] }
 0x151   :  { %1003 = vrot.lane.b32.xlu1 %v603_v46, %s1510_s29  ;;  %311 = vrot.lane.b32.xlu0 %v310_v38, %s1517_s11  ;;  %s1258_s29 = sld [smem:[#allocation4 + $0x17]] }
 0x155   :  { %1012 = vrot.lane.b32.xlu1 %v613_v47, %s1511_s30  ;;  %321 = vrot.lane.b32.xlu0 %v320_v39, %s1518_s12  ;;  %s1259_s30 = sld [smem:[#allocation4 + $0x18]] }
 0x159   :  { %769 = vrot.lane.b32.xlu1 %v1740_v20, %s1512_s6  ;;  %331 = vrot.lane.b32.xlu0 %v330_v40, %s1519_s13  ;;  %v1095_v40 = vrot.slane %v1770_v36, 1  ;;  %s1260_s6 = sld [smem:[#allocation4 + $0x19]] }
 0x15d   :  { %778 = vrot.lane.b32.xlu1 %v351_v48, %s1514_s8  ;;  %341 = vrot.lane.b32.xlu0 %v1740_v20, %s1520_s14  ;;  %s1541_s8 = smov 80  }
 0x161   :  { %787 = vrot.lane.b32.xlu1 %v361_v49, %s1515_s9  ;;  %352 = vrot.lane.b32.xlu0 %v351_v48, %s1521_s0  ;;  %s1947_s9 = sld [smem:[#allocation4]] }
 0x165   :  { %796 = vrot.lane.b32.xlu1 %v371_v50, %s1516_s10  ;;  %362 = vrot.lane.b32.xlu0 %v361_v49, %s1522_s16  ;;  %s1949_s10 = sld [smem:[#allocation4 + $0x1]] }
 0x169   :  { %805 = vrot.lane.b32.xlu1 %v381_v51, %s1517_s11  ;;  %372 = vrot.lane.b32.xlu0 %v371_v50, %s1523_s18  ;;  %v1125_v50 = vrot.slane %v1770_v36, 4  ;;  %s1953_s11 = sld [smem:[#allocation4 + $0x2]] }
 0x16d   :  { %814 = vrot.lane.b32.xlu1 %v391_v52, %s1518_s12  ;;  %382 = vrot.lane.b32.xlu0 %v381_v51, %s1524_s19  ;;  %v1538_v51 = vmov 0.0   ;;  %s1957_s12 = sld [smem:[#allocation4 + $0x3]] }
 0x16e   :  { %188 = vst [vmem:[#allocation2] sm:$0xff] %v1538_v51  ;;  %189 = vst [vmem:[#allocation2 + $0x8] sm:$0xff] %v1538_v51 }
 0x16f   :  { %190 = vst [vmem:[#allocation2 + $0x10] sm:$0xff] %v1538_v51  ;;  %191 = vst [vmem:[#allocation2 + $0x18] sm:$0xff] %v1538_v51 }
 0x170   :  { %192 = vst [vmem:[#allocation2 + $0x20] sm:$0xff] %v1538_v51  ;;  %193 = vst [vmem:[#allocation2 + $0x28] sm:$0xff] %v1538_v51 }
 0x171   :  { %823 = vrot.lane.b32.xlu1 %v401_v53, %s1519_s13  ;;  %392 = vrot.lane.b32.xlu0 %v391_v52, %s1525_s21  ;;  %194 = vst [vmem:[#allocation2 + $0x30] sm:$0xff] %v1538_v51  ;;  %195 = vst [vmem:[#allocation2 + $0x38] sm:$0xff] %v1538_v51  ;;  %s1964_s13 = sld [smem:[#allocation4 + $0x4]] }
 0x175   :  { %832 = vrot.lane.b32.xlu1 %v1748_v26, %s1520_s14  ;;  %402 = vrot.lane.b32.xlu0 %v401_v53, %s1526_s23  ;;  %s1967_s14 = sld [smem:[#allocation4 + $0x5]] }
 0x179   :  { %841 = vrot.lane.b32.xlu1 %v421_v54, %s1521_s0  ;;  %412 = vrot.lane.b32.xlu0 %v1748_v26, %s1493_s15  ;;  %s1529_s15 = smov 90   ;;  %s1971_s0 = sld [smem:[#allocation4 + $0x6]] }
 0x17b   :  { %v1827_v55 = vpop.permute.xlu0 %482  ;;  %v1829_v56 = vpop.permute.xlu1 %895 }
 0x17d   :  { %850 = vrot.lane.b32.xlu1 %v431_v57, %s1522_s16  ;;  %564 = vrot.lane.b32.xlu0 %v563_v41, %s1527_s25  ;;  %s1976_s16 = sld [smem:[#allocation4 + $0x7]] }
 0x17f   :  { %v221_v58 = vpop.permute.xlu1 %220  ;;  %v211_v59 = vpop.permute.xlu0 %210 }
 0x180   :  { %v213_v61 = vadd.f32 %v1724_v5, %v211_v59  ;;  %v461_v5 = vrot.slane %v1748_v26, 5  ;;  %v1145_v59 = vrot.slane %v1770_v36, 6 }
 0x181   :  { %859 = vrot.lane.b32.xlu1 %v441_v60, %s1523_s18  ;;  %574 = vrot.lane.b32.xlu0 %v573_v43, %s1528_s3  ;;  %s1983_s18 = sld [smem:[#allocation4 + $0x8]] }
 0x182   :  { %v223_v62 = vadd.f32 %v221_v58, %v213_v61 }
 0x183   :  { %v1838_v63 = vpop.permute.xlu1 %904  ;;  %v231_v0 = vpop.permute.xlu0 %230 }
 0x184   :  { %v233_v2 = vadd.f32 %v231_v0, %v223_v62 }
 0x185   :  { %868 = vrot.lane.b32.xlu1 %v451_v1, %s1524_s19  ;;  %422 = vrot.lane.b32.xlu0 %v421_v54, %s1496_s17  ;;  %s1530_s17 = smov 89   ;;  %v1135_v54 = vrot.slane %v1770_v36, 5  ;;  %s1990_s19 = sld [smem:[#allocation4 + $0x9]] }
 0x187   :  { %v1842_v3 = vpop.permute.xlu1 %913  ;;  %v241_v4 = vpop.permute.xlu0 %240 }
 0x188   :  { %v243_v6 = vadd.f32 %v241_v4, %v233_v2 }
 0x189   :  { %877 = vrot.lane.b32.xlu1 %v461_v5, %s1525_s21  ;;  %432 = vrot.lane.b32.xlu0 %v431_v57, %s1498_s1  ;;  %s1531_s1 = smov 88   ;;  %s1997_s21 = sld [smem:[#allocation4 + $0xa]] }
 0x18b   :  { %v1847_v7 = vpop.permute.xlu1 %922  ;;  %v251_v8 = vpop.permute.xlu0 %250 }
 0x18c   :  { %v253_v10 = vadd.f32 %v251_v8, %v243_v6 }
 0x18d   :  { %886 = vrot.lane.b32.xlu1 %v471_v9, %s1526_s23  ;;  %442 = vrot.lane.b32.xlu0 %v441_v60, %s1500_s20  ;;  %s1532_s20 = smov 87   ;;  %s2008_s23 = sld [smem:[#allocation4 + $0xb]] }
 0x18f   :  { %v1852_v11 = vpop.permute.xlu1 %931  ;;  %v261_v14 = vpop.permute.xlu0 %260 }
 0x190   :  { %v1854_v15 = vadd.f32 %v261_v14, %v253_v10 }
 0x191   :  { %1021 = vrot.lane.b32.xlu1 %v1742_v21, %s1513_s7  ;;  %452 = vrot.lane.b32.xlu0 %v451_v1, %s1502_s22  ;;  %s1533_s22 = smov 86   ;;  %s1539_s7 = smov 82  }
 0x193   :  { %v1859_v16 = vpop.permute.xlu1 %940  ;;  %v1861_v17 = vpop.permute.xlu0 %493 }
 0x195   :  { %1030 = vrot.lane.b32.xlu1 %v634_v18, %s1527_s25  ;;  %462 = vrot.lane.b32.xlu0 %v461_v5, %s1504_s24  ;;  %s1534_s24 = smov 85   ;;  %s2017_s25 = sld [smem:[#allocation4 + $0xc]] }
 0x197   :  { %v1866_v19 = vpop.permute.xlu1 %949  ;;  %v1868_v20 = vpop.permute.xlu0 %503 }
 0x199   :  { %1039 = vrot.lane.b32.xlu1 %v644_v22, %s1528_s3  ;;  %472 = vrot.lane.b32.xlu0 %v471_v9, %s1506_s26  ;;  %s1535_s26 = smov 84   ;;  %s2024_s3 = sld [smem:[#allocation4 + $0xd]] }
 0x19b   :  { %v1873_v23 = vpop.permute.xlu1 %958  ;;  %v1875_v24 = vpop.permute.xlu0 %513 }
 0x19d   :  { %1048 = vrot.lane.b32.xlu1 %v654_v25, %s1529_s15  ;;  %584 = vrot.lane.b32.xlu0 %v583_v44, %s1529_s15  ;;  %v1115_v44 = vrot.slane %v1770_v36, 3  ;;  %s2031_s15 = sld [smem:[#allocation4 + $0xe]] }
 0x19f   :  { %v1880_v26 = vpop.permute.xlu1 %724  ;;  %v1882_v27 = vpop.permute.xlu0 %523 }
 0x1a1   :  { %1057 = vrot.lane.b32.xlu1 %v664_v28, %s1530_s17  ;;  %594 = vrot.lane.b32.xlu0 %v593_v45, %s1530_s17  ;;  %v1537_v45 = vmov 0   ;;  %s2038_s17 = sld [smem:[#allocation4 + $0xf]] }
 0x1a2   :  { %1444 = vset.pattern.permute.xlu1 %v1537_v45  ;;  %1443 = vset.pattern.permute.xlu0 %v1537_v45 }
 0x1a3   :  { %v1887_v29 = vpop.permute.xlu1 %733  ;;  %v1889_v30 = vpop.permute.xlu0 %533 }
 0x1a5   :  { %1066 = vrot.lane.b32.xlu1 %v674_v31, %s1531_s1  ;;  %604 = vrot.lane.b32.xlu0 %v603_v46, %s1531_s1  ;;  %v196_v46 = vld [vmem:[%s2072_s2] sm:$0x3]  ;;  %s2044_s1 = sld [smem:[#allocation4 + $0x10]] }
 0x1a6   :  { %199 = vst [vmem:[#allocation2 + $0x1b] sm:$0x3] %v196_v46 }
 0x1a7   :  { %v1894_v32 = vpop.permute.xlu1 %742  ;;  %v1896_v33 = vpop.permute.xlu0 %543 }
 0x1a9   :  { %1075 = vrot.lane.b32.xlu1 %v684_v34, %s1532_s20  ;;  %614 = vrot.lane.b32.xlu0 %v613_v47, %s1532_s20  ;;  %v197_v47 = vld [vmem:[%s2072_s2 + $0x2] sm:$0x3]  ;;  %s1540_s2 = smov 81   ;;  %s2048_s20 = sld [smem:[#allocation4 + $0x11]] }
 0x1aa   :  { %200 = vst [vmem:[#allocation2 + $0x23] sm:$0x3] %v197_v47 }
 0x1ab   :  { %v1901_v35 = vpop.permute.xlu1 %751  ;;  %v1903_v37 = vpop.permute.xlu0 %270 }
 0x1ad   :  { %1085 = vrot.lane.b32.xlu1 %v1770_v36, %s1533_s22  ;;  %624 = vrot.lane.b32.xlu0 %v1742_v21, %s1533_s22  ;;  %s2051_s22 = sld [smem:[#allocation4 + $0x12]] }
 0x1af   :  { %v1907_v38 = vpop.permute.xlu1 %760  ;;  %v1909_v39 = vpop.permute.xlu0 %553 }
 0x1b1   :  { %1096 = vrot.lane.b32.xlu1 %v1095_v40, %s1534_s24  ;;  %635 = vrot.lane.b32.xlu0 %v634_v18, %s1534_s24  ;;  %s1254_s24 = sld [smem:[#allocation4 + $0x13]] }
 0x1b3   :  { %v1912_v12 = vpop.permute.xlu1 %967  ;;  %v716_v41 = vpop.permute.xlu0 %715 }
 0x1b4   :  { %v718_v4 = vadd.f32 %v1734_v13, %v716_v41  ;;  %v273_v13 = vadd.f32 %v1903_v37, %v1854_v15 }
 0x1b5   :  { %1106 = vrot.lane.b32.xlu1 %v1105_v42, %s1535_s26  ;;  %645 = vrot.lane.b32.xlu0 %v644_v22, %s1535_s26  ;;  %s1255_s26 = sld [smem:[#allocation4 + $0x14]] }
 0x1b6   :  { %v727_v8 = vadd.f32 %v1880_v26, %v718_v4  ;;  %v712_v4 = vstv %s1947_s9  ;;  %s1264_s9 = sld [smem:[#allocation4 + $0x1d]] }
 0x1b7   :  { %v1915_v43 = vpop.permute.xlu1 %976  ;;  %v282_v21 = vpop.permute.xlu0 %281 }
 0x1b8   :  { %v736_v36 = vadd.f32 %v1887_v29, %v727_v8  ;;  %v284_v41 = vadd.f32 %v282_v21, %v273_v13  ;;  %v721_v8 = vstv %s1949_s10  ;;  %s1265_s10 = sld [smem:[#allocation4 + $0x1e]] }
 0x1b9   :  { %1116 = vrot.lane.b32.xlu1 %v1115_v44, %s1536_s27  ;;  %655 = vrot.lane.b32.xlu0 %v654_v25, %s1536_s27  ;;  %s1256_s27 = sld [smem:[#allocation4 + $0x15]] }
 0x1ba   :  { %v745_v22 = vadd.f32 %v1894_v32, %v736_v36  ;;  %v203_v36 = vld [vmem:[#allocation2] sm:$0x3] }
 0x1bb   :  { %v1924_v48 = vpop.permute.xlu1 %985  ;;  %v292_v49 = vpop.permute.xlu0 %291 }
 0x1bc   :  { %v294_v45 = vadd.f32 %v292_v49, %v284_v41 }
 0x1bd   :  { %1126 = vrot.lane.b32.xlu1 %v1125_v50, %s1539_s7  ;;  %665 = vrot.lane.b32.xlu0 %v664_v28, %s1539_s7  ;;  %s1261_s7 = sld [smem:[#allocation4 + $0x1a]] }
 0x1bf   :  { %v1927_v52 = vpop.permute.xlu1 %994  ;;  %v302_v53 = vpop.permute.xlu0 %301 }
 0x1c0   :  { %v304_v32 = vadd.f32 %v302_v53, %v294_v45 }
 0x1c1   :  { %1136 = vrot.lane.b32.xlu1 %v1135_v54, %s1540_s2  ;;  %675 = vrot.lane.b32.xlu0 %v674_v31, %s1540_s2  ;;  %v754_v31 = vadd.f32 %v1901_v35, %v745_v22  ;;  %s1262_s2 = sld [smem:[#allocation4 + $0x1b]] }
 0x1c3   :  { %v1930_v57 = vpop.permute.xlu1 %1003  ;;  %v312_v58 = vpop.permute.xlu0 %311  ;;  %v763_v26 = vadd.f32 %v1907_v38, %v754_v31 }
 0x1c4   :  { %v314_v15 = vadd.f32 %v312_v58, %v304_v32 }
 0x1c5   :  { %1146 = vrot.lane.b32.xlu1 %v1145_v59, %s1541_s8  ;;  %685 = vrot.lane.b32.xlu0 %v684_v34, %s1541_s8  ;;  %s1263_s8 = sld [smem:[#allocation4 + $0x1c]] }
 0x1c7   :  { %v1933_v60 = vpop.permute.xlu1 %1012  ;;  %v322_v61 = vpop.permute.xlu0 %321 }
 0x1c8   :  { %v324_v38 = vadd.f32 %v322_v61, %v314_v15  ;;  %v214_v61 = vld [vmem:[#allocation2 + $0x1] sm:$0x3] }
 0x1c9   :  { %v217_v41 = vmul.f32 %v721_v8, %v214_v61 }
 0x1cb   :  { %v770_v62 = vpop.permute.xlu1 %769  ;;  %v332_v0 = vpop.permute.xlu0 %331 }
 0x1cc   :  { %v772_v42 = vadd.f32 %v770_v62, %v763_v26  ;;  %v334_v53 = vadd.f32 %v332_v0, %v324_v38  ;;  %v206_v26 = vmul.f32 %v712_v4, %v203_v36 }
 0x1cf   :  { %v779_v1 = vpop.permute.xlu1 %778  ;;  %v342_v2 = vpop.permute.xlu0 %341 }
 0x1d0   :  { %v781_v46 = vadd.f32 %v779_v1, %v772_v42  ;;  %v344_v59 = vadd.f32 %v342_v2, %v334_v53  ;;  %v710_v1 = vld [vmem:[#allocation2 + $0x8] sm:$0x3]  ;;  %v218_v53 = vadd.f32 %v217_v41, %v206_v26 }
 0x1d1   :  { %v713_v31 = vmul.f32 %v712_v4, %v710_v1 }
 0x1d3   :  { %v788_v5 = vpop.permute.xlu1 %787  ;;  %v353_v6 = vpop.permute.xlu0 %352 }
 0x1d4   :  { %v790_v47 = vadd.f32 %v788_v5, %v781_v46  ;;  %v719_v5 = vld [vmem:[#allocation2 + $0x9] sm:$0x3]  ;;  %v224_v46 = vld [vmem:[#allocation2 + $0x2] sm:$0x3] }
 0x1d5   :  { %v722_v0 = vmul.f32 %v721_v8, %v719_v5 }
 0x1d7   :  { %v797_v9 = vpop.permute.xlu1 %796  ;;  %v363_v10 = vpop.permute.xlu0 %362  ;;  %v723_v15 = vadd.f32 %v722_v0, %v713_v31 }
 0x1d8   :  { %v799_v37 = vadd.f32 %v797_v9, %v790_v47 }
 0x1db   :  { %v806_v14 = vpop.permute.xlu1 %805  ;;  %v373_v18 = vpop.permute.xlu0 %372 }
 0x1dc   :  { %v808_v21 = vadd.f32 %v806_v14, %v799_v37  ;;  %v355_v14 = vadd.f32 %v353_v6, %v344_v59  ;;  %v234_v59 = vld [vmem:[#allocation2 + $0x3] sm:$0x3] }
 0x1de   :  { %v365_v13 = vadd.f32 %v363_v10, %v355_v14 }
 0x1df   :  { %v815_v25 = vpop.permute.xlu1 %814  ;;  %v383_v28 = vpop.permute.xlu0 %382 }
 0x1e0   :  { %v817_v54 = vadd.f32 %v815_v25, %v808_v21  ;;  %v730_v25 = vstv %s1953_s11  ;;  %v375_v32 = vadd.f32 %v373_v18, %v365_v13  ;;  %v737_v21 = vld [vmem:[#allocation2 + $0xb] sm:$0x3]  ;;  %v757_v13 = vstv %s1967_s14  ;;  %s1266_s11 = sld [smem:[#allocation4 + $0x1f]]  ;;  %s1269_s14 = sld [smem:[#allocation4 + $0x22]] }
 0x1e1   :  { %v227_v10 = vmul.f32 %v730_v25, %v224_v46 }
 0x1e2   :  { %v385_v37 = vadd.f32 %v383_v28, %v375_v32  ;;  %v746_v28 = vld [vmem:[#allocation2 + $0xc] sm:$0x3]  ;;  %v254_v32 = vld [vmem:[#allocation2 + $0x5] sm:$0x3] }
 0x1e3   :  { %v824_v34 = vpop.permute.xlu1 %823  ;;  %v1940_v40 = vpop.permute.xlu0 %392 }
 0x1e4   :  { %v826_v62 = vadd.f32 %v824_v34, %v817_v54  ;;  %v728_v34 = vld [vmem:[#allocation2 + $0xa] sm:$0x3] }
 0x1e5   :  { %v731_v6 = vmul.f32 %v730_v25, %v728_v34 }
 0x1e7   :  { %v833_v44 = vpop.permute.xlu1 %832  ;;  %v1945_v29 = vpop.permute.xlu0 %402  ;;  %v732_v4 = vadd.f32 %v731_v6, %v723_v15 }
 0x1e8   :  { %v835_v22 = vadd.f32 %v833_v44, %v826_v62  ;;  %v739_v44 = vstv %s1957_s12  ;;  %v395_v62 = vadd.f32 %v1940_v40, %v385_v37  ;;  %s1267_s12 = sld [smem:[#allocation4 + $0x20]] }
 0x1e9   :  { %v740_v18 = vmul.f32 %v739_v44, %v737_v21  ;;  %v237_v36 = vmul.f32 %v739_v44, %v234_v59  ;;  %v766_v44 = vstv %s1971_s0  ;;  %v257_v21 = vmul.f32 %v757_v13, %v254_v32  ;;  %v791_v32 = vld [vmem:[#allocation2 + $0x12] sm:$0x3]  ;;  %s1270_s0 = sld [smem:[#allocation4 + $0x23]] }
 0x1ea   :  { %v405_v5 = vadd.f32 %v1945_v29, %v395_v62  ;;  %v755_v29 = vld [vmem:[#allocation2 + $0xd] sm:$0x3] }
 0x1eb   :  { %v842_v35 = vpop.permute.xlu1 %841  ;;  %v1951_v50 = vpop.permute.xlu0 %412  ;;  %v741_v40 = vadd.f32 %v740_v18, %v732_v4  ;;  %v758_v6 = vmul.f32 %v757_v13, %v755_v29  ;;  %v773_v18 = vld [vmem:[#allocation2 + $0x10] sm:$0x3] }
 0x1ec   :  { %v844_v2 = vadd.f32 %v842_v35, %v835_v22  ;;  %v244_v22 = vld [vmem:[#allocation2 + $0x4] sm:$0x3]  ;;  %v415_v31 = vadd.f32 %v1951_v50, %v405_v5 }
 0x1ef   :  { %v851_v51 = vpop.permute.xlu1 %850  ;;  %v1955_v49 = vpop.permute.xlu0 %564 }
 0x1f0   :  { %v853_v47 = vadd.f32 %v851_v51, %v844_v2  ;;  %v748_v51 = vstv %s1964_s13  ;;  %s1268_s13 = sld [smem:[#allocation4 + $0x21]] }
 0x1f1   :  { %v749_v25 = vmul.f32 %v748_v51, %v746_v28  ;;  %v247_v41 = vmul.f32 %v748_v51, %v244_v22  ;;  %v784_v22 = vstv %s1983_s18  ;;  %s1272_s18 = sld [smem:[#allocation4 + $0x25]] }
 0x1f3   :  { %v860_v58 = vpop.permute.xlu1 %859  ;;  %v1961_v9 = vpop.permute.xlu0 %574  ;;  %v750_v15 = vadd.f32 %v749_v25, %v741_v40 }
 0x1f4   :  { %v862_v38 = vadd.f32 %v860_v58, %v853_v47  ;;  %v228_v58 = vadd.f32 %v227_v10, %v218_v53 }
 0x1f6   :  { %v238_v26 = vadd.f32 %v237_v36, %v228_v58  ;;  %v275_v58 = vld [vmem:[#allocation2 + $0x8] sm:$0x3] }
 0x1f7   :  { %v869_v42 = vpop.permute.xlu1 %868  ;;  %v423_v45 = vpop.permute.xlu0 %422 }
 0x1f8   :  { %v871_v1 = vadd.f32 %v869_v42, %v862_v38  ;;  %v425_v2 = vadd.f32 %v423_v45, %v415_v31  ;;  %v248_v38 = vadd.f32 %v247_v41, %v238_v26 }
 0x1fa   :  { %v258_v51 = vadd.f32 %v257_v21, %v248_v38  ;;  %v800_v38 = vld [vmem:[#allocation2 + $0x13] sm:$0x3] }
 0x1fb   :  { %v878_v35 = vpop.permute.xlu1 %877  ;;  %v433_v54 = vpop.permute.xlu0 %432 }
 0x1fc   :  { %v880_v8 = vadd.f32 %v878_v35, %v871_v1  ;;  %v435_v47 = vadd.f32 %v433_v54, %v425_v2  ;;  %v264_v35 = vld [vmem:[#allocation2 + $0x6] sm:$0x3]  ;;  %v775_v1 = vstv %s1976_s16  ;;  %s1271_s16 = sld [smem:[#allocation4 + $0x24]] }
 0x1fd   :  { %v267_v5 = vmul.f32 %v766_v44, %v264_v35  ;;  %v278_v25 = vmul.f32 %v775_v1, %v275_v58 }
 0x1ff   :  { %v887_v61 = vpop.permute.xlu1 %886  ;;  %v443_v14 = vpop.permute.xlu0 %442  ;;  %v268_v40 = vadd.f32 %v267_v5, %v258_v51 }
 0x200   :  { %v889_v0 = vadd.f32 %v887_v61, %v880_v8  ;;  %v445_v37 = vadd.f32 %v443_v14, %v435_v47  ;;  %v776_v14 = vmul.f32 %v775_v1, %v773_v18  ;;  %v811_v1 = vstv %s2008_s23  ;;  %s1275_s23 = sld [smem:[#allocation4 + $0x28]] }
 0x201   :  { %v279_v47 = vadd.f32 %v278_v25, %v268_v40 }
 0x202   :  { %v898_v34 = vadd.f32 %v1829_v56, %v889_v0  ;;  %v764_v56 = vld [vmem:[#allocation2 + $0xe] sm:$0x3]  ;;  %v782_v0 = vld [vmem:[#allocation2 + $0x11] sm:$0x3] }
 0x203   :  { %v1979_v42 = vpop.permute.xlu1 %1021  ;;  %v453_v46 = vpop.permute.xlu0 %452  ;;  %v767_v62 = vmul.f32 %v766_v44, %v764_v56  ;;  %v785_v41 = vmul.f32 %v784_v22, %v782_v0  ;;  %v295_v44 = vld [vmem:[#allocation2 + $0xa] sm:$0x3]  ;;  %v802_v56 = vstv %s1997_s21  ;;  %v325_v0 = vld [vmem:[#allocation2 + $0xd] sm:$0x3]  ;;  %s1274_s21 = sld [smem:[#allocation4 + $0x27]] }
 0x204   :  { %v907_v50 = vadd.f32 %v1838_v63, %v898_v34  ;;  %v455_v59 = vadd.f32 %v453_v46, %v445_v37  ;;  %v759_v63 = vadd.f32 %v758_v6, %v750_v15  ;;  %v285_v34 = vld [vmem:[#allocation2 + $0x9] sm:$0x3]  ;;  %v793_v46 = vstv %s1990_s19  ;;  %s1273_s19 = sld [smem:[#allocation4 + $0x26]] }
 0x205   :  { %v794_v37 = vmul.f32 %v793_v46, %v791_v32 }
 0x206   :  { %v916_v45 = vadd.f32 %v1842_v3, %v907_v50  ;;  %v768_v61 = vadd.f32 %v767_v62, %v759_v63  ;;  %v288_v50 = vmul.f32 %v784_v22, %v285_v34  ;;  %v803_v62 = vmul.f32 %v802_v56, %v800_v38 }
 0x207   :  { %v1986_v53 = vpop.permute.xlu1 %1030  ;;  %v463_v10 = vpop.permute.xlu0 %462  ;;  %v829_v34 = vstv %s2024_s3  ;;  %s1277_s3 = sld [smem:[#allocation4 + $0x2a]] }
 0x208   :  { %v925_v54 = vadd.f32 %v1847_v7, %v916_v45  ;;  %v465_v3 = vadd.f32 %v463_v10, %v455_v59  ;;  %v777_v26 = vadd.f32 %v776_v14, %v768_v61  ;;  %v289_v21 = vadd.f32 %v288_v50, %v279_v47  ;;  %v305_v59 = vld [vmem:[#allocation2 + $0xb] sm:$0x3]  ;;  %v818_v61 = vld [vmem:[#allocation2 + $0x15] sm:$0x3] }
 0x209   :  { %v298_v10 = vmul.f32 %v793_v46, %v295_v44  ;;  %v308_v18 = vmul.f32 %v802_v56, %v305_v59  ;;  %v838_v47 = vstv %s2031_s15  ;;  %v836_v44 = vld [vmem:[#allocation2 + $0x18] sm:$0x3]  ;;  %s1278_s15 = sld [smem:[#allocation4 + $0x2b]] }
 0x20a   :  { %v934_v4 = vadd.f32 %v1852_v11, %v925_v54  ;;  %v786_v45 = vadd.f32 %v785_v41, %v777_v26 }
 0x20b   :  { %v1993_v8 = vpop.permute.xlu1 %1039  ;;  %v473_v28 = vpop.permute.xlu0 %472 }
 0x20c   :  { %v943_v36 = vadd.f32 %v1859_v16, %v934_v4  ;;  %v475_v7 = vadd.f32 %v473_v28, %v465_v3  ;;  %v795_v63 = vadd.f32 %v794_v37, %v786_v45  ;;  %v809_v4 = vld [vmem:[#allocation2 + $0x14] sm:$0x3]  ;;  %v299_v3 = vadd.f32 %v298_v10, %v289_v21  ;;  %v315_v28 = vld [vmem:[#allocation2 + $0xc] sm:$0x3]  ;;  %v346_v37 = vld [vmem:[#allocation2 + $0x10] sm:$0x3] }
 0x20d   :  { %v318_v22 = vmul.f32 %v811_v1, %v315_v28  ;;  %v845_v10 = vld [vmem:[#allocation2 + $0x19] sm:$0x3] }
 0x20e   :  { %v952_v31 = vadd.f32 %v1866_v19, %v943_v36  ;;  %v485_v11 = vadd.f32 %v1827_v55, %v475_v7  ;;  %v804_v58 = vadd.f32 %v803_v62, %v795_v63  ;;  %v812_v36 = vmul.f32 %v811_v1, %v809_v4 }
 0x20f   :  { %v2001_v13 = vpop.permute.xlu1 %1048  ;;  %v2003_v2 = vpop.permute.xlu0 %584  ;;  %v820_v7 = vstv %s2017_s25  ;;  %v309_v14 = vadd.f32 %v308_v18, %v299_v3  ;;  %v854_v3 = vld [vmem:[#allocation2 + $0x1a] sm:$0x3]  ;;  %s1276_s25 = sld [smem:[#allocation4 + $0x29]] }
 0x210   :  { %v961_v16 = vadd.f32 %v1873_v23, %v952_v31  ;;  %v496_v29 = vadd.f32 %v1861_v17, %v485_v11  ;;  %v813_v40 = vadd.f32 %v812_v36, %v804_v58  ;;  %v821_v25 = vmul.f32 %v820_v7, %v818_v61 }
 0x211   :  { %v328_v26 = vmul.f32 %v820_v7, %v325_v0 }
 0x212   :  { %v970_v55 = vadd.f32 %v1912_v12, %v961_v16  ;;  %v506_v19 = vadd.f32 %v1868_v20, %v496_v29  ;;  %v827_v16 = vld [vmem:[#allocation2 + $0x16] sm:$0x3]  ;;  %v319_v29 = vadd.f32 %v318_v22, %v309_v14  ;;  %v863_v14 = vld [vmem:[#allocation2 + $0x1b] sm:$0x3] }
 0x213   :  { %v2012_v15 = vpop.permute.xlu1 %1057  ;;  %v595_v6 = vpop.permute.xlu0 %594  ;;  %v830_v32 = vmul.f32 %v829_v34, %v827_v16  ;;  %v872_v16 = vld [vmem:[#allocation2 + $0x1c] sm:$0x3] }
 0x214   :  { %v979_v23 = vadd.f32 %v1915_v43, %v970_v55  ;;  %v516_v17 = vadd.f32 %v1875_v24, %v506_v19  ;;  %v335_v55 = vld [vmem:[#allocation2 + $0xe] sm:$0x3] }
 0x216   :  { %v988_v12 = vadd.f32 %v1924_v48, %v979_v23  ;;  %v526_v20 = vadd.f32 %v1882_v27, %v516_v17  ;;  %v338_v23 = vmul.f32 %v829_v34, %v335_v55  ;;  %v874_v34 = vstv %s2051_s22  ;;  %v386_v55 = vld [vmem:[#allocation2 + $0x14] sm:$0x3]  ;;  %s1282_s22 = sld [smem:[#allocation4 + $0x2f]] }
 0x217   :  { %v1067_v35 = vpop.permute.xlu1 %1066  ;;  %v605_v54 = vpop.permute.xlu0 %604 }
 0x218   :  { %v997_v43 = vadd.f32 %v1927_v52, %v988_v12  ;;  %v536_v24 = vadd.f32 %v1889_v30, %v526_v20 }
 0x21a   :  { %v1006_v48 = vadd.f32 %v1930_v57, %v997_v43  ;;  %v546_v27 = vadd.f32 %v1896_v33, %v536_v24  ;;  %v356_v24 = vld [vmem:[#allocation2 + $0x11] sm:$0x3] }
 0x21b   :  { %v1076_v51 = vpop.permute.xlu1 %1075  ;;  %v615_v5 = vpop.permute.xlu0 %614 }
 0x21c   :  { %v1015_v52 = vadd.f32 %v1933_v60, %v1006_v48  ;;  %v556_v30 = vadd.f32 %v1909_v39, %v546_v27  ;;  %v856_v48 = vstv %s2044_s1  ;;  %s1280_s1 = sld [smem:[#allocation4 + $0x2d]] }
 0x21d   :  { %v857_v7 = vmul.f32 %v856_v48, %v854_v3 }
 0x21e   :  { %v1024_v57 = vadd.f32 %v1979_v42, %v1015_v52  ;;  %v567_v33 = vadd.f32 %v1955_v49, %v556_v30  ;;  %v366_v52 = vld [vmem:[#allocation2 + $0x12] sm:$0x3] }
 0x21f   :  { %v1086_v31 = vpop.permute.xlu1 %1085  ;;  %v625_v11 = vpop.permute.xlu0 %624 }
 0x220   :  { %v1033_v60 = vadd.f32 %v1986_v53, %v1024_v57  ;;  %v577_v39 = vadd.f32 %v1961_v9, %v567_v33  ;;  %v822_v9 = vadd.f32 %v821_v25, %v813_v40  ;;  %v865_v57 = vstv %s2048_s20  ;;  %s1281_s20 = sld [smem:[#allocation4 + $0x2e]] }
 0x221   :  { %v866_v25 = vmul.f32 %v865_v57, %v863_v14 }
 0x222   :  { %v1042_v42 = vadd.f32 %v1993_v8, %v1033_v60  ;;  %v587_v49 = vadd.f32 %v2003_v2, %v577_v39  ;;  %v329_v2 = vadd.f32 %v328_v26, %v319_v29  ;;  %v831_v20 = vadd.f32 %v830_v32, %v822_v9  ;;  %v376_v60 = vld [vmem:[#allocation2 + $0x13] sm:$0x3] }
 0x223   :  { %v1097_v41 = vpop.permute.xlu1 %1096  ;;  %v636_v46 = vpop.permute.xlu0 %635  ;;  %v379_v26 = vmul.f32 %v865_v57, %v376_v60  ;;  %v875_v9 = vmul.f32 %v874_v34, %v872_v16  ;;  %v446_v57 = vld [vmem:[#allocation2 + $0x1b] sm:$0x3] }
 0x224   :  { %v1051_v53 = vadd.f32 %v2001_v13, %v1042_v42  ;;  %v597_v19 = vadd.f32 %v595_v6, %v587_v49  ;;  %v839_v13 = vmul.f32 %v838_v47, %v836_v44  ;;  %v847_v6 = vstv %s2038_s17  ;;  %s1279_s17 = sld [smem:[#allocation4 + $0x2c]] }
 0x225   :  { %v339_v59 = vadd.f32 %v338_v23, %v329_v2  ;;  %v883_v44 = vstv %s1254_s24  ;;  %v396_v2 = vld [vmem:[#allocation2 + $0x15] sm:$0x3]  ;;  %s1283_s24 = sld [smem:[#allocation4 + $0x30]] }
 0x226   :  { %v1060_v50 = vadd.f32 %v2012_v15, %v1051_v53  ;;  %v607_v8 = vadd.f32 %v605_v54, %v597_v19  ;;  %v349_v15 = vmul.f32 %v838_v47, %v346_v37  ;;  %v840_v1 = vadd.f32 %v839_v13, %v831_v20  ;;  %v406_v20 = vld [vmem:[#allocation2 + $0x16] sm:$0x3] }
 0x227   :  { %v1107_v17 = vpop.permute.xlu1 %1106  ;;  %v646_v45 = vpop.permute.xlu0 %645  ;;  %v399_v37 = vmul.f32 %v883_v44, %v396_v2 }
 0x228   :  { %v1069_v56 = vadd.f32 %v1067_v35, %v1060_v50  ;;  %v617_v12 = vadd.f32 %v615_v5, %v607_v8  ;;  %v848_v35 = vmul.f32 %v847_v6, %v845_v10  ;;  %v350_v18 = vadd.f32 %v349_v15, %v339_v59  ;;  %v881_v8 = vld [vmem:[#allocation2 + $0x1d] sm:$0x3]  ;;  %v899_v10 = vld [vmem:[#allocation2 + $0x20] sm:$0x3]  ;;  %v416_v15 = vld [vmem:[#allocation2 + $0x18] sm:$0x3] }
 0x229   :  { %v389_v50 = vmul.f32 %v874_v34, %v386_v55  ;;  %v901_v59 = vstv %s1256_s27  ;;  %v944_v34 = vld [vmem:[#allocation2 + $0x25] sm:$0x3]  ;;  %v955_v55 = vstv %s1262_s2 }
 0x22a   :  { %v1078_v38 = vadd.f32 %v1076_v51, %v1069_v56  ;;  %v627_v21 = vadd.f32 %v625_v11, %v617_v12  ;;  %v359_v51 = vmul.f32 %v847_v6, %v356_v24  ;;  %v849_v36 = vadd.f32 %v848_v35, %v840_v1  ;;  %v890_v56 = vld [vmem:[#allocation2 + $0x1e] sm:$0x3]  ;;  %v426_v35 = vld [vmem:[#allocation2 + $0x19] sm:$0x3] }
 0x22b   :  { %v1117_v54 = vpop.permute.xlu1 %1116  ;;  %v656_v43 = vpop.permute.xlu0 %655  ;;  %v892_v12 = vstv %s1255_s26  ;;  %v910_v1 = vstv %s1257_s28  ;;  %s1542_s28 = smov [#allocation7]  }
 0x22c   :  { %v1088_v63 = vadd.f32 %v1086_v31, %v1078_v38  ;;  %v638_v62 = vadd.f32 %v636_v46, %v627_v21  ;;  %v360_v22 = vadd.f32 %v359_v51, %v350_v18  ;;  %v369_v31 = vmul.f32 %v856_v48, %v366_v52  ;;  %v917_v18 = vld [vmem:[#allocation2 + $0x22] sm:$0x3] }
 0x22d   :  { %v858_v40 = vadd.f32 %v857_v7, %v849_v36  ;;  %v893_v6 = vmul.f32 %v892_v12, %v890_v56  ;;  %v409_v21 = vmul.f32 %v892_v12, %v406_v20  ;;  %v429_v3 = vmul.f32 %v910_v1, %v426_v35  ;;  %v926_v36 = vld [vmem:[#allocation2 + $0x23] sm:$0x3]  ;;  %v497_v12 = vld [vmem:[#allocation2 + $0x21] sm:$0x3] }
 0x22e   :  { %v1099_v27 = vadd.f32 %v1097_v41, %v1088_v63  ;;  %v648_v4 = vadd.f32 %v646_v45, %v638_v62  ;;  %v370_v29 = vadd.f32 %v369_v31, %v360_v22  ;;  %v419_v63 = vmul.f32 %v901_v59, %v416_v15  ;;  %v908_v62 = vld [vmem:[#allocation2 + $0x21] sm:$0x3]  ;;  %v935_v31 = vld [vmem:[#allocation2 + $0x24] sm:$0x3] }
 0x22f   :  { %v1127_v5 = vpop.permute.xlu1 %1126  ;;  %v666_v28 = vpop.permute.xlu0 %665  ;;  %v867_v32 = vadd.f32 %v866_v25, %v858_v40  ;;  %v919_v51 = vstv %s1258_s29  ;;  %v928_v7 = vstv %s1259_s30  ;;  %v973_v56 = vstv %s1264_s9  ;;  %s1175_s29 = sshll.u32 %s1542_s28, 4  ;;  %s1176_s29 = int_to_ptr.vmem [resolvable:$true] %s1175_s29 }
 0x230   :  { %v1109_v30 = vadd.f32 %v1107_v17, %v1099_v27  ;;  %v658_v58 = vadd.f32 %v656_v43, %v648_v4  ;;  %v380_v47 = vadd.f32 %v379_v26, %v370_v29  ;;  %v884_v17 = vmul.f32 %v883_v44, %v881_v8  ;;  %v487_v44 = vld [vmem:[#allocation2 + $0x20] sm:$0x3]  ;;  %p1470_p6 = scmp.lt.s32.totalorder %s1176_s29, %s1176_s29 }
 0x231   :  { %v876_v23 = vadd.f32 %v875_v9, %v867_v32  ;;  %v902_v43 = vmul.f32 %v901_v59, %v899_v10  ;;  %v911_v27 = vmul.f32 %v910_v1, %v908_v62  ;;  %v920_v52 = vmul.f32 %v919_v51, %v917_v18  ;;  %v507_v59 = vld [vmem:[#allocation2 + $0x22] sm:$0x3] }
 0x232   :  { %v1119_v33 = vadd.f32 %v1117_v54, %v1109_v30  ;;  %v668_v61 = vadd.f32 %v666_v28, %v658_v58  ;;  %v390_v45 = vadd.f32 %v389_v50, %v380_v47  ;;  %v449_v22 = vmul.f32 %v928_v7, %v446_v57  ;;  %v962_v50 = vld [vmem:[#allocation2 + $0x28] sm:$0x3]  ;;  %v517_v1 = vld [vmem:[#allocation2 + $0x23] sm:$0x3] }
 0x233   :  { %v1137_v11 = vpop.permute.xlu1 %1136  ;;  %v676_v0 = vpop.permute.xlu0 %675  ;;  %v885_v13 = vadd.f32 %v884_v17, %v876_v23  ;;  %v964_v8 = vstv %s1263_s8  ;;  %v982_v10 = vstv %s1265_s10  ;;  %v991_v62 = vstv %s1266_s11 }
 0x234   :  { %v1129_v39 = vadd.f32 %v1127_v5, %v1119_v33  ;;  %v678_v49 = vadd.f32 %v676_v0, %v668_v61  ;;  %v400_v38 = vadd.f32 %v399_v37, %v390_v45  ;;  %v436_v5 = vld [vmem:[#allocation2 + $0x1a] sm:$0x3]  ;;  %v929_v61 = vmul.f32 %v928_v7, %v926_v36  ;;  %v456_v0 = vld [vmem:[#allocation2 + $0x1c] sm:$0x3]  ;;  %v971_v37 = vld [vmem:[#allocation2 + $0x29] sm:$0x3] }
 0x235   :  { %v894_v54 = vadd.f32 %v893_v6, %v885_v13  ;;  %v439_v58 = vmul.f32 %v919_v51, %v436_v5  ;;  %v965_v23 = vmul.f32 %v964_v8, %v962_v50  ;;  %v490_v45 = vmul.f32 %v964_v8, %v487_v44  ;;  %v527_v51 = vld [vmem:[#allocation2 + $0x24] sm:$0x3]  ;;  %v578_v8 = vld [vmem:[#allocation2 + $0x2a] sm:$0x3] }
 0x236   :  { %v1139_v42 = vadd.f32 %v1137_v11, %v1129_v39  ;;  %v410_v24 = vadd.f32 %v409_v21, %v400_v38  ;;  %v937_v11 = vstv %s1260_s6  ;;  %v974_v13 = vmul.f32 %v973_v56, %v971_v37  ;;  %v980_v21 = vld [vmem:[#allocation2 + $0x2a] sm:$0x3]  ;;  %v537_v7 = vld [vmem:[#allocation2 + $0x25] sm:$0x3] }
 0x237   :  { %v1147_v41 = vpop.permute.xlu1 %1146  ;;  %v686_v46 = vpop.permute.xlu0 %685  ;;  %v903_v48 = vadd.f32 %v902_v43, %v894_v54  ;;  %v938_v39 = vmul.f32 %v937_v11, %v935_v31  ;;  %v459_v25 = vmul.f32 %v937_v11, %v456_v0  ;;  %v500_v38 = vmul.f32 %v973_v56, %v497_v12  ;;  %v547_v11 = vld [vmem:[#allocation2 + $0x26] sm:$0x3]  ;;  %v588_v56 = vld [vmem:[#allocation2 + $0x2b] sm:$0x3] }
 0x238   :  { %v1149_v53 = vadd.f32 %v1147_v41, %v1139_v42  ;;  %v688_v19 = vadd.f32 %v686_v46, %v678_v49  ;;  %v420_v4 = vadd.f32 %v419_v63, %v410_v24  ;;  %v946_v42 = vstv %s1261_s7  ;;  %v466_v49 = vld [vmem:[#allocation2 + $0x1d] sm:$0x3]  ;;  %v953_v46 = vld [vmem:[#allocation2 + $0x26] sm:$0x3]  ;;  %v989_v63 = vld [vmem:[#allocation2 + $0x2b] sm:$0x3] }
 0x239   :  { %v912_v28 = vadd.f32 %v911_v27, %v903_v48  ;;  %v947_v29 = vmul.f32 %v946_v42, %v944_v34  ;;  %v469_v41 = vmul.f32 %v946_v42, %v466_v49  ;;  %v956_v9 = vmul.f32 %v955_v55, %v953_v46  ;;  %v558_v42 = vld [vmem:[#allocation2 + $0x28] sm:$0x3] }
 0x23a   :  { %1157 = vperm.xlu1 %1444, %v1149_v53   ;;  %696 = vperm.xlu0 %1443, %v688_v19   ;;  %v430_v30 = vadd.f32 %v429_v3, %v420_v4  ;;  %v476_v53 = vld [vmem:[#allocation2 + $0x1e] sm:$0x3]  ;;  %v983_v54 = vmul.f32 %v982_v10, %v980_v21  ;;  %v510_v24 = vmul.f32 %v982_v10, %v507_v59  ;;  %v998_v3 = vld [vmem:[#allocation2 + $0x2c] sm:$0x3]  ;;  %v1000_v18 = vstv %s1267_s12 }
 0x23b   :  { %v921_v33 = vadd.f32 %v920_v52, %v912_v28  ;;  %v479_v47 = vmul.f32 %v955_v55, %v476_v53  ;;  %v992_v48 = vmul.f32 %v991_v62, %v989_v63  ;;  %v520_v4 = vmul.f32 %v991_v62, %v517_v1  ;;  %v568_v55 = vld [vmem:[#allocation2 + $0x29] sm:$0x3]  ;;  %v598_v10 = vld [vmem:[#allocation2 + $0x2c] sm:$0x3] }
 0x23c   :  { %v440_v14 = vadd.f32 %v439_v58, %v430_v30  ;;  %v1001_v28 = vmul.f32 %v1000_v18, %v998_v3  ;;  %v530_v30 = vmul.f32 %v1000_v18, %v527_v51  ;;  %v1007_v58 = vld [vmem:[#allocation2 + $0x2d] sm:$0x3]  ;;  %v1009_v36 = vstv %s1268_s13 }
 0x23d   :  { %v930_v60 = vadd.f32 %v929_v61, %v921_v33  ;;  %v1010_v33 = vmul.f32 %v1009_v36, %v1007_v58  ;;  %v1018_v31 = vstv %s1269_s14  ;;  %v1027_v34 = vstv %s1270_s0  ;;  %v608_v62 = vld [vmem:[#allocation2 + $0x2d] sm:$0x3] }
 0x23e   :  { %v450_v40 = vadd.f32 %v449_v22, %v440_v14  ;;  %v540_v14 = vmul.f32 %v1009_v36, %v537_v7  ;;  %v1016_v22 = vld [vmem:[#allocation2 + $0x2e] sm:$0x3]  ;;  %v1036_v46 = vstv %s1271_s16  ;;  %v1045_v50 = vstv %s1272_s18  ;;  %v629_v36 = vld [vmem:[#allocation2 + $0x30] sm:$0x3] }
 0x23f   :  { %v939_v16 = vadd.f32 %v938_v39, %v930_v60  ;;  %v1019_v60 = vmul.f32 %v1018_v31, %v1016_v22  ;;  %v1054_v37 = vstv %s1273_s19  ;;  %v1063_v21 = vstv %s1274_s21  ;;  %v618_v18 = vld [vmem:[#allocation2 + $0x2e] sm:$0x3] }
 0x240   :  { %v460_v26 = vadd.f32 %v459_v25, %v450_v40  ;;  %v550_v40 = vmul.f32 %v1018_v31, %v547_v11  ;;  %v1025_v25 = vld [vmem:[#allocation2 + $0x30] sm:$0x3]  ;;  %v1072_v63 = vstv %s1275_s23  ;;  %v1081_v3 = vstv %s1276_s25 }
 0x241   :  { %v948_v19 = vadd.f32 %v947_v29, %v939_v16  ;;  %v1028_v16 = vmul.f32 %v1027_v34, %v1025_v25  ;;  %v1092_v58 = vstv %s1277_s3  ;;  %v1102_v22 = vstv %s1278_s15  ;;  %v639_v31 = vld [vmem:[#allocation2 + $0x31] sm:$0x3] }
 0x242   :  { %v470_v32 = vadd.f32 %v469_v41, %v460_v26  ;;  %v561_v26 = vmul.f32 %v1027_v34, %v558_v42  ;;  %v1034_v41 = vld [vmem:[#allocation2 + $0x31] sm:$0x3]  ;;  %v1112_v25 = vstv %s1279_s17 }
 0x243   :  { %v957_v2 = vadd.f32 %v956_v9, %v948_v19  ;;  %v1037_v19 = vmul.f32 %v1036_v46, %v1034_v41  ;;  %v649_v34 = vld [vmem:[#allocation2 + $0x32] sm:$0x3]  ;;  %v1122_v41 = vstv %s1280_s1 }
 0x244   :  { %v480_v17 = vadd.f32 %v479_v47, %v470_v32  ;;  %v571_v32 = vmul.f32 %v1036_v46, %v568_v55  ;;  %v1043_v47 = vld [vmem:[#allocation2 + $0x32] sm:$0x3] }
 0x245   :  { %v966_v20 = vadd.f32 %v965_v23, %v957_v2  ;;  %v1046_v2 = vmul.f32 %v1045_v50, %v1043_v47  ;;  %v659_v46 = vld [vmem:[#allocation2 + $0x33] sm:$0x3]  ;;  %v1132_v47 = vstv %s1281_s20 }
 0x246   :  { %v491_v6 = vadd.f32 %v490_v45, %v480_v17  ;;  %v581_v17 = vmul.f32 %v1045_v50, %v578_v8  ;;  %v1052_v45 = vld [vmem:[#allocation2 + $0x33] sm:$0x3] }
 0x247   :  { %v975_v15 = vadd.f32 %v974_v13, %v966_v20  ;;  %v1055_v20 = vmul.f32 %v1054_v37, %v1052_v45  ;;  %v669_v50 = vld [vmem:[#allocation2 + $0x34] sm:$0x3]  ;;  %v1142_v45 = vstv %s1282_s22 }
 0x248   :  { %v501_v43 = vadd.f32 %v500_v38, %v491_v6  ;;  %v591_v6 = vmul.f32 %v1054_v37, %v588_v56  ;;  %v1061_v38 = vld [vmem:[#allocation2 + $0x34] sm:$0x3] }
 0x249   :  { %v984_v35 = vadd.f32 %v983_v54, %v975_v15  ;;  %v1064_v15 = vmul.f32 %v1063_v21, %v1061_v38  ;;  %v679_v37 = vld [vmem:[#allocation2 + $0x35] sm:$0x3]  ;;  %v1152_v38 = vstv %s1283_s24 }
 0x24a   :  { %v511_v27 = vadd.f32 %v510_v24, %v501_v43  ;;  %v601_v43 = vmul.f32 %v1063_v21, %v598_v10  ;;  %v1070_v24 = vld [vmem:[#allocation2 + $0x35] sm:$0x3] }
 0x24b   :  { %v993_v5 = vadd.f32 %v992_v48, %v984_v35  ;;  %v1073_v35 = vmul.f32 %v1072_v63, %v1070_v24  ;;  %v689_v21 = vld [vmem:[#allocation2 + $0x36] sm:$0x3] }
 0x24c   :  { %v521_v52 = vadd.f32 %v520_v4, %v511_v27  ;;  %v611_v27 = vmul.f32 %v1072_v63, %v608_v62  ;;  %v1079_v4 = vld [vmem:[#allocation2 + $0x36] sm:$0x3]  ;;  %v700_v63 = vstv %s2074_s4  ;;  %s1465_s4 = scalar_lea.vmem %s1176_s29, 64 }
 0x24d   :  { %v1002_v57 = vadd.f32 %v1001_v28, %v993_v5  ;;  %v1082_v5 = vmul.f32 %v1081_v3, %v1079_v4  ;;  %p1466_p5 = scmp.ne.s32.totalorder %s1176_s29, %s1465_s4  ;;  %p1471_p7 = scmp.lt.s32.totalorder %s1465_s4, %s1465_s4 }
 0x24e   :  { %v531_v61 = vadd.f32 %v530_v30, %v521_v52  ;;  %v621_v52 = vmul.f32 %v1081_v3, %v618_v18  ;;  %v1090_v30 = vld [vmem:[#allocation2 + $0x38] sm:$0x3] }
 0x24f   :  { %v1011_v0 = vadd.f32 %v1010_v33, %v1002_v57  ;;  %v1093_v57 = vmul.f32 %v1092_v58, %v1090_v30  ;;  %p1472_p8 = por %p1471_p7, %p1470_p6 }
 0x250   :  { %v541_v39 = vadd.f32 %v540_v14, %v531_v61  ;;  %v632_v61 = vmul.f32 %v1092_v58, %v629_v36  ;;  %v1100_v14 = vld [vmem:[#allocation2 + $0x39] sm:$0x3] }
 0x251   :  { %v1020_v49 = vadd.f32 %v1019_v60, %v1011_v0  ;;  %v1103_v0 = vmul.f32 %v1102_v22, %v1100_v14  ;;  %p1473_p9 = pnand %p1472_p8, %p1466_p5 }
 0x252   :  { %v551_v29 = vadd.f32 %v550_v40, %v541_v39  ;;  %v642_v39 = vmul.f32 %v1102_v22, %v639_v31  ;;  %v1110_v40 = vld [vmem:[#allocation2 + $0x3a] sm:$0x3] }
 0x253   :  { %v1029_v53 = vadd.f32 %v1028_v16, %v1020_v49  ;;  %v1113_v49 = vmul.f32 %v1112_v25, %v1110_v40 }
 0x254   :  { %v562_v9 = vadd.f32 %v561_v26, %v551_v29  ;;  %v652_v29 = vmul.f32 %v1112_v25, %v649_v34  ;;  %v1120_v26 = vld [vmem:[#allocation2 + $0x3b] sm:$0x3] }
 0x255   :  { %v1038_v44 = vadd.f32 %v1037_v19, %v1029_v53  ;;  %v1123_v53 = vmul.f32 %v1122_v41, %v1120_v26 }
 0x256   :  { %v572_v23 = vadd.f32 %v571_v32, %v562_v9  ;;  %v662_v9 = vmul.f32 %v1122_v41, %v659_v46  ;;  %v1130_v32 = vld [vmem:[#allocation2 + $0x3c] sm:$0x3] }
 0x257   :  { %v1047_v12 = vadd.f32 %v1046_v2, %v1038_v44  ;;  %v1133_v44 = vmul.f32 %v1132_v47, %v1130_v32 }
 0x258   :  { %v582_v13 = vadd.f32 %v581_v17, %v572_v23  ;;  %v672_v23 = vmul.f32 %v1132_v47, %v669_v50  ;;  %v1140_v17 = vld [vmem:[#allocation2 + $0x3d] sm:$0x3] }
 0x259   :  { %v1056_v59 = vadd.f32 %v1055_v20, %v1047_v12  ;;  %v1143_v12 = vmul.f32 %v1142_v45, %v1140_v17 }
 0x25a   :  { %v592_v54 = vadd.f32 %v591_v6, %v582_v13  ;;  %v682_v13 = vmul.f32 %v1142_v45, %v679_v37  ;;  %v1150_v6 = vld [vmem:[#allocation2 + $0x3e] sm:$0x3] }
 0x25b   :  { %v1065_v1 = vadd.f32 %v1064_v15, %v1056_v59  ;;  %v1153_v59 = vmul.f32 %v1152_v38, %v1150_v6 }
 0x25c   :  { %v602_v48 = vadd.f32 %v601_v43, %v592_v54  ;;  %v692_v54 = vmul.f32 %v1152_v38, %v689_v21 }
 0x25d   :  { %v1074_v51 = vadd.f32 %v1073_v35, %v1065_v1 }
 0x25e   :  { %v612_v28 = vadd.f32 %v611_v27, %v602_v48 }
 0x25f   :  { %v1083_v7 = vadd.f32 %v1082_v5, %v1074_v51 }
 0x260   :  { %v622_v33 = vadd.f32 %v621_v52, %v612_v28 }
 0x261   :  { %v1094_v11 = vadd.f32 %v1093_v57, %v1083_v7 }
 0x262   :  { %v633_v60 = vadd.f32 %v632_v61, %v622_v33 }
 0x263   :  { %v1104_v42 = vadd.f32 %v1103_v0, %v1094_v11 }
 0x264   :  { %v643_v16 = vadd.f32 %v642_v39, %v633_v60 }
 0x265   :  { %v1114_v55 = vadd.f32 %v1113_v49, %v1104_v42 }
 0x266   :  { %v653_v19 = vadd.f32 %v652_v29, %v643_v16 }
 0x267   :  { %v1124_v8 = vadd.f32 %v1123_v53, %v1114_v55 }
 0x268   :  { %v663_v2 = vadd.f32 %v662_v9, %v653_v19 }
 0x269   :  { %v1134_v56 = vadd.f32 %v1133_v44, %v1124_v8 }
 0x26a   :  { %v673_v20 = vadd.f32 %v672_v23, %v663_v2 }
 0x26b   :  { %v1144_v10 = vadd.f32 %v1143_v12, %v1134_v56 }
 0x26c   :  { %v683_v15 = vadd.f32 %v682_v13, %v673_v20 }
 0x26d   :  { %v1154_v43 = vadd.f32 %v1153_v59, %v1144_v10 }
 0x26e   :  { %v693_v24 = vadd.f32 %v692_v54, %v683_v15 }
 0x2b9   :  { %v1158_v62 = vpop.permute.xlu1 %1157  ;;  %v697_v1 = vpop.permute.xlu0 %696 }
 0x2ba   :  { %v1160_v35 = vadd.f32 %v1158_v62, %v1154_v43  ;;  %v699_v48 = vadd.f32 %v697_v1, %v693_v24 }
 0x2bc   :  { %v1161_v27 = vadd.f32 %v1160_v35, %v700_v63  ;;  %v701_v4 = vadd.f32 %v700_v63, %v699_v48 }
 0x2be   :  { %v1284_v3 = vmul.f32 -1.442695, %v1161_v27  ;;  %v1235_v18 = vmul.f32 -1.442695, %v701_v4 }
 0x2c0   :  { %1445 = vpow2.f32 %v1284_v3 }
 0x2c1   :  { %1447 = vpow2.f32 %v1235_v18 }
 0x2ca   :  { %v1446_v51 = vpop.eup %1445 }
 0x2cb   :  { %v1448_v5 = vpop.eup %1447  ;;  %v1165_v28 = vadd.f32 1.0, %v1446_v51 }
 0x2cc   :  { %v705_v52 = vadd.f32 1.0, %v1448_v5 }
 0x2cd   :  { %1449 = vrcp.f32 %v1165_v28 }
 0x2ce   :  { %1451 = vrcp.f32 %v705_v52 }
 0x2d7   :  { %v1450_v30 = vpop.eup %1449 }
 0x2d8   :  { %v1452_v58 = vpop.eup %1451  ;;  %1169 = vst [vmem:[#allocation7 + $0x2] sm:$0x3] %v1450_v30 }
 0x2d9   :  { %708 = vst [vmem:[#allocation7] sm:$0x3] %v1452_v58 }
 0x2da   :  { %1476 = shalt.err (!%p1473_p9)
}
 0x2db   :  { %s1477_s7 = scalar_lea.hbm %s2075_s5, 64 }
 0x2dc   :  { %p1478_p10 = scmp.ne.s32.totalorder %s2075_s5, %s1477_s7  ;;  %p1481_p11 = scmp.lt.u32.totalorder %s1477_s7, %s2075_s5 }
 0x2de   :  { %p1483_p12 = pnand %p1481_p11, %p1478_p10 }
 0x2e0   :  { %1486 = shalt.err (!%p1483_p12)
}
 0x2e1   :  { %s1543_s11 = smov 32   ;;  %s1544_s12 = smov 2  }
 0x2e2   :  { %1181 = dma.vmem_to_hbm [thread:$0]  %s1176_s29, 64, %s2075_s5, [#allocation5], %s1543_s11, %s1543_s11, %s1544_s12  }
 0x2e3   :  { %1489 = dma.done.wait [#allocation5], 64  }
 0x2e4   :  { %1490 = vsyncadd [#allocation5], 4294967232 }
 0x2e5   :  { %1185 = vsyncpa [#allocation5], 1 }
 0x2e6   :  { %1186 = vsyncpa [#allocation6], 1 }

</bundles_post_ra>
